<compile_context>
chip_gen: v7x
topology: tpu7x:2x2x1
jax: 0.10.0
libtpu: 0.0.40
codegen_flags: <defaults>
</compile_context>

<pallas_src>
import jax
import jax.numpy as jnp
from jax.experimental import pallas as pl
from jax.experimental.pallas import tpu as pltpu


# ----------------------------- helpers -----------------------------

def _pad128(n: int) -> int:
    return ((n + 127) // 128) * 128


def _pad2d(w, rows, cols):
    return jnp.pad(w, ((0, rows - w.shape[0]), (0, cols - w.shape[1])))


def _device_vmem_bytes() -> int:
    try:
        return int(pltpu.get_tpu_info().vmem_capacity_bytes)
    except Exception:
        return 64 << 20  # conservative default (v7x per-TensorCore VMEM)


def _pick_tb(B: int) -> int:
    if B <= 128:
        return max(16, ((B + 15) // 16) * 16)  # bf16 LHS packs 16 rows per vreg
    if B < 512:
        return 128  # keeps >= 2 grid steps for B >= 256 -> both v7x cores busy
    return 256      # amortize pipeline per-step overhead / 256-wide MXU


# ----------------------------- kernel -----------------------------

def _make_kernel(widths_list):
    """widths_list: per modality, 8 padded output widths in order
       (enc_h1, enc_h2, enc_h3, K, dec_h1, dec_h2, dec_h3, D), all multiples of 128."""
    n_mod = len(widths_list)

    def kernel(*refs):
        x_refs = refs[:n_mod]
        y_ref = refs[n_mod]
        w_refs = refs[n_mod + 1:n_mod + 1 + 10 * n_mod]
        bias_ref = refs[n_mod + 1 + 10 * n_mod]
        out_refs = refs[n_mod + 2 + 10 * n_mod:]   # per modality: (z_ref, xhat_ref)

        f32, bf16 = jnp.float32, jnp.bfloat16
        y_bf = y_ref[...]  # one-hot labels, already bf16 (exact)

        def W(m, j):
            return w_refs[10 * m + j][...]

        def bias(m, i):
            r = 8 * m + i
            return bias_ref[r:r + 1, :widths_list[m][i]]  # (1, out_pad) static slice

        # torch.nan_to_num(x, nan=0, posinf=0, neginf=0) then cast to bf16 MXU operand.
        h = []
        for m in range(n_mod):
            x = x_refs[m][...]
            h.append(jnp.where(jnp.isfinite(x), x, 0.0).astype(bf16))

        # ---- encoder_mlp layer 0: split matmul replaces concat([x, y], -1) @ W ----
        for m in range(n_mod):
            o = (jnp.dot(h[m], W(m, 0), preferred_element_type=f32)
                 + jnp.dot(y_bf, W(m, 1), preferred_element_type=f32)
                 + bias(m, 0))
            h[m] = jnp.maximum(o, 0.0).astype(bf16)   # bf16 carry between layers
        # ---- encoder_mlp layer 1 (+ReLU) ----
        for m in range(n_mod):
            o = jnp.dot(h[m], W(m, 2), preferred_element_type=f32) + bias(m, 1)
            h[m] = jnp.maximum(o, 0.0).astype(bf16)
        # ---- encoder_mlp layer 2 (no ReLU) ----
        for m in range(n_mod):
            o = jnp.dot(h[m], W(m, 3), preferred_element_type=f32) + bias(m, 2)
            h[m] = o.astype(bf16)
        # ---- encoder_loc ----
        z = [None] * n_mod
        for m in range(n_mod):
            zloc = jnp.dot(h[m], W(m, 4), preferred_element_type=f32) + bias(m, 3)
            out_refs[2 * m][...] = zloc
            z[m] = zloc.astype(bf16)
        # ---- decoder_mlp layer 0: split matmul replaces concat([z, y], -1) @ W ----
        for m in range(n_mod):
            o = (jnp.dot(z[m], W(m, 5), preferred_element_type=f32)
                 + jnp.dot(y_bf, W(m, 6), preferred_element_type=f32)
                 + bias(m, 4))
            h[m] = jnp.maximum(o, 0.0).astype(bf16)
        # ---- decoder_mlp layer 1 (+ReLU) ----
        for m in range(n_mod):
            o = jnp.dot(h[m], W(m, 7), preferred_element_type=f32) + bias(m, 5)
            h[m] = jnp.maximum(o, 0.0).astype(bf16)
        # ---- decoder_mlp layer 2 (no ReLU) ----
        for m in range(n_mod):
            o = jnp.dot(h[m], W(m, 8), preferred_element_type=f32) + bias(m, 6)
            h[m] = o.astype(bf16)
        # ---- decoder_loc ----
        for m in range(n_mod):
            out_refs[2 * m + 1][...] = (
                jnp.dot(h[m], W(m, 9), preferred_element_type=f32) + bias(m, 7))

    return kernel


# ----------------------------- wrapper -----------------------------

def multimod_forward(xcal, xrna, y, params):
    """Mirrors MultiModSupMlpVAE_v0.forward for a single batch.
    params: dict with 'enc_cal', 'dec_cal', 'enc_rna', 'dec_rna', each a list of 4
    (W[in, out], b[out]) tuples (3 MLP layers + 1 loc layer)."""
    B, CalD = xcal.shape
    RnaD = xrna.shape[1]
    NS = y.shape[1]
    K = params["enc_cal"][-1][0].shape[1]
    NSp, Kp = _pad128(NS), _pad128(K)
    bf = jnp.bfloat16

    def prep(x, enc, dec, D):
        """Pad to 128-multiples, split first-layer weights, cast to bf16."""
        Dp = _pad128(D)
        (w0, b0), (w1, b1), (w2, b2), (wl, bl) = enc
        (v0, c0), (v1, c1), (v2, c2), (vl, cl) = dec
        H1p, H2p, H3p = _pad128(w0.shape[1]), _pad128(w1.shape[1]), _pad128(w2.shape[1])
        G1p, G2p, G3p = _pad128(v0.shape[1]), _pad128(v1.shape[1]), _pad128(v2.shape[1])
        widths = (H1p, H2p, H3p, Kp, G1p, G2p, G3p, Dp)
        weights = [
            _pad2d(w0[:D], Dp, H1p).astype(bf),          # x-rows of enc layer 0
            _pad2d(w0[D:D + NS], NSp, H1p).astype(bf),   # y-rows of enc layer 0
            _pad2d(w1, H1p, H2p).astype(bf),
            _pad2d(w2, H2p, H3p).astype(bf),
            _pad2d(wl, H3p, Kp).astype(bf),
            _pad2d(v0[:K], Kp, G1p).astype(bf),          # z-rows of dec layer 0
            _pad2d(v0[K:K + NS], NSp, G1p).astype(bf),   # y-rows of dec layer 0
            _pad2d(v1, G1p, G2p).astype(bf),
            _pad2d(v2, G2p, G3p).astype(bf),
            _pad2d(vl, G3p, Dp).astype(bf),
        ]
        biases = [b0, b1, b2, bl, c0, c1, c2, cl]
        return dict(x=x, D=D, Dp=Dp, weights=weights, biases=biases, widths=widths)

    mods = [prep(xcal, params["enc_cal"], params["dec_cal"], CalD),
            prep(xrna, params["enc_rna"], params["dec_rna"], RnaD)]

    TB = _pick_tb(B)
    Bp = ((B + TB - 1) // TB) * TB
    grid = (Bp // TB,)

    y_p = jnp.pad(y.astype(bf), ((0, Bp - B), (0, NSp - NS)))

    vmem_cap = _device_vmem_bytes()
    budget = vmem_cap - (8 << 20)

    def group_bytes(group, buffers):
        param = sum(int(w.size) * 2 for m in group for w in m["weights"])
        bias_b = 8 * len(group) * max(max(m["widths"]) for m in group) * 4
        tiles = (sum(8 * TB * m["Dp"] + 4 * TB * Kp for m in group)  # f32 x in + xhat, z out
                 + 2 * TB * NSp)                                      # bf16 y in
        return buffers * param + bias_b + 2 * tiles + (4 << 20)       # 2x = pipelined tiles

    # One fused call (both modalities share the y tile) when resident weights fit;
    # otherwise one call per modality halves residency.
    groups = [mods] if group_bytes(mods, 1) <= budget else [[m] for m in mods]

    def run_group(group, buffers):
        Lmax = max(max(m["widths"]) for m in group)
        bias_pack = jnp.stack(
            [jnp.pad(b.astype(jnp.float32), (0, Lmax - b.shape[0]))
             for m in group for b in m["biases"]], axis=0)
        xs = [jnp.pad(m["x"].astype(jnp.float32),
                      ((0, Bp - B), (0, m["Dp"] - m["D"]))) for m in group]
        weights = [w for m in group for w in m["weights"]]

        if buffers == 1:
            def res(shape):  # invariant block: single buffer, never re-DMA'd
                return pl.BlockSpec(shape, lambda i: (0, 0), pipeline_mode=pl.Buffered(1))
        else:
            def res(shape):
                return pl.BlockSpec(shape, lambda i: (0, 0))

        in_specs = ([pl.BlockSpec((TB, m["Dp"]), lambda i: (i, 0)) for m in group]
                    + [pl.BlockSpec((TB, NSp), lambda i: (i, 0))]
                    + [res(w.shape) for w in weights]
                    + [res(bias_pack.shape)])
        out_shape, out_specs = [], []
        for m in group:
            out_shape += [jax.ShapeDtypeStruct((Bp, Kp), jnp.float32),
                          jax.ShapeDtypeStruct((Bp, m["Dp"]), jnp.float32)]
            out_specs += [pl.BlockSpec((TB, Kp), lambda i: (i, 0)),
                          pl.BlockSpec((TB, m["Dp"]), lambda i: (i, 0))]

        flops = sum(2 * Bp * w.shape[0] * w.shape[1] for w in weights)
        bytes_accessed = (sum(int(a.size) * a.dtype.itemsize
                              for a in xs + [y_p] + weights + [bias_pack])
                          + sum(int(s.size) * 4 for s in out_shape))
        vmem_limit = int(min(max(group_bytes(group, buffers), 32 << 20),
                             vmem_cap - (4 << 20)))

        kernel = _make_kernel([m["widths"] for m in group])
        return pl.pallas_call(
            kernel,
            out_shape=tuple(out_shape),
            grid=grid,
            in_specs=in_specs,
            out_specs=tuple(out_specs),
            compiler_params=pltpu.CompilerParams(
                dimension_semantics=("parallel",),
                vmem_limit_bytes=vmem_limit),
            cost_estimate=pl.CostEstimate(flops=int(flops), transcendentals=0,
                                          bytes_accessed=int(bytes_accessed)),
        )(*xs, y_p, *weights, bias_pack)

    def run_group_safe(group):
        # Prefer single-buffered resident weights (halves their VMEM footprint); fall back
        # to the default pipeline if this jax build rejects pipeline_mode here.
        try:
            return run_group(group, 1)
        except Exception:
            return run_group(group, 2)

    outs = []
    for g in groups:
        outs.extend(run_group_safe(g))
    zc_p, xc_p, zr_p, xr_p = outs[0], outs[1], outs[2], outs[3]

    # slice padding away (pure layout plumbing)
    return (zc_p[:B, :K], xc_p[:B, :CalD], zr_p[:B, :K], xr_p[:B, :RnaD])


# ------------- parameter construction (deterministic, PyTorch-like init) -------------

def _linear_params(key, fan_in, fan_out):
    kw, kb = jax.random.split(key)
    bound = 1.0 / jnp.sqrt(jnp.float32(fan_in))
    w = jax.random.uniform(kw, (fan_in, fan_out), jnp.float32, -bound, bound)
    b = jax.random.uniform(kb, (fan_out,), jnp.float32, -bound, bound)
    return w, b


def make_multimod_params(key, CalD, RnaD, NS, K):
    def make_stack(key, dims):
        layers = []
        for i in range(len(dims) - 1):
            key, sub = jax.random.split(key)
            layers.append(_linear_params(sub, dims[i], dims[i + 1]))
        return key, layers

    params = {}
    key, params["enc_cal"] = make_stack(key, [CalD + NS, (CalD + NS) // 2, 4 * K, 2 * K, K])
    key, params["dec_cal"] = make_stack(key, [K + NS, CalD // 8, CalD // 4, CalD // 2, CalD])
    key, params["enc_rna"] = make_stack(key, [RnaD + NS, (RnaD + NS) // 2, 4 * K, 2 * K, K])
    key, params["dec_rna"] = make_stack(key, [K + NS, RnaD // 8, RnaD // 4, RnaD // 2, RnaD])
    return params


# --------------------- pure-JAX reference (same bf16-matmul scheme) ---------------------

def reference_forward(xcal, xrna, y, params):
    def nan0(x):
        return jnp.where(jnp.isfinite(x), x, 0.0)

    def mm(h, w):
        return jnp.dot(h.astype(jnp.bfloat16), w.astype(jnp.bfloat16),
                       preferred_element_type=jnp.float32)

    def run(x, enc, dec):
        (w0, b0), (w1, b1), (w2, b2), (wl, bl) = enc
        (v0, c0), (v1, c1), (v2, c2), (vl, cl) = dec
        h = jnp.concatenate([nan0(x), y], axis=-1)
        h = jnp.maximum(mm(h, w0) + b0, 0.0)
        h = jnp.maximum(mm(h, w1) + b1, 0.0)
        h = mm(h, w2) + b2
        z = mm(h, wl) + bl
        h = jnp.concatenate([z, y], axis=-1)
        h = jnp.maximum(mm(h, v0) + c0, 0.0)
        h = jnp.maximum(mm(h, v1) + c1, 0.0)
        h = mm(h, v2) + c2
        return z, mm(h, vl) + cl

    zc, xc = run(xcal, params["enc_cal"], params["dec_cal"])
    zr, xr = run(xrna, params["enc_rna"], params["dec_rna"])
    return zc, xc, zr, xr


if __name__ == "__main__":
    # Small shapes consistent with the module's __init__ constraints.
    B, CalD, RnaD, NS, K = 8, 64, 32, 8, 8

    key = jax.random.PRNGKey(0)
    kp, kx1, kx2, ky = jax.random.split(key, 4)

    params = make_multimod_params(kp, CalD, RnaD, NS, K)

    xcal = jax.random.normal(kx1, (B, CalD), jnp.float32)
    # inject a NaN and an inf to exercise the nan_to_num path
    xcal = xcal.at[0, 0].set(jnp.nan).at[1, 1].set(jnp.inf)
    xrna = jax.random.normal(kx2, (B, RnaD), jnp.float32)

    labels = jax.random.randint(ky, (B,), 0, NS)
    y = jax.nn.one_hot(labels, NS, dtype=jnp.float32)

    zloc_cal, xhat_cal, zloc_rna, xhat_rna = multimod_forward(xcal, xrna, y, params)
    jax.block_until_ready((zloc_cal, xhat_cal, zloc_rna, xhat_rna))

    assert zloc_cal.shape == (B, K) and xhat_cal.shape == (B, CalD)
    assert zloc_rna.shape == (B, K) and xhat_rna.shape == (B, RnaD)
    assert bool(jnp.all(jnp.isfinite(zloc_cal))) and bool(jnp.all(jnp.isfinite(xhat_cal)))
    assert bool(jnp.all(jnp.isfinite(zloc_rna))) and bool(jnp.all(jnp.isfinite(xhat_rna)))

    # check against a pure-JAX reference using the same bf16-operand / f32-accum scheme
    rzc, rxc, rzr, rxr = reference_forward(xcal, xrna, y, params)
    for got, ref in ((zloc_cal, rzc), (xhat_cal, rxc), (zloc_rna, rzr), (xhat_rna, rxr)):
        assert jnp.allclose(got, ref, atol=1e-2, rtol=1e-2), \
            float(jnp.max(jnp.abs(got - ref)))

    print("KERNEL_OK")
</pallas_src>

<mosaic_0001>
module attributes {stable_mosaic.version = 11 : i64} {
  func.func @kernel(%arg0: i32, %arg1: memref<16x128xf32, #tpu.memory_space<vmem>>, %arg2: memref<16x128xf32, #tpu.memory_space<vmem>>, %arg3: memref<16x128xbf16, #tpu.memory_space<vmem>>, %arg4: memref<128x128xbf16, #tpu.memory_space<vmem>>, %arg5: memref<128x128xbf16, #tpu.memory_space<vmem>>, %arg6: memref<128x128xbf16, #tpu.memory_space<vmem>>, %arg7: memref<128x128xbf16, #tpu.memory_space<vmem>>, %arg8: memref<128x128xbf16, #tpu.memory_space<vmem>>, %arg9: memref<128x128xbf16, #tpu.memory_space<vmem>>, %arg10: memref<128x128xbf16, #tpu.memory_space<vmem>>, %arg11: memref<128x128xbf16, #tpu.memory_space<vmem>>, %arg12: memref<128x128xbf16, #tpu.memory_space<vmem>>, %arg13: memref<128x128xbf16, #tpu.memory_space<vmem>>, %arg14: memref<128x128xbf16, #tpu.memory_space<vmem>>, %arg15: memref<128x128xbf16, #tpu.memory_space<vmem>>, %arg16: memref<128x128xbf16, #tpu.memory_space<vmem>>, %arg17: memref<128x128xbf16, #tpu.memory_space<vmem>>, %arg18: memref<128x128xbf16, #tpu.memory_space<vmem>>, %arg19: memref<128x128xbf16, #tpu.memory_space<vmem>>, %arg20: memref<128x128xbf16, #tpu.memory_space<vmem>>, %arg21: memref<128x128xbf16, #tpu.memory_space<vmem>>, %arg22: memref<128x128xbf16, #tpu.memory_space<vmem>>, %arg23: memref<128x128xbf16, #tpu.memory_space<vmem>>, %arg24: memref<16x128xf32, #tpu.memory_space<vmem>>, %arg25: memref<16x128xf32, #tpu.memory_space<vmem>>, %arg26: memref<16x128xf32, #tpu.memory_space<vmem>>, %arg27: memref<16x128xf32, #tpu.memory_space<vmem>>, %arg28: memref<16x128xf32, #tpu.memory_space<vmem>>) attributes {dimension_semantics = [#tpu.dimension_semantics<parallel>], iteration_bounds = array<i64: 1>, scalar_prefetch = 0 : i64, scratch_operands = 0 : i64, tpu.core_type = #tpu.core_type<tc>, window_params = [{transform_indices = @transform_0, window_bounds = array<i64: 16, 128>}, {transform_indices = @transform_1, window_bounds = array<i64: 16, 128>}, {transform_indices = @transform_2, window_bounds = array<i64: 16, 128>}, {pipeline_mode = #tpu.pipeline_mode<synchronous>, transform_indices = @transform_3, window_bounds = array<i64: 128, 128>}, {pipeline_mode = #tpu.pipeline_mode<synchronous>, transform_indices = @transform_4, window_bounds = array<i64: 128, 128>}, {pipeline_mode = #tpu.pipeline_mode<synchronous>, transform_indices = @transform_5, window_bounds = array<i64: 128, 128>}, {pipeline_mode = #tpu.pipeline_mode<synchronous>, transform_indices = @transform_6, window_bounds = array<i64: 128, 128>}, {pipeline_mode = #tpu.pipeline_mode<synchronous>, transform_indices = @transform_7, window_bounds = array<i64: 128, 128>}, {pipeline_mode = #tpu.pipeline_mode<synchronous>, transform_indices = @transform_8, window_bounds = array<i64: 128, 128>}, {pipeline_mode = #tpu.pipeline_mode<synchronous>, transform_indices = @transform_9, window_bounds = array<i64: 128, 128>}, {pipeline_mode = #tpu.pipeline_mode<synchronous>, transform_indices = @transform_10, window_bounds = array<i64: 128, 128>}, {pipeline_mode = #tpu.pipeline_mode<synchronous>, transform_indices = @transform_11, window_bounds = array<i64: 128, 128>}, {pipeline_mode = #tpu.pipeline_mode<synchronous>, transform_indices = @transform_12, window_bounds = array<i64: 128, 128>}, {pipeline_mode = #tpu.pipeline_mode<synchronous>, transform_indices = @transform_13, window_bounds = array<i64: 128, 128>}, {pipeline_mode = #tpu.pipeline_mode<synchronous>, transform_indices = @transform_14, window_bounds = array<i64: 128, 128>}, {pipeline_mode = #tpu.pipeline_mode<synchronous>, transform_indices = @transform_15, window_bounds = array<i64: 128, 128>}, {pipeline_mode = #tpu.pipeline_mode<synchronous>, transform_indices = @transform_16, window_bounds = array<i64: 128, 128>}, {pipeline_mode = #tpu.pipeline_mode<synchronous>, transform_indices = @transform_17, window_bounds = array<i64: 128, 128>}, {pipeline_mode = #tpu.pipeline_mode<synchronous>, transform_indices = @transform_18, window_bounds = array<i64: 128, 128>}, {pipeline_mode = #tpu.pipeline_mode<synchronous>, transform_indices = @transform_19, window_bounds = array<i64: 128, 128>}, {pipeline_mode = #tpu.pipeline_mode<synchronous>, transform_indices = @transform_20, window_bounds = array<i64: 128, 128>}, {pipeline_mode = #tpu.pipeline_mode<synchronous>, transform_indices = @transform_21, window_bounds = array<i64: 128, 128>}, {pipeline_mode = #tpu.pipeline_mode<synchronous>, transform_indices = @transform_22, window_bounds = array<i64: 128, 128>}, {pipeline_mode = #tpu.pipeline_mode<synchronous>, transform_indices = @transform_23, window_bounds = array<i64: 16, 128>}, {transform_indices = @transform_24, window_bounds = array<i64: 16, 128>}, {transform_indices = @transform_25, window_bounds = array<i64: 16, 128>}, {transform_indices = @transform_26, window_bounds = array<i64: 16, 128>}, {transform_indices = @transform_27, window_bounds = array<i64: 16, 128>}]} {
    %c0 = arith.constant 0 : index
    %c0_0 = arith.constant 0 : index
    %0 = vector.load %arg3[%c0, %c0_0] : memref<16x128xbf16, #tpu.memory_space<vmem>>, vector<16x128xbf16>
    %c0_1 = arith.constant 0 : index
    %c0_2 = arith.constant 0 : index
    %1 = vector.load %arg1[%c0_1, %c0_2] : memref<16x128xf32, #tpu.memory_space<vmem>>, vector<16x128xf32>
    %2 = tpu.weird %1 : vector<16x128xf32> -> vector<16x128xi1>
    %cst = arith.constant dense<true> : vector<16x128xi1>
    %3 = arith.xori %2, %cst : vector<16x128xi1>
    %cst_3 = arith.constant 0.000000e+00 : f32
    %4 = vector.broadcast %cst_3 : f32 to vector<16x128xf32>
    %5 = arith.select %3, %1, %4 : vector<16x128xi1>, vector<16x128xf32>
    %6 = arith.truncf %5 : vector<16x128xf32> to vector<16x128xbf16>
    %c0_4 = arith.constant 0 : index
    %c0_5 = arith.constant 0 : index
    %7 = vector.load %arg2[%c0_4, %c0_5] : memref<16x128xf32, #tpu.memory_space<vmem>>, vector<16x128xf32>
    %8 = tpu.weird %7 : vector<16x128xf32> -> vector<16x128xi1>
    %cst_6 = arith.constant dense<true> : vector<16x128xi1>
    %9 = arith.xori %8, %cst_6 : vector<16x128xi1>
    %cst_7 = arith.constant 0.000000e+00 : f32
    %10 = vector.broadcast %cst_7 : f32 to vector<16x128xf32>
    %11 = arith.select %9, %7, %10 : vector<16x128xi1>, vector<16x128xf32>
    %12 = arith.truncf %11 : vector<16x128xf32> to vector<16x128xbf16>
    %c0_8 = arith.constant 0 : index
    %c0_9 = arith.constant 0 : index
    %13 = vector.load %arg4[%c0_8, %c0_9] : memref<128x128xbf16, #tpu.memory_space<vmem>>, vector<128x128xbf16>
    %cst_10 = arith.constant dense<0.000000e+00> : vector<16x128xf32>
    %14 = tpu.matmul %6, %13, %cst_10 {dimension_numbers = #tpu.dot_dimension_numbers<[1], [0], [0], [1], [0, 0, 1, 1], [], []>} : vector<16x128xbf16>, vector<128x128xbf16>, vector<16x128xf32> -> vector<16x128xf32>
    %c0_11 = arith.constant 0 : index
    %c0_12 = arith.constant 0 : index
    %15 = vector.load %arg5[%c0_11, %c0_12] : memref<128x128xbf16, #tpu.memory_space<vmem>>, vector<128x128xbf16>
    %cst_13 = arith.constant dense<0.000000e+00> : vector<16x128xf32>
    %16 = tpu.matmul %0, %15, %cst_13 {dimension_numbers = #tpu.dot_dimension_numbers<[1], [0], [0], [1], [0, 0, 1, 1], [], []>} : vector<16x128xbf16>, vector<128x128xbf16>, vector<16x128xf32> -> vector<16x128xf32>
    %17 = arith.addf %14, %16 : vector<16x128xf32>
    %c0_14 = arith.constant 0 : index
    %c0_15 = arith.constant 0 : index
    %18 = vector.load %arg24[%c0_14, %c0_15] : memref<16x128xf32, #tpu.memory_space<vmem>>, vector<1x128xf32>
    %19 = vector.broadcast %18 : vector<1x128xf32> to vector<16x128xf32>
    %20 = arith.addf %17, %19 : vector<16x128xf32>
    %cst_16 = arith.constant 0.000000e+00 : f32
    %21 = vector.broadcast %cst_16 : f32 to vector<16x128xf32>
    %22 = arith.maximumf %20, %21 : vector<16x128xf32>
    %23 = arith.truncf %22 : vector<16x128xf32> to vector<16x128xbf16>
    %c0_17 = arith.constant 0 : index
    %c0_18 = arith.constant 0 : index
    %24 = vector.load %arg14[%c0_17, %c0_18] : memref<128x128xbf16, #tpu.memory_space<vmem>>, vector<128x128xbf16>
    %cst_19 = arith.constant dense<0.000000e+00> : vector<16x128xf32>
    %25 = tpu.matmul %12, %24, %cst_19 {dimension_numbers = #tpu.dot_dimension_numbers<[1], [0], [0], [1], [0, 0, 1, 1], [], []>} : vector<16x128xbf16>, vector<128x128xbf16>, vector<16x128xf32> -> vector<16x128xf32>
    %c0_20 = arith.constant 0 : index
    %c0_21 = arith.constant 0 : index
    %26 = vector.load %arg15[%c0_20, %c0_21] : memref<128x128xbf16, #tpu.memory_space<vmem>>, vector<128x128xbf16>
    %cst_22 = arith.constant dense<0.000000e+00> : vector<16x128xf32>
    %27 = tpu.matmul %0, %26, %cst_22 {dimension_numbers = #tpu.dot_dimension_numbers<[1], [0], [0], [1], [0, 0, 1, 1], [], []>} : vector<16x128xbf16>, vector<128x128xbf16>, vector<16x128xf32> -> vector<16x128xf32>
    %28 = arith.addf %25, %27 : vector<16x128xf32>
    %c8 = arith.constant 8 : index
    %c0_23 = arith.constant 0 : index
    %29 = vector.load %arg24[%c8, %c0_23] : memref<16x128xf32, #tpu.memory_space<vmem>>, vector<1x128xf32>
    %30 = vector.broadcast %29 : vector<1x128xf32> to vector<16x128xf32>
    %31 = arith.addf %28, %30 : vector<16x128xf32>
    %cst_24 = arith.constant 0.000000e+00 : f32
    %32 = vector.broadcast %cst_24 : f32 to vector<16x128xf32>
    %33 = arith.maximumf %31, %32 : vector<16x128xf32>
    %34 = arith.truncf %33 : vector<16x128xf32> to vector<16x128xbf16>
    %c0_25 = arith.constant 0 : index
    %c0_26 = arith.constant 0 : index
    %35 = vector.load %arg6[%c0_25, %c0_26] : memref<128x128xbf16, #tpu.memory_space<vmem>>, vector<128x128xbf16>
    %cst_27 = arith.constant dense<0.000000e+00> : vector<16x128xf32>
    %36 = tpu.matmul %23, %35, %cst_27 {dimension_numbers = #tpu.dot_dimension_numbers<[1], [0], [0], [1], [0, 0, 1, 1], [], []>} : vector<16x128xbf16>, vector<128x128xbf16>, vector<16x128xf32> -> vector<16x128xf32>
    %c1 = arith.constant 1 : index
    %c0_28 = arith.constant 0 : index
    %37 = vector.load %arg24[%c1, %c0_28] : memref<16x128xf32, #tpu.memory_space<vmem>>, vector<1x128xf32>
    %38 = vector.broadcast %37 : vector<1x128xf32> to vector<16x128xf32>
    %39 = arith.addf %36, %38 : vector<16x128xf32>
    %cst_29 = arith.constant 0.000000e+00 : f32
    %40 = vector.broadcast %cst_29 : f32 to vector<16x128xf32>
    %41 = arith.maximumf %39, %40 : vector<16x128xf32>
    %42 = arith.truncf %41 : vector<16x128xf32> to vector<16x128xbf16>
    %c0_30 = arith.constant 0 : index
    %c0_31 = arith.constant 0 : index
    %43 = vector.load %arg16[%c0_30, %c0_31] : memref<128x128xbf16, #tpu.memory_space<vmem>>, vector<128x128xbf16>
    %cst_32 = arith.constant dense<0.000000e+00> : vector<16x128xf32>
    %44 = tpu.matmul %34, %43, %cst_32 {dimension_numbers = #tpu.dot_dimension_numbers<[1], [0], [0], [1], [0, 0, 1, 1], [], []>} : vector<16x128xbf16>, vector<128x128xbf16>, vector<16x128xf32> -> vector<16x128xf32>
    %c9 = arith.constant 9 : index
    %c0_33 = arith.constant 0 : index
    %45 = vector.load %arg24[%c9, %c0_33] : memref<16x128xf32, #tpu.memory_space<vmem>>, vector<1x128xf32>
    %46 = vector.broadcast %45 : vector<1x128xf32> to vector<16x128xf32>
    %47 = arith.addf %44, %46 : vector<16x128xf32>
    %cst_34 = arith.constant 0.000000e+00 : f32
    %48 = vector.broadcast %cst_34 : f32 to vector<16x128xf32>
    %49 = arith.maximumf %47, %48 : vector<16x128xf32>
    %50 = arith.truncf %49 : vector<16x128xf32> to vector<16x128xbf16>
    %c0_35 = arith.constant 0 : index
    %c0_36 = arith.constant 0 : index
    %51 = vector.load %arg7[%c0_35, %c0_36] : memref<128x128xbf16, #tpu.memory_space<vmem>>, vector<128x128xbf16>
    %cst_37 = arith.constant dense<0.000000e+00> : vector<16x128xf32>
    %52 = tpu.matmul %42, %51, %cst_37 {dimension_numbers = #tpu.dot_dimension_numbers<[1], [0], [0], [1], [0, 0, 1, 1], [], []>} : vector<16x128xbf16>, vector<128x128xbf16>, vector<16x128xf32> -> vector<16x128xf32>
    %c2 = arith.constant 2 : index
    %c0_38 = arith.constant 0 : index
    %53 = vector.load %arg24[%c2, %c0_38] : memref<16x128xf32, #tpu.memory_space<vmem>>, vector<1x128xf32>
    %54 = vector.broadcast %53 : vector<1x128xf32> to vector<16x128xf32>
    %55 = arith.addf %52, %54 : vector<16x128xf32>
    %56 = arith.truncf %55 : vector<16x128xf32> to vector<16x128xbf16>
    %c0_39 = arith.constant 0 : index
    %c0_40 = arith.constant 0 : index
    %57 = vector.load %arg17[%c0_39, %c0_40] : memref<128x128xbf16, #tpu.memory_space<vmem>>, vector<128x128xbf16>
    %cst_41 = arith.constant dense<0.000000e+00> : vector<16x128xf32>
    %58 = tpu.matmul %50, %57, %cst_41 {dimension_numbers = #tpu.dot_dimension_numbers<[1], [0], [0], [1], [0, 0, 1, 1], [], []>} : vector<16x128xbf16>, vector<128x128xbf16>, vector<16x128xf32> -> vector<16x128xf32>
    %c10 = arith.constant 10 : index
    %c0_42 = arith.constant 0 : index
    %59 = vector.load %arg24[%c10, %c0_42] : memref<16x128xf32, #tpu.memory_space<vmem>>, vector<1x128xf32>
    %60 = vector.broadcast %59 : vector<1x128xf32> to vector<16x128xf32>
    %61 = arith.addf %58, %60 : vector<16x128xf32>
    %62 = arith.truncf %61 : vector<16x128xf32> to vector<16x128xbf16>
    %c0_43 = arith.constant 0 : index
    %c0_44 = arith.constant 0 : index
    %63 = vector.load %arg8[%c0_43, %c0_44] : memref<128x128xbf16, #tpu.memory_space<vmem>>, vector<128x128xbf16>
    %cst_45 = arith.constant dense<0.000000e+00> : vector<16x128xf32>
    %64 = tpu.matmul %56, %63, %cst_45 {dimension_numbers = #tpu.dot_dimension_numbers<[1], [0], [0], [1], [0, 0, 1, 1], [], []>} : vector<16x128xbf16>, vector<128x128xbf16>, vector<16x128xf32> -> vector<16x128xf32>
    %c3 = arith.constant 3 : index
    %c0_46 = arith.constant 0 : index
    %65 = vector.load %arg24[%c3, %c0_46] : memref<16x128xf32, #tpu.memory_space<vmem>>, vector<1x128xf32>
    %66 = vector.broadcast %65 : vector<1x128xf32> to vector<16x128xf32>
    %67 = arith.addf %64, %66 : vector<16x128xf32>
    %c0_47 = arith.constant 0 : index
    %c0_48 = arith.constant 0 : index
    %68 = vector.load %arg25[%c0_47, %c0_48] : memref<16x128xf32, #tpu.memory_space<vmem>>, vector<16x128xf32>
    tpu.vector_store %arg25[%c0_47, %c0_48], %67 {strides = array<i32>} : memref<16x128xf32, #tpu.memory_space<vmem>>, vector<16x128xf32>,
    %69 = arith.truncf %67 : vector<16x128xf32> to vector<16x128xbf16>
    %c0_49 = arith.constant 0 : index
    %c0_50 = arith.constant 0 : index
    %70 = vector.load %arg18[%c0_49, %c0_50] : memref<128x128xbf16, #tpu.memory_space<vmem>>, vector<128x128xbf16>
    %cst_51 = arith.constant dense<0.000000e+00> : vector<16x128xf32>
    %71 = tpu.matmul %62, %70, %cst_51 {dimension_numbers = #tpu.dot_dimension_numbers<[1], [0], [0], [1], [0, 0, 1, 1], [], []>} : vector<16x128xbf16>, vector<128x128xbf16>, vector<16x128xf32> -> vector<16x128xf32>
    %c11 = arith.constant 11 : index
    %c0_52 = arith.constant 0 : index
    %72 = vector.load %arg24[%c11, %c0_52] : memref<16x128xf32, #tpu.memory_space<vmem>>, vector<1x128xf32>
    %73 = vector.broadcast %72 : vector<1x128xf32> to vector<16x128xf32>
    %74 = arith.addf %71, %73 : vector<16x128xf32>
    %c0_53 = arith.constant 0 : index
    %c0_54 = arith.constant 0 : index
    %75 = vector.load %arg27[%c0_53, %c0_54] : memref<16x128xf32, #tpu.memory_space<vmem>>, vector<16x128xf32>
    tpu.vector_store %arg27[%c0_53, %c0_54], %74 {strides = array<i32>} : memref<16x128xf32, #tpu.memory_space<vmem>>, vector<16x128xf32>,
    %76 = arith.truncf %74 : vector<16x128xf32> to vector<16x128xbf16>
    %c0_55 = arith.constant 0 : index
    %c0_56 = arith.constant 0 : index
    %77 = vector.load %arg9[%c0_55, %c0_56] : memref<128x128xbf16, #tpu.memory_space<vmem>>, vector<128x128xbf16>
    %cst_57 = arith.constant dense<0.000000e+00> : vector<16x128xf32>
    %78 = tpu.matmul %69, %77, %cst_57 {dimension_numbers = #tpu.dot_dimension_numbers<[1], [0], [0], [1], [0, 0, 1, 1], [], []>} : vector<16x128xbf16>, vector<128x128xbf16>, vector<16x128xf32> -> vector<16x128xf32>
    %c0_58 = arith.constant 0 : index
    %c0_59 = arith.constant 0 : index
    %79 = vector.load %arg10[%c0_58, %c0_59] : memref<128x128xbf16, #tpu.memory_space<vmem>>, vector<128x128xbf16>
    %cst_60 = arith.constant dense<0.000000e+00> : vector<16x128xf32>
    %80 = tpu.matmul %0, %79, %cst_60 {dimension_numbers = #tpu.dot_dimension_numbers<[1], [0], [0], [1], [0, 0, 1, 1], [], []>} : vector<16x128xbf16>, vector<128x128xbf16>, vector<16x128xf32> -> vector<16x128xf32>
    %81 = arith.addf %78, %80 : vector<16x128xf32>
    %c4 = arith.constant 4 : index
    %c0_61 = arith.constant 0 : index
    %82 = vector.load %arg24[%c4, %c0_61] : memref<16x128xf32, #tpu.memory_space<vmem>>, vector<1x128xf32>
    %83 = vector.broadcast %82 : vector<1x128xf32> to vector<16x128xf32>
    %84 = arith.addf %81, %83 : vector<16x128xf32>
    %cst_62 = arith.constant 0.000000e+00 : f32
    %85 = vector.broadcast %cst_62 : f32 to vector<16x128xf32>
    %86 = arith.maximumf %84, %85 : vector<16x128xf32>
    %87 = arith.truncf %86 : vector<16x128xf32> to vector<16x128xbf16>
    %c0_63 = arith.constant 0 : index
    %c0_64 = arith.constant 0 : index
    %88 = vector.load %arg19[%c0_63, %c0_64] : memref<128x128xbf16, #tpu.memory_space<vmem>>, vector<128x128xbf16>
    %cst_65 = arith.constant dense<0.000000e+00> : vector<16x128xf32>
    %89 = tpu.matmul %76, %88, %cst_65 {dimension_numbers = #tpu.dot_dimension_numbers<[1], [0], [0], [1], [0, 0, 1, 1], [], []>} : vector<16x128xbf16>, vector<128x128xbf16>, vector<16x128xf32> -> vector<16x128xf32>
    %c0_66 = arith.constant 0 : index
    %c0_67 = arith.constant 0 : index
    %90 = vector.load %arg20[%c0_66, %c0_67] : memref<128x128xbf16, #tpu.memory_space<vmem>>, vector<128x128xbf16>
    %cst_68 = arith.constant dense<0.000000e+00> : vector<16x128xf32>
    %91 = tpu.matmul %0, %90, %cst_68 {dimension_numbers = #tpu.dot_dimension_numbers<[1], [0], [0], [1], [0, 0, 1, 1], [], []>} : vector<16x128xbf16>, vector<128x128xbf16>, vector<16x128xf32> -> vector<16x128xf32>
    %92 = arith.addf %89, %91 : vector<16x128xf32>
    %c12 = arith.constant 12 : index
    %c0_69 = arith.constant 0 : index
    %93 = vector.load %arg24[%c12, %c0_69] : memref<16x128xf32, #tpu.memory_space<vmem>>, vector<1x128xf32>
    %94 = vector.broadcast %93 : vector<1x128xf32> to vector<16x128xf32>
    %95 = arith.addf %92, %94 : vector<16x128xf32>
    %cst_70 = arith.constant 0.000000e+00 : f32
    %96 = vector.broadcast %cst_70 : f32 to vector<16x128xf32>
    %97 = arith.maximumf %95, %96 : vector<16x128xf32>
    %98 = arith.truncf %97 : vector<16x128xf32> to vector<16x128xbf16>
    %c0_71 = arith.constant 0 : index
    %c0_72 = arith.constant 0 : index
    %99 = vector.load %arg11[%c0_71, %c0_72] : memref<128x128xbf16, #tpu.memory_space<vmem>>, vector<128x128xbf16>
    %cst_73 = arith.constant dense<0.000000e+00> : vector<16x128xf32>
    %100 = tpu.matmul %87, %99, %cst_73 {dimension_numbers = #tpu.dot_dimension_numbers<[1], [0], [0], [1], [0, 0, 1, 1], [], []>} : vector<16x128xbf16>, vector<128x128xbf16>, vector<16x128xf32> -> vector<16x128xf32>
    %c5 = arith.constant 5 : index
    %c0_74 = arith.constant 0 : index
    %101 = vector.load %arg24[%c5, %c0_74] : memref<16x128xf32, #tpu.memory_space<vmem>>, vector<1x128xf32>
    %102 = vector.broadcast %101 : vector<1x128xf32> to vector<16x128xf32>
    %103 = arith.addf %100, %102 : vector<16x128xf32>
    %cst_75 = arith.constant 0.000000e+00 : f32
    %104 = vector.broadcast %cst_75 : f32 to vector<16x128xf32>
    %105 = arith.maximumf %103, %104 : vector<16x128xf32>
    %106 = arith.truncf %105 : vector<16x128xf32> to vector<16x128xbf16>
    %c0_76 = arith.constant 0 : index
    %c0_77 = arith.constant 0 : index
    %107 = vector.load %arg21[%c0_76, %c0_77] : memref<128x128xbf16, #tpu.memory_space<vmem>>, vector<128x128xbf16>
    %cst_78 = arith.constant dense<0.000000e+00> : vector<16x128xf32>
    %108 = tpu.matmul %98, %107, %cst_78 {dimension_numbers = #tpu.dot_dimension_numbers<[1], [0], [0], [1], [0, 0, 1, 1], [], []>} : vector<16x128xbf16>, vector<128x128xbf16>, vector<16x128xf32> -> vector<16x128xf32>
    %c13 = arith.constant 13 : index
    %c0_79 = arith.constant 0 : index
    %109 = vector.load %arg24[%c13, %c0_79] : memref<16x128xf32, #tpu.memory_space<vmem>>, vector<1x128xf32>
    %110 = vector.broadcast %109 : vector<1x128xf32> to vector<16x128xf32>
    %111 = arith.addf %108, %110 : vector<16x128xf32>
    %cst_80 = arith.constant 0.000000e+00 : f32
    %112 = vector.broadcast %cst_80 : f32 to vector<16x128xf32>
    %113 = arith.maximumf %111, %112 : vector<16x128xf32>
    %114 = arith.truncf %113 : vector<16x128xf32> to vector<16x128xbf16>
    %c0_81 = arith.constant 0 : index
    %c0_82 = arith.constant 0 : index
    %115 = vector.load %arg12[%c0_81, %c0_82] : memref<128x128xbf16, #tpu.memory_space<vmem>>, vector<128x128xbf16>
    %cst_83 = arith.constant dense<0.000000e+00> : vector<16x128xf32>
    %116 = tpu.matmul %106, %115, %cst_83 {dimension_numbers = #tpu.dot_dimension_numbers<[1], [0], [0], [1], [0, 0, 1, 1], [], []>} : vector<16x128xbf16>, vector<128x128xbf16>, vector<16x128xf32> -> vector<16x128xf32>
    %c6 = arith.constant 6 : index
    %c0_84 = arith.constant 0 : index
    %117 = vector.load %arg24[%c6, %c0_84] : memref<16x128xf32, #tpu.memory_space<vmem>>, vector<1x128xf32>
    %118 = vector.broadcast %117 : vector<1x128xf32> to vector<16x128xf32>
    %119 = arith.addf %116, %118 : vector<16x128xf32>
    %120 = arith.truncf %119 : vector<16x128xf32> to vector<16x128xbf16>
    %c0_85 = arith.constant 0 : index
    %c0_86 = arith.constant 0 : index
    %121 = vector.load %arg22[%c0_85, %c0_86] : memref<128x128xbf16, #tpu.memory_space<vmem>>, vector<128x128xbf16>
    %cst_87 = arith.constant dense<0.000000e+00> : vector<16x128xf32>
    %122 = tpu.matmul %114, %121, %cst_87 {dimension_numbers = #tpu.dot_dimension_numbers<[1], [0], [0], [1], [0, 0, 1, 1], [], []>} : vector<16x128xbf16>, vector<128x128xbf16>, vector<16x128xf32> -> vector<16x128xf32>
    %c14 = arith.constant 14 : index
    %c0_88 = arith.constant 0 : index
    %123 = vector.load %arg24[%c14, %c0_88] : memref<16x128xf32, #tpu.memory_space<vmem>>, vector<1x128xf32>
    %124 = vector.broadcast %123 : vector<1x128xf32> to vector<16x128xf32>
    %125 = arith.addf %122, %124 : vector<16x128xf32>
    %126 = arith.truncf %125 : vector<16x128xf32> to vector<16x128xbf16>
    %c0_89 = arith.constant 0 : index
    %c0_90 = arith.constant 0 : index
    %127 = vector.load %arg13[%c0_89, %c0_90] : memref<128x128xbf16, #tpu.memory_space<vmem>>, vector<128x128xbf16>
    %cst_91 = arith.constant dense<0.000000e+00> : vector<16x128xf32>
    %128 = tpu.matmul %120, %127, %cst_91 {dimension_numbers = #tpu.dot_dimension_numbers<[1], [0], [0], [1], [0, 0, 1, 1], [], []>} : vector<16x128xbf16>, vector<128x128xbf16>, vector<16x128xf32> -> vector<16x128xf32>
    %c7 = arith.constant 7 : index
    %c0_92 = arith.constant 0 : index
    %129 = vector.load %arg24[%c7, %c0_92] : memref<16x128xf32, #tpu.memory_space<vmem>>, vector<1x128xf32>
    %130 = vector.broadcast %129 : vector<1x128xf32> to vector<16x128xf32>
    %131 = arith.addf %128, %130 : vector<16x128xf32>
    %c0_93 = arith.constant 0 : index
    %c0_94 = arith.constant 0 : index
    %132 = vector.load %arg26[%c0_93, %c0_94] : memref<16x128xf32, #tpu.memory_space<vmem>>, vector<16x128xf32>
    tpu.vector_store %arg26[%c0_93, %c0_94], %131 {strides = array<i32>} : memref<16x128xf32, #tpu.memory_space<vmem>>, vector<16x128xf32>,
    %c0_95 = arith.constant 0 : index
    %c0_96 = arith.constant 0 : index
    %133 = vector.load %arg23[%c0_95, %c0_96] : memref<128x128xbf16, #tpu.memory_space<vmem>>, vector<128x128xbf16>
    %cst_97 = arith.constant dense<0.000000e+00> : vector<16x128xf32>
    %134 = tpu.matmul %126, %133, %cst_97 {dimension_numbers = #tpu.dot_dimension_numbers<[1], [0], [0], [1], [0, 0, 1, 1], [], []>} : vector<16x128xbf16>, vector<128x128xbf16>, vector<16x128xf32> -> vector<16x128xf32>
    %c15 = arith.constant 15 : index
    %c0_98 = arith.constant 0 : index
    %135 = vector.load %arg24[%c15, %c0_98] : memref<16x128xf32, #tpu.memory_space<vmem>>, vector<1x128xf32>
    %136 = vector.broadcast %135 : vector<1x128xf32> to vector<16x128xf32>
    %137 = arith.addf %134, %136 : vector<16x128xf32>
    %c0_99 = arith.constant 0 : index
    %c0_100 = arith.constant 0 : index
    %138 = vector.load %arg28[%c0_99, %c0_100] : memref<16x128xf32, #tpu.memory_space<vmem>>, vector<16x128xf32>
    tpu.vector_store %arg28[%c0_99, %c0_100], %137 {strides = array<i32>} : memref<16x128xf32, #tpu.memory_space<vmem>>, vector<16x128xf32>,
    return
  }
  func.func @transform_0(%arg0: i32) -> (i32, i32) {
    %c0_i32 = arith.constant 0 : i32
    %c0_i32_0 = arith.constant 0 : i32
    return %arg0, %c0_i32 : i32, i32
  }
  func.func @transform_1(%arg0: i32) -> (i32, i32) {
    %c0_i32 = arith.constant 0 : i32
    %c0_i32_0 = arith.constant 0 : i32
    return %arg0, %c0_i32 : i32, i32
  }
  func.func @transform_2(%arg0: i32) -> (i32, i32) {
    %c0_i32 = arith.constant 0 : i32
    %c0_i32_0 = arith.constant 0 : i32
    return %arg0, %c0_i32 : i32, i32
  }
  func.func @transform_3(%arg0: i32) -> (i32, i32) {
    %c0_i32 = arith.constant 0 : i32
    %c0_i32_0 = arith.constant 0 : i32
    %c0_i32_1 = arith.constant 0 : i32
    return %c0_i32, %c0_i32_0 : i32, i32
  }
  func.func @transform_4(%arg0: i32) -> (i32, i32) {
    %c0_i32 = arith.constant 0 : i32
    %c0_i32_0 = arith.constant 0 : i32
    %c0_i32_1 = arith.constant 0 : i32
    return %c0_i32, %c0_i32_0 : i32, i32
  }
  func.func @transform_5(%arg0: i32) -> (i32, i32) {
    %c0_i32 = arith.constant 0 : i32
    %c0_i32_0 = arith.constant 0 : i32
    %c0_i32_1 = arith.constant 0 : i32
    return %c0_i32, %c0_i32_0 : i32, i32
  }
  func.func @transform_6(%arg0: i32) -> (i32, i32) {
    %c0_i32 = arith.constant 0 : i32
    %c0_i32_0 = arith.constant 0 : i32
    %c0_i32_1 = arith.constant 0 : i32
    return %c0_i32, %c0_i32_0 : i32, i32
  }
  func.func @transform_7(%arg0: i32) -> (i32, i32) {
    %c0_i32 = arith.constant 0 : i32
    %c0_i32_0 = arith.constant 0 : i32
    %c0_i32_1 = arith.constant 0 : i32
    return %c0_i32, %c0_i32_0 : i32, i32
  }
  func.func @transform_8(%arg0: i32) -> (i32, i32) {
    %c0_i32 = arith.constant 0 : i32
    %c0_i32_0 = arith.constant 0 : i32
    %c0_i32_1 = arith.constant 0 : i32
    return %c0_i32, %c0_i32_0 : i32, i32
  }
  func.func @transform_9(%arg0: i32) -> (i32, i32) {
    %c0_i32 = arith.constant 0 : i32
    %c0_i32_0 = arith.constant 0 : i32
    %c0_i32_1 = arith.constant 0 : i32
    return %c0_i32, %c0_i32_0 : i32, i32
  }
  func.func @transform_10(%arg0: i32) -> (i32, i32) {
    %c0_i32 = arith.constant 0 : i32
    %c0_i32_0 = arith.constant 0 : i32
    %c0_i32_1 = arith.constant 0 : i32
    return %c0_i32, %c0_i32_0 : i32, i32
  }
  func.func @transform_11(%arg0: i32) -> (i32, i32) {
    %c0_i32 = arith.constant 0 : i32
    %c0_i32_0 = arith.constant 0 : i32
    %c0_i32_1 = arith.constant 0 : i32
    return %c0_i32, %c0_i32_0 : i32, i32
  }
  func.func @transform_12(%arg0: i32) -> (i32, i32) {
    %c0_i32 = arith.constant 0 : i32
    %c0_i32_0 = arith.constant 0 : i32
    %c0_i32_1 = arith.constant 0 : i32
    return %c0_i32, %c0_i32_0 : i32, i32
  }
  func.func @transform_13(%arg0: i32) -> (i32, i32) {
    %c0_i32 = arith.constant 0 : i32
    %c0_i32_0 = arith.constant 0 : i32
    %c0_i32_1 = arith.constant 0 : i32
    return %c0_i32, %c0_i32_0 : i32, i32
  }
  func.func @transform_14(%arg0: i32) -> (i32, i32) {
    %c0_i32 = arith.constant 0 : i32
    %c0_i32_0 = arith.constant 0 : i32
    %c0_i32_1 = arith.constant 0 : i32
    return %c0_i32, %c0_i32_0 : i32, i32
  }
  func.func @transform_15(%arg0: i32) -> (i32, i32) {
    %c0_i32 = arith.constant 0 : i32
    %c0_i32_0 = arith.constant 0 : i32
    %c0_i32_1 = arith.constant 0 : i32
    return %c0_i32, %c0_i32_0 : i32, i32
  }
  func.func @transform_16(%arg0: i32) -> (i32, i32) {
    %c0_i32 = arith.constant 0 : i32
    %c0_i32_0 = arith.constant 0 : i32
    %c0_i32_1 = arith.constant 0 : i32
    return %c0_i32, %c0_i32_0 : i32, i32
  }
  func.func @transform_17(%arg0: i32) -> (i32, i32) {
    %c0_i32 = arith.constant 0 : i32
    %c0_i32_0 = arith.constant 0 : i32
    %c0_i32_1 = arith.constant 0 : i32
    return %c0_i32, %c0_i32_0 : i32, i32
  }
  func.func @transform_18(%arg0: i32) -> (i32, i32) {
    %c0_i32 = arith.constant 0 : i32
    %c0_i32_0 = arith.constant 0 : i32
    %c0_i32_1 = arith.constant 0 : i32
    return %c0_i32, %c0_i32_0 : i32, i32
  }
  func.func @transform_19(%arg0: i32) -> (i32, i32) {
    %c0_i32 = arith.constant 0 : i32
    %c0_i32_0 = arith.constant 0 : i32
    %c0_i32_1 = arith.constant 0 : i32
    return %c0_i32, %c0_i32_0 : i32, i32
  }
  func.func @transform_20(%arg0: i32) -> (i32, i32) {
    %c0_i32 = arith.constant 0 : i32
    %c0_i32_0 = arith.constant 0 : i32
    %c0_i32_1 = arith.constant 0 : i32
    return %c0_i32, %c0_i32_0 : i32, i32
  }
  func.func @transform_21(%arg0: i32) -> (i32, i32) {
    %c0_i32 = arith.constant 0 : i32
    %c0_i32_0 = arith.constant 0 : i32
    %c0_i32_1 = arith.constant 0 : i32
    return %c0_i32, %c0_i32_0 : i32, i32
  }
  func.func @transform_22(%arg0: i32) -> (i32, i32) {
    %c0_i32 = arith.constant 0 : i32
    %c0_i32_0 = arith.constant 0 : i32
    %c0_i32_1 = arith.constant 0 : i32
    return %c0_i32, %c0_i32_0 : i32, i32
  }
  func.func @transform_23(%arg0: i32) -> (i32, i32) {
    %c0_i32 = arith.constant 0 : i32
    %c0_i32_0 = arith.constant 0 : i32
    %c0_i32_1 = arith.constant 0 : i32
    return %c0_i32, %c0_i32_0 : i32, i32
  }
  func.func @transform_24(%arg0: i32) -> (i32, i32) {
    %c0_i32 = arith.constant 0 : i32
    %c0_i32_0 = arith.constant 0 : i32
    return %arg0, %c0_i32 : i32, i32
  }
  func.func @transform_25(%arg0: i32) -> (i32, i32) {
    %c0_i32 = arith.constant 0 : i32
    %c0_i32_0 = arith.constant 0 : i32
    return %arg0, %c0_i32 : i32, i32
  }
  func.func @transform_26(%arg0: i32) -> (i32, i32) {
    %c0_i32 = arith.constant 0 : i32
    %c0_i32_0 = arith.constant 0 : i32
    return %arg0, %c0_i32 : i32, i32
  }
  func.func @transform_27(%arg0: i32) -> (i32, i32) {
    %c0_i32 = arith.constant 0 : i32
    %c0_i32_0 = arith.constant 0 : i32
    return %arg0, %c0_i32 : i32, i32
  }
}

module attributes {stable_mosaic.version = 11 : i64} {
  func.func @kernel(%arg0: i32, %arg1: memref<16x128xf32, #tpu.memory_space<vmem>>, %arg2: memref<16x128xf32, #tpu.memory_space<vmem>>, %arg3: memref<16x128xbf16, #tpu.memory_space<vmem>>, %arg4: memref<128x128xbf16, #tpu.memory_space<vmem>>, %arg5: memref<128x128xbf16, #tpu.memory_space<vmem>>, %arg6: memref<128x128xbf16, #tpu.memory_space<vmem>>, %arg7: memref<128x128xbf16, #tpu.memory_space<vmem>>, %arg8: memref<128x128xbf16, #tpu.memory_space<vmem>>, %arg9: memref<128x128xbf16, #tpu.memory_space<vmem>>, %arg10: memref<128x128xbf16, #tpu.memory_space<vmem>>, %arg11: memref<128x128xbf16, #tpu.memory_space<vmem>>, %arg12: memref<128x128xbf16, #tpu.memory_space<vmem>>, %arg13: memref<128x128xbf16, #tpu.memory_space<vmem>>, %arg14: memref<128x128xbf16, #tpu.memory_space<vmem>>, %arg15: memref<128x128xbf16, #tpu.memory_space<vmem>>, %arg16: memref<128x128xbf16, #tpu.memory_space<vmem>>, %arg17: memref<128x128xbf16, #tpu.memory_space<vmem>>, %arg18: memref<128x128xbf16, #tpu.memory_space<vmem>>, %arg19: memref<128x128xbf16, #tpu.memory_space<vmem>>, %arg20: memref<128x128xbf16, #tpu.memory_space<vmem>>, %arg21: memref<128x128xbf16, #tpu.memory_space<vmem>>, %arg22: memref<128x128xbf16, #tpu.memory_space<vmem>>, %arg23: memref<128x128xbf16, #tpu.memory_space<vmem>>, %arg24: memref<16x128xf32, #tpu.memory_space<vmem>>, %arg25: memref<16x128xf32, #tpu.memory_space<vmem>>, %arg26: memref<16x128xf32, #tpu.memory_space<vmem>>, %arg27: memref<16x128xf32, #tpu.memory_space<vmem>>, %arg28: memref<16x128xf32, #tpu.memory_space<vmem>>) attributes {dimension_semantics = [#tpu.dimension_semantics<parallel>], iteration_bounds = array<i64: 1>, scalar_prefetch = 0 : i64, scratch_operands = 0 : i64, tpu.core_type = #tpu.core_type<tc>, window_params = [{transform_indices = @transform_0, window_bounds = array<i64: 16, 128>}, {transform_indices = @transform_1, window_bounds = array<i64: 16, 128>}, {transform_indices = @transform_2, window_bounds = array<i64: 16, 128>}, {pipeline_mode = #tpu.pipeline_mode<synchronous>, transform_indices = @transform_3, window_bounds = array<i64: 128, 128>}, {pipeline_mode = #tpu.pipeline_mode<synchronous>, transform_indices = @transform_4, window_bounds = array<i64: 128, 128>}, {pipeline_mode = #tpu.pipeline_mode<synchronous>, transform_indices = @transform_5, window_bounds = array<i64: 128, 128>}, {pipeline_mode = #tpu.pipeline_mode<synchronous>, transform_indices = @transform_6, window_bounds = array<i64: 128, 128>}, {pipeline_mode = #tpu.pipeline_mode<synchronous>, transform_indices = @transform_7, window_bounds = array<i64: 128, 128>}, {pipeline_mode = #tpu.pipeline_mode<synchronous>, transform_indices = @transform_8, window_bounds = array<i64: 128, 128>}, {pipeline_mode = #tpu.pipeline_mode<synchronous>, transform_indices = @transform_9, window_bounds = array<i64: 128, 128>}, {pipeline_mode = #tpu.pipeline_mode<synchronous>, transform_indices = @transform_10, window_bounds = array<i64: 128, 128>}, {pipeline_mode = #tpu.pipeline_mode<synchronous>, transform_indices = @transform_11, window_bounds = array<i64: 128, 128>}, {pipeline_mode = #tpu.pipeline_mode<synchronous>, transform_indices = @transform_12, window_bounds = array<i64: 128, 128>}, {pipeline_mode = #tpu.pipeline_mode<synchronous>, transform_indices = @transform_13, window_bounds = array<i64: 128, 128>}, {pipeline_mode = #tpu.pipeline_mode<synchronous>, transform_indices = @transform_14, window_bounds = array<i64: 128, 128>}, {pipeline_mode = #tpu.pipeline_mode<synchronous>, transform_indices = @transform_15, window_bounds = array<i64: 128, 128>}, {pipeline_mode = #tpu.pipeline_mode<synchronous>, transform_indices = @transform_16, window_bounds = array<i64: 128, 128>}, {pipeline_mode = #tpu.pipeline_mode<synchronous>, transform_indices = @transform_17, window_bounds = array<i64: 128, 128>}, {pipeline_mode = #tpu.pipeline_mode<synchronous>, transform_indices = @transform_18, window_bounds = array<i64: 128, 128>}, {pipeline_mode = #tpu.pipeline_mode<synchronous>, transform_indices = @transform_19, window_bounds = array<i64: 128, 128>}, {pipeline_mode = #tpu.pipeline_mode<synchronous>, transform_indices = @transform_20, window_bounds = array<i64: 128, 128>}, {pipeline_mode = #tpu.pipeline_mode<synchronous>, transform_indices = @transform_21, window_bounds = array<i64: 128, 128>}, {pipeline_mode = #tpu.pipeline_mode<synchronous>, transform_indices = @transform_22, window_bounds = array<i64: 128, 128>}, {pipeline_mode = #tpu.pipeline_mode<synchronous>, transform_indices = @transform_23, window_bounds = array<i64: 16, 128>}, {transform_indices = @transform_24, window_bounds = array<i64: 16, 128>}, {transform_indices = @transform_25, window_bounds = array<i64: 16, 128>}, {transform_indices = @transform_26, window_bounds = array<i64: 16, 128>}, {transform_indices = @transform_27, window_bounds = array<i64: 16, 128>}]} {
    %c0 = arith.constant 0 : index
    %c0_0 = arith.constant 0 : index
    %0 = vector.load %arg3[%c0, %c0_0] : memref<16x128xbf16, #tpu.memory_space<vmem>>, vector<16x128xbf16>
    %c0_1 = arith.constant 0 : index
    %c0_2 = arith.constant 0 : index
    %1 = vector.load %arg1[%c0_1, %c0_2] : memref<16x128xf32, #tpu.memory_space<vmem>>, vector<16x128xf32>
    %2 = tpu.weird %1 : vector<16x128xf32> -> vector<16x128xi1>
    %cst = arith.constant dense<true> : vector<16x128xi1>
    %3 = arith.xori %2, %cst : vector<16x128xi1>
    %cst_3 = arith.constant 0.000000e+00 : f32
    %4 = vector.broadcast %cst_3 : f32 to vector<16x128xf32>
    %5 = arith.select %3, %1, %4 : vector<16x128xi1>, vector<16x128xf32>
    %6 = arith.truncf %5 : vector<16x128xf32> to vector<16x128xbf16>
    %c0_4 = arith.constant 0 : index
    %c0_5 = arith.constant 0 : index
    %7 = vector.load %arg2[%c0_4, %c0_5] : memref<16x128xf32, #tpu.memory_space<vmem>>, vector<16x128xf32>
    %8 = tpu.weird %7 : vector<16x128xf32> -> vector<16x128xi1>
    %cst_6 = arith.constant dense<true> : vector<16x128xi1>
    %9 = arith.xori %8, %cst_6 : vector<16x128xi1>
    %cst_7 = arith.constant 0.000000e+00 : f32
    %10 = vector.broadcast %cst_7 : f32 to vector<16x128xf32>
    %11 = arith.select %9, %7, %10 : vector<16x128xi1>, vector<16x128xf32>
    %12 = arith.truncf %11 : vector<16x128xf32> to vector<16x128xbf16>
    %c0_8 = arith.constant 0 : index
    %c0_9 = arith.constant 0 : index
    %13 = vector.load %arg4[%c0_8, %c0_9] : memref<128x128xbf16, #tpu.memory_space<vmem>>, vector<128x128xbf16>
    %cst_10 = arith.constant dense<0.000000e+00> : vector<16x128xf32>
    %14 = tpu.matmul %6, %13, %cst_10 {dimension_numbers = #tpu.dot_dimension_numbers<[1], [0], [0], [1], [0, 0, 1, 1], [], []>} : vector<16x128xbf16>, vector<128x128xbf16>, vector<16x128xf32> -> vector<16x128xf32>
    %c0_11 = arith.constant 0 : index
    %c0_12 = arith.constant 0 : index
    %15 = vector.load %arg5[%c0_11, %c0_12] : memref<128x128xbf16, #tpu.memory_space<vmem>>, vector<128x128xbf16>
    %cst_13 = arith.constant dense<0.000000e+00> : vector<16x128xf32>
    %16 = tpu.matmul %0, %15, %cst_13 {dimension_numbers = #tpu.dot_dimension_numbers<[1], [0], [0], [1], [0, 0, 1, 1], [], []>} : vector<16x128xbf16>, vector<128x128xbf16>, vector<16x128xf32> -> vector<16x128xf32>
    %17 = arith.addf %14, %16 : vector<16x128xf32>
    %c0_14 = arith.constant 0 : index
    %c0_15 = arith.constant 0 : index
    %18 = vector.load %arg24[%c0_14, %c0_15] : memref<16x128xf32, #tpu.memory_space<vmem>>, vector<1x128xf32>
    %19 = vector.broadcast %18 : vector<1x128xf32> to vector<16x128xf32>
    %20 = arith.addf %17, %19 : vector<16x128xf32>
    %cst_16 = arith.constant 0.000000e+00 : f32
    %21 = vector.broadcast %cst_16 : f32 to vector<16x128xf32>
    %22 = arith.maximumf %20, %21 : vector<16x128xf32>
    %23 = arith.truncf %22 : vector<16x128xf32> to vector<16x128xbf16>
    %c0_17 = arith.constant 0 : index
    %c0_18 = arith.constant 0 : index
    %24 = vector.load %arg14[%c0_17, %c0_18] : memref<128x128xbf16, #tpu.memory_space<vmem>>, vector<128x128xbf16>
    %cst_19 = arith.constant dense<0.000000e+00> : vector<16x128xf32>
    %25 = tpu.matmul %12, %24, %cst_19 {dimension_numbers = #tpu.dot_dimension_numbers<[1], [0], [0], [1], [0, 0, 1, 1], [], []>} : vector<16x128xbf16>, vector<128x128xbf16>, vector<16x128xf32> -> vector<16x128xf32>
    %c0_20 = arith.constant 0 : index
    %c0_21 = arith.constant 0 : index
    %26 = vector.load %arg15[%c0_20, %c0_21] : memref<128x128xbf16, #tpu.memory_space<vmem>>, vector<128x128xbf16>
    %cst_22 = arith.constant dense<0.000000e+00> : vector<16x128xf32>
    %27 = tpu.matmul %0, %26, %cst_22 {dimension_numbers = #tpu.dot_dimension_numbers<[1], [0], [0], [1], [0, 0, 1, 1], [], []>} : vector<16x128xbf16>, vector<128x128xbf16>, vector<16x128xf32> -> vector<16x128xf32>
    %28 = arith.addf %25, %27 : vector<16x128xf32>
    %c8 = arith.constant 8 : index
    %c0_23 = arith.constant 0 : index
    %29 = vector.load %arg24[%c8, %c0_23] : memref<16x128xf32, #tpu.memory_space<vmem>>, vector<1x128xf32>
    %30 = vector.broadcast %29 : vector<1x128xf32> to vector<16x128xf32>
    %31 = arith.addf %28, %30 : vector<16x128xf32>
    %cst_24 = arith.constant 0.000000e+00 : f32
    %32 = vector.broadcast %cst_24 : f32 to vector<16x128xf32>
    %33 = arith.maximumf %31, %32 : vector<16x128xf32>
    %34 = arith.truncf %33 : vector<16x128xf32> to vector<16x128xbf16>
    %c0_25 = arith.constant 0 : index
    %c0_26 = arith.constant 0 : index
    %35 = vector.load %arg6[%c0_25, %c0_26] : memref<128x128xbf16, #tpu.memory_space<vmem>>, vector<128x128xbf16>
    %cst_27 = arith.constant dense<0.000000e+00> : vector<16x128xf32>
    %36 = tpu.matmul %23, %35, %cst_27 {dimension_numbers = #tpu.dot_dimension_numbers<[1], [0], [0], [1], [0, 0, 1, 1], [], []>} : vector<16x128xbf16>, vector<128x128xbf16>, vector<16x128xf32> -> vector<16x128xf32>
    %c1 = arith.constant 1 : index
    %c0_28 = arith.constant 0 : index
    %37 = vector.load %arg24[%c1, %c0_28] : memref<16x128xf32, #tpu.memory_space<vmem>>, vector<1x128xf32>
    %38 = vector.broadcast %37 : vector<1x128xf32> to vector<16x128xf32>
    %39 = arith.addf %36, %38 : vector<16x128xf32>
    %cst_29 = arith.constant 0.000000e+00 : f32
    %40 = vector.broadcast %cst_29 : f32 to vector<16x128xf32>
    %41 = arith.maximumf %39, %40 : vector<16x128xf32>
    %42 = arith.truncf %41 : vector<16x128xf32> to vector<16x128xbf16>
    %c0_30 = arith.constant 0 : index
    %c0_31 = arith.constant 0 : index
    %43 = vector.load %arg16[%c0_30, %c0_31] : memref<128x128xbf16, #tpu.memory_space<vmem>>, vector<128x128xbf16>
    %cst_32 = arith.constant dense<0.000000e+00> : vector<16x128xf32>
    %44 = tpu.matmul %34, %43, %cst_32 {dimension_numbers = #tpu.dot_dimension_numbers<[1], [0], [0], [1], [0, 0, 1, 1], [], []>} : vector<16x128xbf16>, vector<128x128xbf16>, vector<16x128xf32> -> vector<16x128xf32>
    %c9 = arith.constant 9 : index
    %c0_33 = arith.constant 0 : index
    %45 = vector.load %arg24[%c9, %c0_33] : memref<16x128xf32, #tpu.memory_space<vmem>>, vector<1x128xf32>
    %46 = vector.broadcast %45 : vector<1x128xf32> to vector<16x128xf32>
    %47 = arith.addf %44, %46 : vector<16x128xf32>
    %cst_34 = arith.constant 0.000000e+00 : f32
    %48 = vector.broadcast %cst_34 : f32 to vector<16x128xf32>
    %49 = arith.maximumf %47, %48 : vector<16x128xf32>
    %50 = arith.truncf %49 : vector<16x128xf32> to vector<16x128xbf16>
    %c0_35 = arith.constant 0 : index
    %c0_36 = arith.constant 0 : index
    %51 = vector.load %arg7[%c0_35, %c0_36] : memref<128x128xbf16, #tpu.memory_space<vmem>>, vector<128x128xbf16>
    %cst_37 = arith.constant dense<0.000000e+00> : vector<16x128xf32>
    %52 = tpu.matmul %42, %51, %cst_37 {dimension_numbers = #tpu.dot_dimension_numbers<[1], [0], [0], [1], [0, 0, 1, 1], [], []>} : vector<16x128xbf16>, vector<128x128xbf16>, vector<16x128xf32> -> vector<16x128xf32>
    %c2 = arith.constant 2 : index
    %c0_38 = arith.constant 0 : index
    %53 = vector.load %arg24[%c2, %c0_38] : memref<16x128xf32, #tpu.memory_space<vmem>>, vector<1x128xf32>
    %54 = vector.broadcast %53 : vector<1x128xf32> to vector<16x128xf32>
    %55 = arith.addf %52, %54 : vector<16x128xf32>
    %56 = arith.truncf %55 : vector<16x128xf32> to vector<16x128xbf16>
    %c0_39 = arith.constant 0 : index
    %c0_40 = arith.constant 0 : index
    %57 = vector.load %arg17[%c0_39, %c0_40] : memref<128x128xbf16, #tpu.memory_space<vmem>>, vector<128x128xbf16>
    %cst_41 = arith.constant dense<0.000000e+00> : vector<16x128xf32>
    %58 = tpu.matmul %50, %57, %cst_41 {dimension_numbers = #tpu.dot_dimension_numbers<[1], [0], [0], [1], [0, 0, 1, 1], [], []>} : vector<16x128xbf16>, vector<128x128xbf16>, vector<16x128xf32> -> vector<16x128xf32>
    %c10 = arith.constant 10 : index
    %c0_42 = arith.constant 0 : index
    %59 = vector.load %arg24[%c10, %c0_42] : memref<16x128xf32, #tpu.memory_space<vmem>>, vector<1x128xf32>
    %60 = vector.broadcast %59 : vector<1x128xf32> to vector<16x128xf32>
    %61 = arith.addf %58, %60 : vector<16x128xf32>
    %62 = arith.truncf %61 : vector<16x128xf32> to vector<16x128xbf16>
    %c0_43 = arith.constant 0 : index
    %c0_44 = arith.constant 0 : index
    %63 = vector.load %arg8[%c0_43, %c0_44] : memref<128x128xbf16, #tpu.memory_space<vmem>>, vector<128x128xbf16>
    %cst_45 = arith.constant dense<0.000000e+00> : vector<16x128xf32>
    %64 = tpu.matmul %56, %63, %cst_45 {dimension_numbers = #tpu.dot_dimension_numbers<[1], [0], [0], [1], [0, 0, 1, 1], [], []>} : vector<16x128xbf16>, vector<128x128xbf16>, vector<16x128xf32> -> vector<16x128xf32>
    %c3 = arith.constant 3 : index
    %c0_46 = arith.constant 0 : index
    %65 = vector.load %arg24[%c3, %c0_46] : memref<16x128xf32, #tpu.memory_space<vmem>>, vector<1x128xf32>
    %66 = vector.broadcast %65 : vector<1x128xf32> to vector<16x128xf32>
    %67 = arith.addf %64, %66 : vector<16x128xf32>
    %c0_47 = arith.constant 0 : index
    %c0_48 = arith.constant 0 : index
    %68 = vector.load %arg25[%c0_47, %c0_48] : memref<16x128xf32, #tpu.memory_space<vmem>>, vector<16x128xf32>
    tpu.vector_store %arg25[%c0_47, %c0_48], %67 {strides = array<i32>} : memref<16x128xf32, #tpu.memory_space<vmem>>, vector<16x128xf32>,
    %69 = arith.truncf %67 : vector<16x128xf32> to vector<16x128xbf16>
    %c0_49 = arith.constant 0 : index
    %c0_50 = arith.constant 0 : index
    %70 = vector.load %arg18[%c0_49, %c0_50] : memref<128x128xbf16, #tpu.memory_space<vmem>>, vector<128x128xbf16>
    %cst_51 = arith.constant dense<0.000000e+00> : vector<16x128xf32>
    %71 = tpu.matmul %62, %70, %cst_51 {dimension_numbers = #tpu.dot_dimension_numbers<[1], [0], [0], [1], [0, 0, 1, 1], [], []>} : vector<16x128xbf16>, vector<128x128xbf16>, vector<16x128xf32> -> vector<16x128xf32>
    %c11 = arith.constant 11 : index
    %c0_52 = arith.constant 0 : index
    %72 = vector.load %arg24[%c11, %c0_52] : memref<16x128xf32, #tpu.memory_space<vmem>>, vector<1x128xf32>
    %73 = vector.broadcast %72 : vector<1x128xf32> to vector<16x128xf32>
    %74 = arith.addf %71, %73 : vector<16x128xf32>
    %c0_53 = arith.constant 0 : index
    %c0_54 = arith.constant 0 : index
    %75 = vector.load %arg27[%c0_53, %c0_54] : memref<16x128xf32, #tpu.memory_space<vmem>>, vector<16x128xf32>
    tpu.vector_store %arg27[%c0_53, %c0_54], %74 {strides = array<i32>} : memref<16x128xf32, #tpu.memory_space<vmem>>, vector<16x128xf32>,
    %76 = arith.truncf %74 : vector<16x128xf32> to vector<16x128xbf16>
    %c0_55 = arith.constant 0 : index
    %c0_56 = arith.constant 0 : index
    %77 = vector.load %arg9[%c0_55, %c0_56] : memref<128x128xbf16, #tpu.memory_space<vmem>>, vector<128x128xbf16>
    %cst_57 = arith.constant dense<0.000000e+00> : vector<16x128xf32>
    %78 = tpu.matmul %69, %77, %cst_57 {dimension_numbers = #tpu.dot_dimension_numbers<[1], [0], [0], [1], [0, 0, 1, 1], [], []>} : vector<16x128xbf16>, vector<128x128xbf16>, vector<16x128xf32> -> vector<16x128xf32>
    %c0_58 = arith.constant 0 : index
    %c0_59 = arith.constant 0 : index
    %79 = vector.load %arg10[%c0_58, %c0_59] : memref<128x128xbf16, #tpu.memory_space<vmem>>, vector<128x128xbf16>
    %cst_60 = arith.constant dense<0.000000e+00> : vector<16x128xf32>
    %80 = tpu.matmul %0, %79, %cst_60 {dimension_numbers = #tpu.dot_dimension_numbers<[1], [0], [0], [1], [0, 0, 1, 1], [], []>} : vector<16x128xbf16>, vector<128x128xbf16>, vector<16x128xf32> -> vector<16x128xf32>
    %81 = arith.addf %78, %80 : vector<16x128xf32>
    %c4 = arith.constant 4 : index
    %c0_61 = arith.constant 0 : index
    %82 = vector.load %arg24[%c4, %c0_61] : memref<16x128xf32, #tpu.memory_space<vmem>>, vector<1x128xf32>
    %83 = vector.broadcast %82 : vector<1x128xf32> to vector<16x128xf32>
    %84 = arith.addf %81, %83 : vector<16x128xf32>
    %cst_62 = arith.constant 0.000000e+00 : f32
    %85 = vector.broadcast %cst_62 : f32 to vector<16x128xf32>
    %86 = arith.maximumf %84, %85 : vector<16x128xf32>
    %87 = arith.truncf %86 : vector<16x128xf32> to vector<16x128xbf16>
    %c0_63 = arith.constant 0 : index
    %c0_64 = arith.constant 0 : index
    %88 = vector.load %arg19[%c0_63, %c0_64] : memref<128x128xbf16, #tpu.memory_space<vmem>>, vector<128x128xbf16>
    %cst_65 = arith.constant dense<0.000000e+00> : vector<16x128xf32>
    %89 = tpu.matmul %76, %88, %cst_65 {dimension_numbers = #tpu.dot_dimension_numbers<[1], [0], [0], [1], [0, 0, 1, 1], [], []>} : vector<16x128xbf16>, vector<128x128xbf16>, vector<16x128xf32> -> vector<16x128xf32>
    %c0_66 = arith.constant 0 : index
    %c0_67 = arith.constant 0 : index
    %90 = vector.load %arg20[%c0_66, %c0_67] : memref<128x128xbf16, #tpu.memory_space<vmem>>, vector<128x128xbf16>
    %cst_68 = arith.constant dense<0.000000e+00> : vector<16x128xf32>
    %91 = tpu.matmul %0, %90, %cst_68 {dimension_numbers = #tpu.dot_dimension_numbers<[1], [0], [0], [1], [0, 0, 1, 1], [], []>} : vector<16x128xbf16>, vector<128x128xbf16>, vector<16x128xf32> -> vector<16x128xf32>
    %92 = arith.addf %89, %91 : vector<16x128xf32>
    %c12 = arith.constant 12 : index
    %c0_69 = arith.constant 0 : index
    %93 = vector.load %arg24[%c12, %c0_69] : memref<16x128xf32, #tpu.memory_space<vmem>>, vector<1x128xf32>
    %94 = vector.broadcast %93 : vector<1x128xf32> to vector<16x128xf32>
    %95 = arith.addf %92, %94 : vector<16x128xf32>
    %cst_70 = arith.constant 0.000000e+00 : f32
    %96 = vector.broadcast %cst_70 : f32 to vector<16x128xf32>
    %97 = arith.maximumf %95, %96 : vector<16x128xf32>
    %98 = arith.truncf %97 : vector<16x128xf32> to vector<16x128xbf16>
    %c0_71 = arith.constant 0 : index
    %c0_72 = arith.constant 0 : index
    %99 = vector.load %arg11[%c0_71, %c0_72] : memref<128x128xbf16, #tpu.memory_space<vmem>>, vector<128x128xbf16>
    %cst_73 = arith.constant dense<0.000000e+00> : vector<16x128xf32>
    %100 = tpu.matmul %87, %99, %cst_73 {dimension_numbers = #tpu.dot_dimension_numbers<[1], [0], [0], [1], [0, 0, 1, 1], [], []>} : vector<16x128xbf16>, vector<128x128xbf16>, vector<16x128xf32> -> vector<16x128xf32>
    %c5 = arith.constant 5 : index
    %c0_74 = arith.constant 0 : index
    %101 = vector.load %arg24[%c5, %c0_74] : memref<16x128xf32, #tpu.memory_space<vmem>>, vector<1x128xf32>
    %102 = vector.broadcast %101 : vector<1x128xf32> to vector<16x128xf32>
    %103 = arith.addf %100, %102 : vector<16x128xf32>
    %cst_75 = arith.constant 0.000000e+00 : f32
    %104 = vector.broadcast %cst_75 : f32 to vector<16x128xf32>
    %105 = arith.maximumf %103, %104 : vector<16x128xf32>
    %106 = arith.truncf %105 : vector<16x128xf32> to vector<16x128xbf16>
    %c0_76 = arith.constant 0 : index
    %c0_77 = arith.constant 0 : index
    %107 = vector.load %arg21[%c0_76, %c0_77] : memref<128x128xbf16, #tpu.memory_space<vmem>>, vector<128x128xbf16>
    %cst_78 = arith.constant dense<0.000000e+00> : vector<16x128xf32>
    %108 = tpu.matmul %98, %107, %cst_78 {dimension_numbers = #tpu.dot_dimension_numbers<[1], [0], [0], [1], [0, 0, 1, 1], [], []>} : vector<16x128xbf16>, vector<128x128xbf16>, vector<16x128xf32> -> vector<16x128xf32>
    %c13 = arith.constant 13 : index
    %c0_79 = arith.constant 0 : index
    %109 = vector.load %arg24[%c13, %c0_79] : memref<16x128xf32, #tpu.memory_space<vmem>>, vector<1x128xf32>
    %110 = vector.broadcast %109 : vector<1x128xf32> to vector<16x128xf32>
    %111 = arith.addf %108, %110 : vector<16x128xf32>
    %cst_80 = arith.constant 0.000000e+00 : f32
    %112 = vector.broadcast %cst_80 : f32 to vector<16x128xf32>
    %113 = arith.maximumf %111, %112 : vector<16x128xf32>
    %114 = arith.truncf %113 : vector<16x128xf32> to vector<16x128xbf16>
    %c0_81 = arith.constant 0 : index
    %c0_82 = arith.constant 0 : index
    %115 = vector.load %arg12[%c0_81, %c0_82] : memref<128x128xbf16, #tpu.memory_space<vmem>>, vector<128x128xbf16>
    %cst_83 = arith.constant dense<0.000000e+00> : vector<16x128xf32>
    %116 = tpu.matmul %106, %115, %cst_83 {dimension_numbers = #tpu.dot_dimension_numbers<[1], [0], [0], [1], [0, 0, 1, 1], [], []>} : vector<16x128xbf16>, vector<128x128xbf16>, vector<16x128xf32> -> vector<16x128xf32>
    %c6 = arith.constant 6 : index
    %c0_84 = arith.constant 0 : index
    %117 = vector.load %arg24[%c6, %c0_84] : memref<16x128xf32, #tpu.memory_space<vmem>>, vector<1x128xf32>
    %118 = vector.broadcast %117 : vector<1x128xf32> to vector<16x128xf32>
    %119 = arith.addf %116, %118 : vector<16x128xf32>
    %120 = arith.truncf %119 : vector<16x128xf32> to vector<16x128xbf16>
    %c0_85 = arith.constant 0 : index
    %c0_86 = arith.constant 0 : index
    %121 = vector.load %arg22[%c0_85, %c0_86] : memref<128x128xbf16, #tpu.memory_space<vmem>>, vector<128x128xbf16>
    %cst_87 = arith.constant dense<0.000000e+00> : vector<16x128xf32>
    %122 = tpu.matmul %114, %121, %cst_87 {dimension_numbers = #tpu.dot_dimension_numbers<[1], [0], [0], [1], [0, 0, 1, 1], [], []>} : vector<16x128xbf16>, vector<128x128xbf16>, vector<16x128xf32> -> vector<16x128xf32>
    %c14 = arith.constant 14 : index
    %c0_88 = arith.constant 0 : index
    %123 = vector.load %arg24[%c14, %c0_88] : memref<16x128xf32, #tpu.memory_space<vmem>>, vector<1x128xf32>
    %124 = vector.broadcast %123 : vector<1x128xf32> to vector<16x128xf32>
    %125 = arith.addf %122, %124 : vector<16x128xf32>
    %126 = arith.truncf %125 : vector<16x128xf32> to vector<16x128xbf16>
    %c0_89 = arith.constant 0 : index
    %c0_90 = arith.constant 0 : index
    %127 = vector.load %arg13[%c0_89, %c0_90] : memref<128x128xbf16, #tpu.memory_space<vmem>>, vector<128x128xbf16>
    %cst_91 = arith.constant dense<0.000000e+00> : vector<16x128xf32>
    %128 = tpu.matmul %120, %127, %cst_91 {dimension_numbers = #tpu.dot_dimension_numbers<[1], [0], [0], [1], [0, 0, 1, 1], [], []>} : vector<16x128xbf16>, vector<128x128xbf16>, vector<16x128xf32> -> vector<16x128xf32>
    %c7 = arith.constant 7 : index
    %c0_92 = arith.constant 0 : index
    %129 = vector.load %arg24[%c7, %c0_92] : memref<16x128xf32, #tpu.memory_space<vmem>>, vector<1x128xf32>
    %130 = vector.broadcast %129 : vector<1x128xf32> to vector<16x128xf32>
    %131 = arith.addf %128, %130 : vector<16x128xf32>
    %c0_93 = arith.constant 0 : index
    %c0_94 = arith.constant 0 : index
    %132 = vector.load %arg26[%c0_93, %c0_94] : memref<16x128xf32, #tpu.memory_space<vmem>>, vector<16x128xf32>
    tpu.vector_store %arg26[%c0_93, %c0_94], %131 {strides = array<i32>} : memref<16x128xf32, #tpu.memory_space<vmem>>, vector<16x128xf32>,
    %c0_95 = arith.constant 0 : index
    %c0_96 = arith.constant 0 : index
    %133 = vector.load %arg23[%c0_95, %c0_96] : memref<128x128xbf16, #tpu.memory_space<vmem>>, vector<128x128xbf16>
    %cst_97 = arith.constant dense<0.000000e+00> : vector<16x128xf32>
    %134 = tpu.matmul %126, %133, %cst_97 {dimension_numbers = #tpu.dot_dimension_numbers<[1], [0], [0], [1], [0, 0, 1, 1], [], []>} : vector<16x128xbf16>, vector<128x128xbf16>, vector<16x128xf32> -> vector<16x128xf32>
    %c15 = arith.constant 15 : index
    %c0_98 = arith.constant 0 : index
    %135 = vector.load %arg24[%c15, %c0_98] : memref<16x128xf32, #tpu.memory_space<vmem>>, vector<1x128xf32>
    %136 = vector.broadcast %135 : vector<1x128xf32> to vector<16x128xf32>
    %137 = arith.addf %134, %136 : vector<16x128xf32>
    %c0_99 = arith.constant 0 : index
    %c0_100 = arith.constant 0 : index
    %138 = vector.load %arg28[%c0_99, %c0_100] : memref<16x128xf32, #tpu.memory_space<vmem>>, vector<16x128xf32>
    tpu.vector_store %arg28[%c0_99, %c0_100], %137 {strides = array<i32>} : memref<16x128xf32, #tpu.memory_space<vmem>>, vector<16x128xf32>,
    return
  }
  func.func @transform_0(%arg0: i32) -> (i32, i32) {
    %c0_i32 = arith.constant 0 : i32
    %c0_i32_0 = arith.constant 0 : i32
    return %arg0, %c0_i32 : i32, i32
  }
  func.func @transform_1(%arg0: i32) -> (i32, i32) {
    %c0_i32 = arith.constant 0 : i32
    %c0_i32_0 = arith.constant 0 : i32
    return %arg0, %c0_i32 : i32, i32
  }
  func.func @transform_2(%arg0: i32) -> (i32, i32) {
    %c0_i32 = arith.constant 0 : i32
    %c0_i32_0 = arith.constant 0 : i32
    return %arg0, %c0_i32 : i32, i32
  }
  func.func @transform_3(%arg0: i32) -> (i32, i32) {
    %c0_i32 = arith.constant 0 : i32
    %c0_i32_0 = arith.constant 0 : i32
    %c0_i32_1 = arith.constant 0 : i32
    return %c0_i32, %c0_i32_0 : i32, i32
  }
  func.func @transform_4(%arg0: i32) -> (i32, i32) {
    %c0_i32 = arith.constant 0 : i32
    %c0_i32_0 = arith.constant 0 : i32
    %c0_i32_1 = arith.constant 0 : i32
    return %c0_i32, %c0_i32_0 : i32, i32
  }
  func.func @transform_5(%arg0: i32) -> (i32, i32) {
    %c0_i32 = arith.constant 0 : i32
    %c0_i32_0 = arith.constant 0 : i32
    %c0_i32_1 = arith.constant 0 : i32
    return %c0_i32, %c0_i32_0 : i32, i32
  }
  func.func @transform_6(%arg0: i32) -> (i32, i32) {
    %c0_i32 = arith.constant 0 : i32
    %c0_i32_0 = arith.constant 0 : i32
    %c0_i32_1 = arith.constant 0 : i32
    return %c0_i32, %c0_i32_0 : i32, i32
  }
  func.func @transform_7(%arg0: i32) -> (i32, i32) {
    %c0_i32 = arith.constant 0 : i32
    %c0_i32_0 = arith.constant 0 : i32
    %c0_i32_1 = arith.constant 0 : i32
    return %c0_i32, %c0_i32_0 : i32, i32
  }
  func.func @transform_8(%arg0: i32) -> (i32, i32) {
    %c0_i32 = arith.constant 0 : i32
    %c0_i32_0 = arith.constant 0 : i32
    %c0_i32_1 = arith.constant 0 : i32
    return %c0_i32, %c0_i32_0 : i32, i32
  }
  func.func @transform_9(%arg0: i32) -> (i32, i32) {
    %c0_i32 = arith.constant 0 : i32
    %c0_i32_0 = arith.constant 0 : i32
    %c0_i32_1 = arith.constant 0 : i32
    return %c0_i32, %c0_i32_0 : i32, i32
  }
  func.func @transform_10(%arg0: i32) -> (i32, i32) {
    %c0_i32 = arith.constant 0 : i32
    %c0_i32_0 = arith.constant 0 : i32
    %c0_i32_1 = arith.constant 0 : i32
    return %c0_i32, %c0_i32_0 : i32, i32
  }
  func.func @transform_11(%arg0: i32) -> (i32, i32) {
    %c0_i32 = arith.constant 0 : i32
    %c0_i32_0 = arith.constant 0 : i32
    %c0_i32_1 = arith.constant 0 : i32
    return %c0_i32, %c0_i32_0 : i32, i32
  }
  func.func @transform_12(%arg0: i32) -> (i32, i32) {
    %c0_i32 = arith.constant 0 : i32
    %c0_i32_0 = arith.constant 0 : i32
    %c0_i32_1 = arith.constant 0 : i32
    return %c0_i32, %c0_i32_0 : i32, i32
  }
  func.func @transform_13(%arg0: i32) -> (i32, i32) {
    %c0_i32 = arith.constant 0 : i32
    %c0_i32_0 = arith.constant 0 : i32
    %c0_i32_1 = arith.constant 0 : i32
    return %c0_i32, %c0_i32_0 : i32, i32
  }
  func.func @transform_14(%arg0: i32) -> (i32, i32) {
    %c0_i32 = arith.constant 0 : i32
    %c0_i32_0 = arith.constant 0 : i32
    %c0_i32_1 = arith.constant 0 : i32
    return %c0_i32, %c0_i32_0 : i32, i32
  }
  func.func @transform_15(%arg0: i32) -> (i32, i32) {
    %c0_i32 = arith.constant 0 : i32
    %c0_i32_0 = arith.constant 0 : i32
    %c0_i32_1 = arith.constant 0 : i32
    return %c0_i32, %c0_i32_0 : i32, i32
  }
  func.func @transform_16(%arg0: i32) -> (i32, i32) {
    %c0_i32 = arith.constant 0 : i32
    %c0_i32_0 = arith.constant 0 : i32
    %c0_i32_1 = arith.constant 0 : i32
    return %c0_i32, %c0_i32_0 : i32, i32
  }
  func.func @transform_17(%arg0: i32) -> (i32, i32) {
    %c0_i32 = arith.constant 0 : i32
    %c0_i32_0 = arith.constant 0 : i32
    %c0_i32_1 = arith.constant 0 : i32
    return %c0_i32, %c0_i32_0 : i32, i32
  }
  func.func @transform_18(%arg0: i32) -> (i32, i32) {
    %c0_i32 = arith.constant 0 : i32
    %c0_i32_0 = arith.constant 0 : i32
    %c0_i32_1 = arith.constant 0 : i32
    return %c0_i32, %c0_i32_0 : i32, i32
  }
  func.func @transform_19(%arg0: i32) -> (i32, i32) {
    %c0_i32 = arith.constant 0 : i32
    %c0_i32_0 = arith.constant 0 : i32
    %c0_i32_1 = arith.constant 0 : i32
    return %c0_i32, %c0_i32_0 : i32, i32
  }
  func.func @transform_20(%arg0: i32) -> (i32, i32) {
    %c0_i32 = arith.constant 0 : i32
    %c0_i32_0 = arith.constant 0 : i32
    %c0_i32_1 = arith.constant 0 : i32
    return %c0_i32, %c0_i32_0 : i32, i32
  }
  func.func @transform_21(%arg0: i32) -> (i32, i32) {
    %c0_i32 = arith.constant 0 : i32
    %c0_i32_0 = arith.constant 0 : i32
    %c0_i32_1 = arith.constant 0 : i32
    return %c0_i32, %c0_i32_0 : i32, i32
  }
  func.func @transform_22(%arg0: i32) -> (i32, i32) {
    %c0_i32 = arith.constant 0 : i32
    %c0_i32_0 = arith.constant 0 : i32
    %c0_i32_1 = arith.constant 0 : i32
    return %c0_i32, %c0_i32_0 : i32, i32
  }
  func.func @transform_23(%arg0: i32) -> (i32, i32) {
    %c0_i32 = arith.constant 0 : i32
    %c0_i32_0 = arith.constant 0 : i32
    %c0_i32_1 = arith.constant 0 : i32
    return %c0_i32, %c0_i32_0 : i32, i32
  }
  func.func @transform_24(%arg0: i32) -> (i32, i32) {
    %c0_i32 = arith.constant 0 : i32
    %c0_i32_0 = arith.constant 0 : i32
    return %arg0, %c0_i32 : i32, i32
  }
  func.func @transform_25(%arg0: i32) -> (i32, i32) {
    %c0_i32 = arith.constant 0 : i32
    %c0_i32_0 = arith.constant 0 : i32
    return %arg0, %c0_i32 : i32, i32
  }
  func.func @transform_26(%arg0: i32) -> (i32, i32) {
    %c0_i32 = arith.constant 0 : i32
    %c0_i32_0 = arith.constant 0 : i32
    return %arg0, %c0_i32 : i32, i32
  }
  func.func @transform_27(%arg0: i32) -> (i32, i32) {
    %c0_i32 = arith.constant 0 : i32
    %c0_i32_0 = arith.constant 0 : i32
    return %arg0, %c0_i32 : i32, i32
  }
}

</mosaic_0001>

<bundles_post_ra>
// kernel: tpu_custom_call.1
= control target key start
LH: loop header
LB: loop body
LE: loop exit
PB: predicated region body
PF: predicated region fallthrough
CT: control target
= control target key end

     0   :  { %s5137_s0 = inlined_call_operand.hbm [shape: f32[16,128], index: 0, kind: input, shape index: {}]   ;;  %s5138_s1 = inlined_call_operand.hbm [shape: f32[16,128], index: 1, kind: input, shape index: {}]   ;;  %s5139_s2 = inlined_call_operand.hbm [shape: bf16[16,128], index: 2, kind: input, shape index: {}]   ;;  %s5140_s3 = inlined_call_operand.hbm [shape: bf16[128,128], index: 3, kind: input, shape index: {}]   ;;  %s5141_s4 = inlined_call_operand.hbm [shape: bf16[128,128], index: 4, kind: input, shape index: {}]   ;;  %s5142_s5 = inlined_call_operand.hbm [shape: bf16[128,128], index: 5, kind: input, shape index: {}]   ;;  %s5143_s6 = inlined_call_operand.hbm [shape: bf16[128,128], index: 6, kind: input, shape index: {}]   ;;  %s5144_s7 = inlined_call_operand.hbm [shape: bf16[128,128], index: 7, kind: input, shape index: {}]   ;;  %s5145_s8 = inlined_call_operand.hbm [shape: bf16[128,128], index: 8, kind: input, shape index: {}]   ;;  %s5146_s9 = inlined_call_operand.hbm [shape: bf16[128,128], index: 9, kind: input, shape index: {}]   ;;  %s5147_s10 = inlined_call_operand.hbm [shape: bf16[128,128], index: 10, kind: input, shape index: {}]   ;;  %s5148_s11 = inlined_call_operand.hbm [shape: bf16[128,128], index: 11, kind: input, shape index: {}]   ;;  %s5149_s12 = inlined_call_operand.hbm [shape: bf16[128,128], index: 12, kind: input, shape index: {}]   ;;  %s5150_s13 = inlined_call_operand.hbm [shape: bf16[128,128], index: 13, kind: input, shape index: {}]   ;;  %s5151_s14 = inlined_call_operand.hbm [shape: bf16[128,128], index: 14, kind: input, shape index: {}]   ;;  %s5152_s15 = inlined_call_operand.hbm [shape: bf16[128,128], index: 15, kind: input, shape index: {}]   ;;  %s5153_s16 = inlined_call_operand.hbm [shape: bf16[128,128], index: 16, kind: input, shape index: {}]   ;;  %s5154_s17 = inlined_call_operand.vmem [shape: bf16[128,128], index: 17, kind: input, shape index: {}]   ;;  %s5155_s18 = inlined_call_operand.hbm [shape: bf16[128,128], index: 18, kind: input, shape index: {}]   ;;  %s5156_s19 = inlined_call_operand.hbm [shape: bf16[128,128], index: 19, kind: input, shape index: {}]   ;;  %s5157_s20 = inlined_call_operand.hbm [shape: bf16[128,128], index: 20, kind: input, shape index: {}]   ;;  %s5158_s21 = inlined_call_operand.hbm [shape: bf16[128,128], index: 21, kind: input, shape index: {}]   ;;  %s5159_s22 = inlined_call_operand.hbm [shape: bf16[128,128], index: 22, kind: input, shape index: {}]   ;;  %s5160_s23 = inlined_call_operand.vmem [shape: f32[16,128], index: 23, kind: input, shape index: {}]   ;;  %s5161_s24 = inlined_call_operand.hbm [shape: f32[16,128], index: 24, kind: output, shape index: {0}]   ;;  %s5162_s25 = inlined_call_operand.hbm [shape: f32[16,128], index: 25, kind: output, shape index: {1}]   ;;  %s5163_s26 = inlined_call_operand.hbm [shape: f32[16,128], index: 26, kind: output, shape index: {2}]   ;;  %s5164_s27 = inlined_call_operand.hbm [shape: f32[16,128], index: 27, kind: output, shape index: {3}]  }
   0x1   :  { %5184 = sst [smem:[#allocation58_spill]] %s5137_s0 }
   0x2   :  { %5185 = sst [smem:[#allocation59_spill]] %s5138_s1 }
   0x3   :  { %5186 = sst [smem:[#allocation60_spill]] %s5139_s2 }
   0x4   :  { %5187 = sst [smem:[#allocation61_spill]] %s5140_s3 }
   0x5   :  { %5188 = sst [smem:[#allocation62_spill]] %s5141_s4 }
   0x6   :  { %5189 = sst [smem:[#allocation63_spill]] %s5142_s5 }
   0x7   :  { %5190 = sst [smem:[#allocation64_spill]] %s5143_s6 }
   0x8   :  { %5191 = sst [smem:[#allocation65_spill]] %s5144_s7 }
   0x9   :  { %5192 = sst [smem:[#allocation66_spill]] %s5145_s8 }
   0xa   :  { %5193 = sst [smem:[#allocation67_spill]] %s5146_s9 }
   0xb   :  { %5194 = sst [smem:[#allocation68_spill]] %s5147_s10 }
   0xc   :  { %5195 = sst [smem:[#allocation69_spill]] %s5148_s11 }
   0xd   :  { %5196 = sst [smem:[#allocation70_spill]] %s5162_s25 }
   0xe   :  { %5197 = sst [smem:[#allocation71_spill]] %s5163_s26 }
   0xf   :  { %5198 = sst [smem:[#allocation72_spill]] %s5164_s27 }
  0x10   :  { %33 = vsyncpa [#allocation3], 0 }
  0x11   :  { %34 = vsyncpa [#allocation6], 0 }
  0x12   :  { %35 = vsyncpa [#allocation9], 0 }
  0x13   :  { %36 = vsyncpa [#allocation12], 0 }
  0x14   :  { %37 = vsyncpa [#allocation15], 0 }
  0x15   :  { %38 = vsyncpa [#allocation18], 0 }
  0x16   :  { %39 = vsyncpa [#allocation21], 0 }
  0x17   :  { %40 = vsyncpa [#allocation24], 0 }
  0x18   :  { %41 = vsyncpa [#allocation27], 0 }
  0x19   :  { %42 = vsyncpa [#allocation30], 0 }
  0x1a   :  { %43 = vsyncpa [#allocation33], 0 }
  0x1b   :  { %44 = vsyncpa [#allocation36], 0 }
  0x1c   :  { %45 = vsyncpa [#allocation4], 0 }
  0x1d   :  { %46 = vsyncpa [#allocation39], 0 }
  0x1e   :  { %47 = vsyncpa [#allocation42], 0  ;;  %s4270_s7 = smov [#allocation5]   ;;  %s5199_s9 = sld [smem:[#allocation59_spill]] }
  0x1f   :  { %s65_s4 = sshll.u32 %s4270_s7, 4  ;;  %s66_s4 = int_to_ptr.vmem [resolvable:$true] %s65_s4 }
  0x24   :  { %s3668_s5 = scalar_lea.hbm %s5199_s9, 256 }
  0x25   :  { %p3669_p0 = scmp.ne.s32.totalorder %s5199_s9, %s3668_s5  ;;  %p3672_p1 = scmp.lt.u32.totalorder %s3668_s5, %s5199_s9 }
  0x27   :  { %p3674_p2 = pnand %p3672_p1, %p3669_p0 }
  0x29   :  { %3677 = shalt.err (!%p3674_p2)
}
  0x2a   :  { %s3678_s1 = scalar_lea.vmem %s66_s4, 256  ;;  %p3683_p4 = scmp.lt.s32.totalorder %s66_s4, %s66_s4 }
  0x2b   :  { %p3679_p3 = scmp.ne.s32.totalorder %s66_s4, %s3678_s1  ;;  %p3684_p5 = scmp.lt.s32.totalorder %s3678_s1, %s3678_s1 }
  0x2d   :  { %p3685_p6 = por %p3684_p5, %p3683_p4 }
  0x2f   :  { %p3686_p7 = pnand %p3685_p6, %p3679_p3 }
  0x31   :  { %3689 = shalt.err (!%p3686_p7)
}
  0x32   :  { %s5180_s6 = smov 128   ;;  %s5182_s11 = smov 8  }
  0x33   :  { %71 = dma.hbm_to_vmem [thread:$0]  %s5199_s9, 256, %s66_s4, [#allocation6], %s5180_s6, %s5180_s6, %s5182_s11  }
  0x34   :  { %s4273_s7 = smov [#allocation8]   ;;  %s4274_s30 = smov [#allocation11]  }
  0x35   :  { %s89_s8 = sshll.u32 %s4273_s7, 4  ;;  %s113_s5 = sshll.u32 %s4274_s30, 4  ;;  %s90_s8 = int_to_ptr.vmem [resolvable:$true] %s89_s8  ;;  %s114_s5 = int_to_ptr.vmem [resolvable:$true] %s113_s5 }
  0x36   :  { %s5200_s10 = sld [smem:[#allocation61_spill]] }
  0x3c   :  { %s3690_s29 = scalar_lea.hbm %s5200_s10, 1024 }
  0x3d   :  { %p3691_p8 = scmp.ne.s32.totalorder %s5200_s10, %s3690_s29  ;;  %p3694_p9 = scmp.lt.u32.totalorder %s3690_s29, %s5200_s10 }
  0x3f   :  { %p3696_p10 = pnand %p3694_p9, %p3691_p8 }
  0x41   :  { %3699 = shalt.err (!%p3696_p10)
}
  0x42   :  { %s3700_s4 = scalar_lea.vmem %s90_s8, 1024  ;;  %p3705_p12 = scmp.lt.s32.totalorder %s90_s8, %s90_s8 }
  0x43   :  { %p3701_p11 = scmp.ne.s32.totalorder %s90_s8, %s3700_s4  ;;  %p3706_p13 = scmp.lt.s32.totalorder %s3700_s4, %s3700_s4 }
  0x45   :  { %p3707_p0 = por %p3706_p13, %p3705_p12 }
  0x47   :  { %p3708_p1 = pnand %p3707_p0, %p3701_p11 }
  0x49   :  { %3711 = shalt.err (!%p3708_p1)
}
  0x4a   :  { %s4275_s9 = smov 64   ;;  %s4276_s2 = smov 4  }
  0x4b   :  { %95 = dma.hbm_to_vmem [thread:$0]  %s5200_s10, 1024, %s90_s8, [#allocation9], %s4275_s9, %s4275_s9, %s4276_s2  }
  0x4c   :  { %s5201_s7 = sld [smem:[#allocation63_spill]] }
  0x52   :  { %s3712_s30 = scalar_lea.hbm %s5201_s7, 1024 }
  0x53   :  { %p3713_p2 = scmp.ne.s32.totalorder %s5201_s7, %s3712_s30  ;;  %p3716_p3 = scmp.lt.u32.totalorder %s3712_s30, %s5201_s7 }
  0x55   :  { %p3718_p4 = pnand %p3716_p3, %p3713_p2 }
  0x57   :  { %3721 = shalt.err (!%p3718_p4)
}
  0x58   :  { %s3722_s4 = scalar_lea.vmem %s114_s5, 1024  ;;  %p3727_p6 = scmp.lt.s32.totalorder %s114_s5, %s114_s5 }
  0x59   :  { %p3723_p5 = scmp.ne.s32.totalorder %s114_s5, %s3722_s4  ;;  %p3728_p7 = scmp.lt.s32.totalorder %s3722_s4, %s3722_s4 }
  0x5b   :  { %p3729_p8 = por %p3728_p7, %p3727_p6 }
  0x5d   :  { %p3730_p9 = pnand %p3729_p8, %p3723_p5 }
  0x5f   :  { %3733 = shalt.err (!%p3730_p9)
}
  0x60   :  { %119 = dma.hbm_to_vmem [thread:$0]  %s5201_s7, 1024, %s114_s5, [#allocation12], %s4275_s9, %s4275_s9, %s4276_s2  }
  0x61   :  { %s4277_s27 = smov [#allocation14]   ;;  %s4278_s25 = smov [#allocation17]  }
  0x62   :  { %s137_s3 = sshll.u32 %s4277_s27, 4  ;;  %s161_s26 = sshll.u32 %s4278_s25, 4  ;;  %s138_s3 = int_to_ptr.vmem [resolvable:$true] %s137_s3  ;;  %s162_s26 = int_to_ptr.vmem [resolvable:$true] %s161_s26 }
  0x63   :  { %s5202_s0 = sld [smem:[#allocation65_spill]] }
  0x69   :  { %s3734_s29 = scalar_lea.hbm %s5202_s0, 1024 }
  0x6a   :  { %p3735_p10 = scmp.ne.s32.totalorder %s5202_s0, %s3734_s29  ;;  %p3738_p11 = scmp.lt.u32.totalorder %s3734_s29, %s5202_s0 }
  0x6c   :  { %p3740_p12 = pnand %p3738_p11, %p3735_p10 }
  0x6e   :  { %3743 = shalt.err (!%p3740_p12)
}
  0x6f   :  { %s3744_s5 = scalar_lea.vmem %s138_s3, 1024  ;;  %p3749_p0 = scmp.lt.s32.totalorder %s138_s3, %s138_s3 }
  0x70   :  { %p3745_p13 = scmp.ne.s32.totalorder %s138_s3, %s3744_s5  ;;  %p3750_p1 = scmp.lt.s32.totalorder %s3744_s5, %s3744_s5 }
  0x72   :  { %p3751_p2 = por %p3750_p1, %p3749_p0 }
  0x74   :  { %p3752_p3 = pnand %p3751_p2, %p3745_p13 }
  0x76   :  { %3755 = shalt.err (!%p3752_p3)
}
  0x77   :  { %143 = dma.hbm_to_vmem [thread:$0]  %s5202_s0, 1024, %s138_s3, [#allocation15], %s4275_s9, %s4275_s9, %s4276_s2  }
  0x78   :  { %s5203_s11 = sld [smem:[#allocation67_spill]] }
  0x7e   :  { %s3756_s27 = scalar_lea.hbm %s5203_s11, 1024 }
  0x7f   :  { %p3757_p4 = scmp.ne.s32.totalorder %s5203_s11, %s3756_s27  ;;  %p3760_p5 = scmp.lt.u32.totalorder %s3756_s27, %s5203_s11 }
  0x81   :  { %p3762_p6 = pnand %p3760_p5, %p3757_p4 }
  0x83   :  { %3765 = shalt.err (!%p3762_p6)
}
  0x84   :  { %s3766_s1 = scalar_lea.vmem %s162_s26, 1024  ;;  %p3771_p8 = scmp.lt.s32.totalorder %s162_s26, %s162_s26 }
  0x85   :  { %p3767_p7 = scmp.ne.s32.totalorder %s162_s26, %s3766_s1  ;;  %p3772_p9 = scmp.lt.s32.totalorder %s3766_s1, %s3766_s1 }
  0x87   :  { %p3773_p10 = por %p3772_p9, %p3771_p8 }
  0x89   :  { %p3774_p11 = pnand %p3773_p10, %p3767_p7 }
  0x8b   :  { %3777 = shalt.err (!%p3774_p11)
}
  0x8c   :  { %167 = dma.hbm_to_vmem [thread:$0]  %s5203_s11, 1024, %s162_s26, [#allocation18], %s4275_s9, %s4275_s9, %s4276_s2  }
  0x8d   :  { %s4279_s4 = smov [#allocation20]   ;;  %s4280_s7 = smov [#allocation23]  }
  0x8e   :  { %s185_s5 = sshll.u32 %s4279_s4, 4  ;;  %s209_s8 = sshll.u32 %s4280_s7, 4  ;;  %s186_s5 = int_to_ptr.vmem [resolvable:$true] %s185_s5  ;;  %s210_s8 = int_to_ptr.vmem [resolvable:$true] %s209_s8 }
  0x8f   :  { %s5204_s27 = sld [smem:[#allocation69_spill]] }
  0x95   :  { %s3778_s25 = scalar_lea.hbm %s5204_s27, 1024 }
  0x96   :  { %p3779_p12 = scmp.ne.s32.totalorder %s5204_s27, %s3778_s25  ;;  %p3782_p13 = scmp.lt.u32.totalorder %s3778_s25, %s5204_s27 }
  0x98   :  { %p3784_p0 = pnand %p3782_p13, %p3779_p12 }
  0x9a   :  { %3787 = shalt.err (!%p3784_p0)
}
  0x9b   :  { %s3788_s26 = scalar_lea.vmem %s186_s5, 1024  ;;  %p3793_p2 = scmp.lt.s32.totalorder %s186_s5, %s186_s5 }
  0x9c   :  { %p3789_p1 = scmp.ne.s32.totalorder %s186_s5, %s3788_s26  ;;  %p3794_p3 = scmp.lt.s32.totalorder %s3788_s26, %s3788_s26 }
  0x9e   :  { %p3795_p4 = por %p3794_p3, %p3793_p2 }
  0xa0   :  { %p3796_p5 = pnand %p3795_p4, %p3789_p1 }
  0xa2   :  { %3799 = shalt.err (!%p3796_p5)
}
  0xa3   :  { %191 = dma.hbm_to_vmem [thread:$0]  %s5204_s27, 1024, %s186_s5, [#allocation21], %s4275_s9, %s4275_s9, %s4276_s2  }
  0xa4   :  { %s3800_s7 = scalar_lea.hbm %s5150_s13, 1024 }
  0xa5   :  { %p3801_p6 = scmp.ne.s32.totalorder %s5150_s13, %s3800_s7  ;;  %p3804_p7 = scmp.lt.u32.totalorder %s3800_s7, %s5150_s13 }
  0xa7   :  { %p3806_p8 = pnand %p3804_p7, %p3801_p6 }
  0xa9   :  { %3809 = shalt.err (!%p3806_p8)
}
  0xaa   :  { %s3810_s28 = scalar_lea.vmem %s210_s8, 1024  ;;  %p3815_p10 = scmp.lt.s32.totalorder %s210_s8, %s210_s8 }
  0xab   :  { %p3811_p9 = scmp.ne.s32.totalorder %s210_s8, %s3810_s28  ;;  %p3816_p11 = scmp.lt.s32.totalorder %s3810_s28, %s3810_s28 }
  0xad   :  { %p3817_p12 = por %p3816_p11, %p3815_p10 }
  0xaf   :  { %p3818_p13 = pnand %p3817_p12, %p3811_p9 }
  0xb1   :  { %3821 = shalt.err (!%p3818_p13)
}
  0xb2   :  { %215 = dma.hbm_to_vmem [thread:$0]  %s5150_s13, 1024, %s210_s8, [#allocation24], %s4275_s9, %s4275_s9, %s4276_s2  }
  0xb3   :  { %s4281_s29 = smov [#allocation26]   ;;  %s4282_s26 = smov [#allocation29]  }
  0xb4   :  { %s233_s1 = sshll.u32 %s4281_s29, 4  ;;  %s259_s11 = sshll.u32 %s4282_s26, 4  ;;  %s234_s1 = int_to_ptr.vmem [resolvable:$true] %s233_s1  ;;  %s260_s11 = int_to_ptr.vmem [resolvable:$true] %s259_s11 }
  0xb5   :  { %s3822_s4 = scalar_lea.hbm %s5152_s15, 1024 }
  0xb6   :  { %p3823_p0 = scmp.ne.s32.totalorder %s5152_s15, %s3822_s4  ;;  %p3826_p1 = scmp.lt.u32.totalorder %s3822_s4, %s5152_s15 }
  0xb8   :  { %p3828_p2 = pnand %p3826_p1, %p3823_p0 }
  0xba   :  { %3831 = shalt.err (!%p3828_p2)
}
  0xbb   :  { %s3832_s13 = scalar_lea.vmem %s234_s1, 1024  ;;  %p3837_p4 = scmp.lt.s32.totalorder %s234_s1, %s234_s1 }
  0xbc   :  { %p3833_p3 = scmp.ne.s32.totalorder %s234_s1, %s3832_s13  ;;  %p3838_p5 = scmp.lt.s32.totalorder %s3832_s13, %s3832_s13 }
  0xbe   :  { %p3839_p6 = por %p3838_p5, %p3837_p4 }
  0xc0   :  { %p3840_p7 = pnand %p3839_p6, %p3833_p3 }
  0xc2   :  { %3843 = shalt.err (!%p3840_p7)
}
  0xc3   :  { %239 = dma.hbm_to_vmem [thread:$0]  %s5152_s15, 1024, %s234_s1, [#allocation27], %s4275_s9, %s4275_s9, %s4276_s2  }
  0xc4   :  { %s3844_s27 = scalar_lea.hbm %s5155_s18, 1024 }
  0xc5   :  { %p3845_p8 = scmp.ne.s32.totalorder %s5155_s18, %s3844_s27  ;;  %p3848_p9 = scmp.lt.u32.totalorder %s3844_s27, %s5155_s18 }
  0xc7   :  { %p3850_p10 = pnand %p3848_p9, %p3845_p8 }
  0xc9   :  { %3853 = shalt.err (!%p3850_p10)
}
  0xca   :  { %s3854_s4 = scalar_lea.vmem %s260_s11, 1024  ;;  %p3859_p12 = scmp.lt.s32.totalorder %s260_s11, %s260_s11 }
  0xcb   :  { %p3855_p11 = scmp.ne.s32.totalorder %s260_s11, %s3854_s4  ;;  %p3860_p13 = scmp.lt.s32.totalorder %s3854_s4, %s3854_s4 }
  0xcd   :  { %p3861_p0 = por %p3860_p13, %p3859_p12 }
  0xcf   :  { %p3862_p1 = pnand %p3861_p0, %p3855_p11 }
  0xd1   :  { %3865 = shalt.err (!%p3862_p1)
}
  0xd2   :  { %265 = dma.hbm_to_vmem [thread:$0]  %s5155_s18, 1024, %s260_s11, [#allocation30], %s4275_s9, %s4275_s9, %s4276_s2  }
  0xd3   :  { %s4283_s7 = smov [#allocation32]   ;;  %s4284_s6 = smov [#allocation2]  }
  0xd4   :  { %s283_s10 = sshll.u32 %s4283_s7, 4  ;;  %s53_s25 = sshll.u32 %s4284_s6, 4  ;;  %s284_s10 = int_to_ptr.vmem [resolvable:$true] %s283_s10  ;;  %s54_s25 = int_to_ptr.vmem [resolvable:$true] %s53_s25 }
  0xd5   :  { %s3866_s30 = scalar_lea.hbm %s5157_s20, 1024 }
  0xd6   :  { %p3867_p2 = scmp.ne.s32.totalorder %s5157_s20, %s3866_s30  ;;  %p3870_p3 = scmp.lt.u32.totalorder %s3866_s30, %s5157_s20 }
  0xd8   :  { %p3872_p4 = pnand %p3870_p3, %p3867_p2 }
  0xda   :  { %3875 = shalt.err (!%p3872_p4)
}
  0xdb   :  { %s3876_s18 = scalar_lea.vmem %s284_s10, 1024  ;;  %p3881_p6 = scmp.lt.s32.totalorder %s284_s10, %s284_s10 }
  0xdc   :  { %p3877_p5 = scmp.ne.s32.totalorder %s284_s10, %s3876_s18  ;;  %p3882_p7 = scmp.lt.s32.totalorder %s3876_s18, %s3876_s18 }
  0xde   :  { %p3883_p8 = por %p3882_p7, %p3881_p6 }
  0xe0   :  { %p3884_p9 = pnand %p3883_p8, %p3877_p5 }
  0xe2   :  { %3887 = shalt.err (!%p3884_p9)
}
  0xe3   :  { %289 = dma.hbm_to_vmem [thread:$0]  %s5157_s20, 1024, %s284_s10, [#allocation33], %s4275_s9, %s4275_s9, %s4276_s2  }
  0xe4   :  { %s5205_s4 = sld [smem:[#allocation58_spill]] }
  0xea   :  { %s3888_s15 = scalar_lea.hbm %s5205_s4, 256 }
  0xeb   :  { %p3889_p10 = scmp.ne.s32.totalorder %s5205_s4, %s3888_s15  ;;  %p3892_p11 = scmp.lt.u32.totalorder %s3888_s15, %s5205_s4 }
  0xed   :  { %p3894_p12 = pnand %p3892_p11, %p3889_p10 }
  0xef   :  { %3897 = shalt.err (!%p3894_p12)
}
  0xf0   :  { %s3898_s8 = scalar_lea.vmem %s54_s25, 256  ;;  %p3903_p0 = scmp.lt.s32.totalorder %s54_s25, %s54_s25 }
  0xf1   :  { %p3899_p13 = scmp.ne.s32.totalorder %s54_s25, %s3898_s8  ;;  %p3904_p1 = scmp.lt.s32.totalorder %s3898_s8, %s3898_s8 }
  0xf3   :  { %p3905_p2 = por %p3904_p1, %p3903_p0 }
  0xf5   :  { %p3906_p3 = pnand %p3905_p2, %p3899_p13 }
  0xf7   :  { %3909 = shalt.err (!%p3906_p3)
}
  0xf8   :  { %s5206_s20 = smov 8   ;;  %s5207_s10 = smov 128  }
  0xf9   :  { %59 = dma.hbm_to_vmem [thread:$0]  %s5205_s4, 256, %s54_s25, [#allocation3], %s5207_s10, %s5207_s10, %s5206_s20  }
  0xfa   :  { %s4285_s5 = smov [#allocation7]   ;;  %s4286_s29 = smov [#allocation10]  }
  0xfb   :  { %s77_s27 = sshll.u32 %s4285_s5, 4  ;;  %s101_s18 = sshll.u32 %s4286_s29, 4  ;;  %s78_s27 = int_to_ptr.vmem [resolvable:$true] %s77_s27  ;;  %s102_s18 = int_to_ptr.vmem [resolvable:$true] %s101_s18 }
  0xfc   :  { %s5208_s3 = sld [smem:[#allocation60_spill]] }
 0x102   :  { %s3910_s0 = scalar_lea.hbm %s5208_s3, 128 }
 0x103   :  { %p3911_p4 = scmp.ne.s32.totalorder %s5208_s3, %s3910_s0  ;;  %p3914_p5 = scmp.lt.u32.totalorder %s3910_s0, %s5208_s3 }
 0x105   :  { %p3916_p6 = pnand %p3914_p5, %p3911_p4 }
 0x107   :  { %3919 = shalt.err (!%p3916_p6)
}
 0x108   :  { %s3920_s25 = scalar_lea.vmem %s78_s27, 128  ;;  %p3925_p8 = scmp.lt.s32.totalorder %s78_s27, %s78_s27 }
 0x109   :  { %p3921_p7 = scmp.ne.s32.totalorder %s78_s27, %s3920_s25  ;;  %p3926_p9 = scmp.lt.s32.totalorder %s3920_s25, %s3920_s25 }
 0x10b   :  { %p3927_p10 = por %p3926_p9, %p3925_p8 }
 0x10d   :  { %p3928_p11 = pnand %p3927_p10, %p3921_p7 }
 0x10f   :  { %3931 = shalt.err (!%p3928_p11)
}
 0x110   :  { %83 = dma.hbm_to_vmem [thread:$0]  %s5208_s3, 128, %s78_s27, [#allocation6], %s4275_s9, %s4275_s9, %s4276_s2  }
 0x111   :  { %s5209_s28 = sld [smem:[#allocation62_spill]] }
 0x117   :  { %s3932_s5 = scalar_lea.hbm %s5209_s28, 1024 }
 0x118   :  { %p3933_p12 = scmp.ne.s32.totalorder %s5209_s28, %s3932_s5  ;;  %p3936_p13 = scmp.lt.u32.totalorder %s3932_s5, %s5209_s28 }
 0x11a   :  { %p3938_p0 = pnand %p3936_p13, %p3933_p12 }
 0x11c   :  { %3941 = shalt.err (!%p3938_p0)
}
 0x11d   :  { %s3942_s15 = scalar_lea.vmem %s102_s18, 1024  ;;  %p3947_p2 = scmp.lt.s32.totalorder %s102_s18, %s102_s18 }
 0x11e   :  { %p3943_p1 = scmp.ne.s32.totalorder %s102_s18, %s3942_s15  ;;  %p3948_p3 = scmp.lt.s32.totalorder %s3942_s15, %s3942_s15 }
 0x120   :  { %p3949_p4 = por %p3948_p3, %p3947_p2 }
 0x122   :  { %p3950_p5 = pnand %p3949_p4, %p3943_p1 }
 0x124   :  { %3953 = shalt.err (!%p3950_p5)
}
 0x125   :  { %107 = dma.hbm_to_vmem [thread:$0]  %s5209_s28, 1024, %s102_s18, [#allocation9], %s4275_s9, %s4275_s9, %s4276_s2  }
 0x126   :  { %s4287_s1 = smov [#allocation13]   ;;  %s4288_s6 = smov [#allocation16]  }
 0x127   :  { %s125_s7 = sshll.u32 %s4287_s1, 4  ;;  %s149_s25 = sshll.u32 %s4288_s6, 4  ;;  %s126_s7 = int_to_ptr.vmem [resolvable:$true] %s125_s7  ;;  %s150_s25 = int_to_ptr.vmem [resolvable:$true] %s149_s25 }
 0x128   :  { %s5210_s8 = sld [smem:[#allocation64_spill]] }
 0x12e   :  { %s3954_s30 = scalar_lea.hbm %s5210_s8, 1024 }
 0x12f   :  { %p3955_p6 = scmp.ne.s32.totalorder %s5210_s8, %s3954_s30  ;;  %p3958_p7 = scmp.lt.u32.totalorder %s3954_s30, %s5210_s8 }
 0x131   :  { %p3960_p8 = pnand %p3958_p7, %p3955_p6 }
 0x133   :  { %3963 = shalt.err (!%p3960_p8)
}
 0x134   :  { %s3964_s18 = scalar_lea.vmem %s126_s7, 1024  ;;  %p3969_p10 = scmp.lt.s32.totalorder %s126_s7, %s126_s7 }
 0x135   :  { %p3965_p9 = scmp.ne.s32.totalorder %s126_s7, %s3964_s18  ;;  %p3970_p11 = scmp.lt.s32.totalorder %s3964_s18, %s3964_s18 }
 0x137   :  { %p3971_p12 = por %p3970_p11, %p3969_p10 }
 0x139   :  { %p3972_p13 = pnand %p3971_p12, %p3965_p9 }
 0x13b   :  { %3975 = shalt.err (!%p3972_p13)
}
 0x13c   :  { %131 = dma.hbm_to_vmem [thread:$0]  %s5210_s8, 1024, %s126_s7, [#allocation12], %s4275_s9, %s4275_s9, %s4276_s2  }
 0x13d   :  { %s5211_s3 = sld [smem:[#allocation66_spill]] }
 0x143   :  { %s3976_s1 = scalar_lea.hbm %s5211_s3, 1024 }
 0x144   :  { %p3977_p0 = scmp.ne.s32.totalorder %s5211_s3, %s3976_s1  ;;  %p3980_p1 = scmp.lt.u32.totalorder %s3976_s1, %s5211_s3 }
 0x146   :  { %p3982_p2 = pnand %p3980_p1, %p3977_p0 }
 0x148   :  { %3985 = shalt.err (!%p3982_p2)
}
 0x149   :  { %s3986_s5 = scalar_lea.vmem %s150_s25, 1024  ;;  %p3991_p4 = scmp.lt.s32.totalorder %s150_s25, %s150_s25 }
 0x14a   :  { %p3987_p3 = scmp.ne.s32.totalorder %s150_s25, %s3986_s5  ;;  %p3992_p5 = scmp.lt.s32.totalorder %s3986_s5, %s3986_s5 }
 0x14c   :  { %p3993_p6 = por %p3992_p5, %p3991_p4 }
 0x14e   :  { %p3994_p7 = pnand %p3993_p6, %p3987_p3 }
 0x150   :  { %3997 = shalt.err (!%p3994_p7)
}
 0x151   :  { %155 = dma.hbm_to_vmem [thread:$0]  %s5211_s3, 1024, %s150_s25, [#allocation15], %s4275_s9, %s4275_s9, %s4276_s2  }
 0x152   :  { %s4289_s29 = smov [#allocation19]   ;;  %s4290_s26 = smov [#allocation22]  }
 0x153   :  { %s173_s11 = sshll.u32 %s4289_s29, 4  ;;  %s197_s18 = sshll.u32 %s4290_s26, 4  ;;  %s174_s11 = int_to_ptr.vmem [resolvable:$true] %s173_s11  ;;  %s198_s18 = int_to_ptr.vmem [resolvable:$true] %s197_s18 }
 0x154   :  { %s5212_s15 = sld [smem:[#allocation68_spill]] }
 0x15a   :  { %s3998_s27 = scalar_lea.hbm %s5212_s15, 1024 }
 0x15b   :  { %p3999_p8 = scmp.ne.s32.totalorder %s5212_s15, %s3998_s27  ;;  %p4002_p9 = scmp.lt.u32.totalorder %s3998_s27, %s5212_s15 }
 0x15d   :  { %p4004_p10 = pnand %p4002_p9, %p3999_p8 }
 0x15f   :  { %4007 = shalt.err (!%p4004_p10)
}
 0x160   :  { %s4008_s25 = scalar_lea.vmem %s174_s11, 1024  ;;  %p4013_p12 = scmp.lt.s32.totalorder %s174_s11, %s174_s11 }
 0x161   :  { %p4009_p11 = scmp.ne.s32.totalorder %s174_s11, %s4008_s25  ;;  %p4014_p13 = scmp.lt.s32.totalorder %s4008_s25, %s4008_s25 }
 0x163   :  { %p4015_p0 = por %p4014_p13, %p4013_p12 }
 0x165   :  { %p4016_p1 = pnand %p4015_p0, %p4009_p11 }
 0x167   :  { %4019 = shalt.err (!%p4016_p1)
}
 0x168   :  { %179 = dma.hbm_to_vmem [thread:$0]  %s5212_s15, 1024, %s174_s11, [#allocation18], %s4275_s9, %s4275_s9, %s4276_s2  }
 0x169   :  { %s4020_s8 = scalar_lea.hbm %s5149_s12, 1024 }
 0x16a   :  { %p4021_p2 = scmp.ne.s32.totalorder %s5149_s12, %s4020_s8  ;;  %p4024_p3 = scmp.lt.u32.totalorder %s4020_s8, %s5149_s12 }
 0x16c   :  { %p4026_p4 = pnand %p4024_p3, %p4021_p2 }
 0x16e   :  { %4029 = shalt.err (!%p4026_p4)
}
 0x16f   :  { %s4030_s27 = scalar_lea.vmem %s198_s18, 1024  ;;  %p4035_p6 = scmp.lt.s32.totalorder %s198_s18, %s198_s18 }
 0x170   :  { %p4031_p5 = scmp.ne.s32.totalorder %s198_s18, %s4030_s27  ;;  %p4036_p7 = scmp.lt.s32.totalorder %s4030_s27, %s4030_s27 }
 0x172   :  { %p4037_p8 = por %p4036_p7, %p4035_p6 }
 0x174   :  { %p4038_p9 = pnand %p4037_p8, %p4031_p5 }
 0x176   :  { %4041 = shalt.err (!%p4038_p9)
}
 0x177   :  { %203 = dma.hbm_to_vmem [thread:$0]  %s5149_s12, 1024, %s198_s18, [#allocation21], %s4275_s9, %s4275_s9, %s4276_s2  }
 0x178   :  { %s4291_s1 = smov [#allocation25]   ;;  %s4292_s4 = smov [#allocation28]  }
 0x179   :  { %s221_s6 = sshll.u32 %s4291_s1, 4  ;;  %s245_s13 = sshll.u32 %s4292_s4, 4  ;;  %s222_s6 = int_to_ptr.vmem [resolvable:$true] %s221_s6  ;;  %s246_s13 = int_to_ptr.vmem [resolvable:$true] %s245_s13 }
 0x17a   :  { %s4042_s30 = scalar_lea.hbm %s5151_s14, 1024 }
 0x17b   :  { %p4043_p10 = scmp.ne.s32.totalorder %s5151_s14, %s4042_s30  ;;  %p4046_p11 = scmp.lt.u32.totalorder %s4042_s30, %s5151_s14 }
 0x17d   :  { %p4048_p12 = pnand %p4046_p11, %p4043_p10 }
 0x17f   :  { %4051 = shalt.err (!%p4048_p12)
}
 0x180   :  { %s4052_s12 = scalar_lea.vmem %s222_s6, 1024  ;;  %p4057_p0 = scmp.lt.s32.totalorder %s222_s6, %s222_s6 }
 0x181   :  { %p4053_p13 = scmp.ne.s32.totalorder %s222_s6, %s4052_s12  ;;  %p4058_p1 = scmp.lt.s32.totalorder %s4052_s12, %s4052_s12 }
 0x183   :  { %p4059_p2 = por %p4058_p1, %p4057_p0 }
 0x185   :  { %p4060_p3 = pnand %p4059_p2, %p4053_p13 }
 0x187   :  { %4063 = shalt.err (!%p4060_p3)
}
 0x188   :  { %227 = dma.hbm_to_vmem [thread:$0]  %s5151_s14, 1024, %s222_s6, [#allocation24], %s4275_s9, %s4275_s9, %s4276_s2  }
 0x189   :  { %s4064_s27 = scalar_lea.hbm %s5153_s16, 1024 }
 0x18a   :  { %p4065_p4 = scmp.ne.s32.totalorder %s5153_s16, %s4064_s27  ;;  %p4068_p5 = scmp.lt.u32.totalorder %s4064_s27, %s5153_s16 }
 0x18c   :  { %p4070_p6 = pnand %p4068_p5, %p4065_p4 }
 0x18e   :  { %4073 = shalt.err (!%p4070_p6)
}
 0x18f   :  { %s4074_s25 = scalar_lea.vmem %s246_s13, 1024  ;;  %p4079_p8 = scmp.lt.s32.totalorder %s246_s13, %s246_s13 }
 0x190   :  { %p4075_p7 = scmp.ne.s32.totalorder %s246_s13, %s4074_s25  ;;  %p4080_p9 = scmp.lt.s32.totalorder %s4074_s25, %s4074_s25 }
 0x192   :  { %p4081_p10 = por %p4080_p9, %p4079_p8 }
 0x194   :  { %p4082_p11 = pnand %p4081_p10, %p4075_p7 }
 0x196   :  { %4085 = shalt.err (!%p4082_p11)
}
 0x197   :  { %251 = dma.hbm_to_vmem [thread:$0]  %s5153_s16, 1024, %s246_s13, [#allocation27], %s4275_s9, %s4275_s9, %s4276_s2  }
 0x198   :  { %s4293_s3 = smov [#allocation31]   ;;  %s4294_s5 = smov [#allocation34]  }
 0x199   :  { %s271_s30 = sshll.u32 %s4293_s3, 4  ;;  %s295_s7 = sshll.u32 %s4294_s5, 4  ;;  %s272_s30 = int_to_ptr.vmem [resolvable:$true] %s271_s30  ;;  %s296_s7 = int_to_ptr.vmem [resolvable:$true] %s295_s7 }
 0x19a   :  { %s4086_s12 = scalar_lea.hbm %s5156_s19, 1024 }
 0x19b   :  { %p4087_p12 = scmp.ne.s32.totalorder %s5156_s19, %s4086_s12  ;;  %p4090_p13 = scmp.lt.u32.totalorder %s4086_s12, %s5156_s19 }
 0x19d   :  { %p4092_p0 = pnand %p4090_p13, %p4087_p12 }
 0x19f   :  { %4095 = shalt.err (!%p4092_p0)
}
 0x1a0   :  { %s4096_s16 = scalar_lea.vmem %s272_s30, 1024  ;;  %p4101_p2 = scmp.lt.s32.totalorder %s272_s30, %s272_s30 }
 0x1a1   :  { %p4097_p1 = scmp.ne.s32.totalorder %s272_s30, %s4096_s16  ;;  %p4102_p3 = scmp.lt.s32.totalorder %s4096_s16, %s4096_s16 }
 0x1a3   :  { %p4103_p4 = por %p4102_p3, %p4101_p2 }
 0x1a5   :  { %p4104_p5 = pnand %p4103_p4, %p4097_p1 }
 0x1a7   :  { %4107 = shalt.err (!%p4104_p5)
}
 0x1a8   :  { %277 = dma.hbm_to_vmem [thread:$0]  %s5156_s19, 1024, %s272_s30, [#allocation30], %s4275_s9, %s4275_s9, %s4276_s2  }
 0x1a9   :  { %s4108_s1 = scalar_lea.hbm %s5158_s21, 1024 }
 0x1aa   :  { %p4109_p6 = scmp.ne.s32.totalorder %s5158_s21, %s4108_s1  ;;  %p4112_p7 = scmp.lt.u32.totalorder %s4108_s1, %s5158_s21 }
 0x1ac   :  { %p4114_p8 = pnand %p4112_p7, %p4109_p6 }
 0x1ae   :  { %4117 = shalt.err (!%p4114_p8)
}
 0x1af   :  { %s4118_s3 = scalar_lea.vmem %s296_s7, 1024  ;;  %p4123_p10 = scmp.lt.s32.totalorder %s296_s7, %s296_s7 }
 0x1b0   :  { %p4119_p9 = scmp.ne.s32.totalorder %s296_s7, %s4118_s3  ;;  %p4124_p11 = scmp.lt.s32.totalorder %s4118_s3, %s4118_s3 }
 0x1b2   :  { %p4125_p12 = por %p4124_p11, %p4123_p10 }
 0x1b4   :  { %p4126_p13 = pnand %p4125_p12, %p4119_p9 }
 0x1b6   :  { %4129 = shalt.err (!%p4126_p13)
}
 0x1b7   :  { %301 = dma.hbm_to_vmem [thread:$0]  %s5158_s21, 1024, %s296_s7, [#allocation33], %s4275_s9, %s4275_s9, %s4276_s2  }
 0x1b8   :  { %s4295_s5 = smov [#allocation35]   ;;  %s4130_s18 = scalar_lea.hbm %s5159_s22, 1024 }
 0x1b9   :  { %s307_s8 = sshll.u32 %s4295_s5, 4  ;;  %p4131_p0 = scmp.ne.s32.totalorder %s5159_s22, %s4130_s18  ;;  %s308_s8 = int_to_ptr.vmem [resolvable:$true] %s307_s8 }
 0x1ba   :  { %p4134_p1 = scmp.lt.u32.totalorder %s4130_s18, %s5159_s22 }
 0x1bc   :  { %p4136_p2 = pnand %p4134_p1, %p4131_p0 }
 0x1be   :  { %4139 = shalt.err (!%p4136_p2)
}
 0x1bf   :  { %s4140_s13 = scalar_lea.vmem %s308_s8, 1024  ;;  %p4145_p4 = scmp.lt.s32.totalorder %s308_s8, %s308_s8 }
 0x1c0   :  { %p4141_p3 = scmp.ne.s32.totalorder %s308_s8, %s4140_s13  ;;  %p4146_p5 = scmp.lt.s32.totalorder %s4140_s13, %s4140_s13 }
 0x1c2   :  { %p4147_p6 = por %p4146_p5, %p4145_p4 }
 0x1c4   :  { %p4148_p7 = pnand %p4147_p6, %p4141_p3 }
 0x1c6   :  { %4151 = shalt.err (!%p4148_p7)
}
 0x1c7   :  { %313 = dma.hbm_to_vmem [thread:$0]  %s5159_s22, 1024, %s308_s8, [#allocation36], %s4275_s9, %s4275_s9, %s4276_s2  }
 0x1c8   :  { %4240 = dma.done.wait [#allocation3], 256  }
 0x1c9   :  { %4241 = vsyncadd [#allocation3], 4294967040 }
 0x1ca   :  { %4242 = dma.done.wait [#allocation6], 384  }
 0x1cb   :  { %4243 = vsyncadd [#allocation6], 4294966912 }
 0x1cc   :  { %4244 = dma.done.wait [#allocation9], 2048  }
 0x1cd   :  { %4245 = vsyncadd [#allocation9], 4294965248 }
 0x1ce   :  { %4246 = dma.done.wait [#allocation12], 2048  }
 0x1cf   :  { %4247 = vsyncadd [#allocation12], 4294965248 }
 0x1d0   :  { %4248 = dma.done.wait [#allocation15], 2048  }
 0x1d1   :  { %4249 = vsyncadd [#allocation15], 4294965248 }
 0x1d2   :  { %4250 = dma.done.wait [#allocation18], 2048  }
 0x1d3   :  { %4251 = vsyncadd [#allocation18], 4294965248 }
 0x1d4   :  { %4252 = dma.done.wait [#allocation21], 2048  }
 0x1d5   :  { %4253 = vsyncadd [#allocation21], 4294965248 }
 0x1d6   :  { %4254 = dma.done.wait [#allocation24], 2048  }
 0x1d7   :  { %4255 = vsyncadd [#allocation24], 4294965248 }
 0x1d8   :  { %4256 = dma.done.wait [#allocation27], 2048  }
 0x1d9   :  { %4257 = vsyncadd [#allocation27], 4294965248 }
 0x1da   :  { %4258 = dma.done.wait [#allocation30], 2048  }
 0x1db   :  { %4259 = vsyncadd [#allocation30], 4294965248 }
 0x1dc   :  { %4260 = dma.done.wait [#allocation33], 2048  }
 0x1dd   :  { %4261 = vsyncadd [#allocation33], 4294965248 }
 0x1de   :  { %4262 = dma.done.wait [#allocation36], 1024  }
 0x1df   :  { %4263 = vsyncadd [#allocation36], 4294966272  ;;  %v4296_v0 = vmov 0.0   ;;  %vm4297_vm0 = vmmov 0   ;;  %v3506_v1 = vld [vmem:[#allocation10] sm:$0xff]   ;;  %v3508_v3 = vld [vmem:[#allocation10 + $0x8] sm:$0xff]  }
 0x1e0   :  { %3073 = vmatprep.subr.bf16.mxu0 %v4296_v0  ;;  %3093 = vmatprep.subr.bf16.mxu1 %v4296_v0  ;;  %v3507_v2 = vld [vmem:[#allocation8] sm:$0xff]   ;;  %v3509_v4 = vld [vmem:[#allocation8 + $0x8] sm:$0xff]   ;;  %v3510_v5 = vld [vmem:[#allocation10 + $0x10] sm:$0xff]   ;;  %vm4298_vm3 = vmmov 1   ;;  %s4299_s12 = smov [#allocation37]  }
 0x1e1   :  { %3089 = vmatprep.mubr.msk.bf16.mxu0 %vm4297_vm0, %v4296_v0  ;;  %3109 = vmatprep.mubr.msk.bf16.mxu1 %vm4297_vm0, %v4296_v0  ;;  %v3511_v6 = vld [vmem:[#allocation8 + $0x10] sm:$0xff]   ;;  %v3512_v7 = vld [vmem:[#allocation10 + $0x18] sm:$0xff]   ;;  %v3514_v9 = vld [vmem:[#allocation10 + $0x20] sm:$0xff]   ;;  %s2640_s18 = sshll.u32 %s4299_s12, 4  ;;  %s2641_s18 = int_to_ptr.vmem [resolvable:$true] %s2640_s18 }
 0x1e2   :  { %3074 = vmatpush3.bf16.msra.mxu0 %v3506_v1  ;;  %3094 = vmatpush3.bf16.msra.mxu1 %v3507_v2  ;;  %v3513_v8 = vld [vmem:[#allocation8 + $0x18] sm:$0xff]   ;;  %v3515_v10 = vld [vmem:[#allocation8 + $0x20] sm:$0xff]   ;;  %v3516_v11 = vld [vmem:[#allocation10 + $0x28] sm:$0xff]   ;;  %s4152_s26 = scalar_lea.vmem %s2641_s18, 256  ;;  %p4157_p9 = scmp.lt.s32.totalorder %s2641_s18, %s2641_s18 }
 0x1e3   :  { %3075 = vmatprep.subr.bf16.mxu0 %v4296_v0  ;;  %3095 = vmatprep.subr.bf16.mxu1 %v4296_v0  ;;  %v3517_v12 = vld [vmem:[#allocation8 + $0x28] sm:$0xff]   ;;  %v3518_v13 = vld [vmem:[#allocation10 + $0x30] sm:$0xff]   ;;  %v385_v14 = vld [vmem:[#allocation2] sm:$0xff]  ;;  %p4153_p8 = scmp.ne.s32.totalorder %s2641_s18, %s4152_s26  ;;  %p4158_p10 = scmp.lt.s32.totalorder %s4152_s26, %s4152_s26 }
 0x1e4   :  { %v386_v15 = vld [vmem:[#allocation2 + $0x8] sm:$0xff]  ;;  %v3519_v16 = vld [vmem:[#allocation8 + $0x30] sm:$0xff]   ;;  %vm387_vm1 = vweird.f32 %v385_v14  ;;  %v3520_v17 = vld [vmem:[#allocation10 + $0x38] sm:$0xff]  }
 0x1e5   :  { %vm388_vm2 = vweird.f32 %v386_v15  ;;  %v3521_v18 = vld [vmem:[#allocation8 + $0x38] sm:$0xff]   ;;  %vm389_vm4 = vmxor %vm387_vm1, %vm4298_vm3  ;;  %v3523_v20 = vld [vmem:[#allocation25] sm:$0xff]   ;;  %v2728_v21 = vpack.c.bf16 %v386_v15, %v385_v14  ;;  %p4159_p11 = por %p4158_p10, %p4157_p9 }
 0x1e6   :  { %3076 = vmatpush3.bf16.msra.mxu0 %v3508_v3  ;;  %3096 = vmatpush3.bf16.msra.mxu1 %v3509_v4  ;;  %v4792_v19 = vld [vmem:[#allocation7] sm:$0xff]   ;;  %vm390_vm5 = vmxor %vm388_vm2, %vm4298_vm3  ;;  %v3524_v22 = vld [vmem:[#allocation23] sm:$0xff]  }
 0x1e7   :  { %3077 = vmatprep.subr.bf16.mxu0 %v4296_v0  ;;  %3097 = vmatprep.subr.bf16.mxu1 %v4296_v0  ;;  %vm2727_vm6 = vmpackc.low %vm390_vm5, %vm389_vm4  ;;  %v3525_v23 = vld [vmem:[#allocation25 + $0x8] sm:$0xff]   ;;  %v3527_v25 = vld [vmem:[#allocation25 + $0x10] sm:$0xff]   ;;  %p4160_p12 = pnand %p4159_p11, %p4153_p8 }
 0x1e8   :  { %v3526_v24 = vld [vmem:[#allocation23 + $0x8] sm:$0xff]   ;;  %v395_v27 = vld [vmem:[#allocation5 + $0x8] sm:$0xff]  ;;  %v3529_v29 = vld [vmem:[#allocation25 + $0x18] sm:$0xff]  }
 0x1e9   :  { %v394_v26 = vld [vmem:[#allocation5] sm:$0xff]  ;;  %v3528_v28 = vld [vmem:[#allocation23 + $0x10] sm:$0xff]   ;;  %v3530_v30 = vld [vmem:[#allocation23 + $0x18] sm:$0xff]   ;;  %vm397_vm8 = vweird.f32 %v395_v27 }
 0x1ea   :  { %3078 = vmatpush3.bf16.msra.mxu0 %v3510_v5  ;;  %3098 = vmatpush3.bf16.msra.mxu1 %v3511_v6  ;;  %vm396_vm7 = vweird.f32 %v394_v26  ;;  %v3531_v31 = vld [vmem:[#allocation25 + $0x20] sm:$0xff]   ;;  %vm4816_vm10 = vmxor %vm397_vm8, %vm4298_vm3  ;;  %v3533_v35 = vld [vmem:[#allocation25 + $0x28] sm:$0xff]   ;;  %v2748_v42 = vpack.c.bf16 %v395_v27, %v394_v26 }
 0x1eb   :  { %3079 = vmatprep.subr.bf16.mxu0 %v4296_v0  ;;  %3099 = vmatprep.subr.bf16.mxu1 %v4296_v0  ;;  %vm4811_vm9 = vmxor %vm396_vm7, %vm4298_vm3  ;;  %v3532_v34 = vld [vmem:[#allocation23 + $0x20] sm:$0xff]   ;;  %v3534_v36 = vld [vmem:[#allocation23 + $0x28] sm:$0xff]  }
 0x1ec   :  { %v3535_v37 = vld [vmem:[#allocation25 + $0x30] sm:$0xff]   ;;  %vm2747_vm11 = vmpackc.low %vm4816_vm10, %vm4811_vm9  ;;  %v3537_v39 = vld [vmem:[#allocation25 + $0x38] sm:$0xff]  }
 0x1ed   :  { %v3536_v38 = vld [vmem:[#allocation23 + $0x30] sm:$0xff]   ;;  %v3538_v40 = vld [vmem:[#allocation23 + $0x38] sm:$0xff]   ;;  %v3539_v41 = vld [vmem:[#allocation11] sm:$0xff]  }
 0x1ee   :  { %3080 = vmatpush3.bf16.msra.mxu0 %v3512_v7  ;;  %3100 = vmatpush3.bf16.msra.mxu1 %v3513_v8  ;;  %v3540_v43 = vld [vmem:[#allocation11 + $0x8] sm:$0xff]   ;;  %v3541_v44 = vld [vmem:[#allocation11 + $0x10] sm:$0xff]   ;;  %v3542_v45 = vld [vmem:[#allocation11 + $0x18] sm:$0xff]  }
 0x1ef   :  { %3081 = vmatprep.subr.bf16.mxu0 %v4296_v0  ;;  %3101 = vmatprep.subr.bf16.mxu1 %v4296_v0  ;;  %v3543_v46 = vld [vmem:[#allocation11 + $0x20] sm:$0xff]   ;;  %v3544_v47 = vld [vmem:[#allocation11 + $0x28] sm:$0xff]   ;;  %v3545_v48 = vld [vmem:[#allocation11 + $0x30] sm:$0xff]  }
 0x1f0   :  { %v3546_v49 = vld [vmem:[#allocation11 + $0x38] sm:$0xff]   ;;  %v3547_v50 = vld [vmem:[#allocation26] sm:$0xff]   ;;  %v3548_v51 = vld [vmem:[#allocation26 + $0x8] sm:$0xff]  }
 0x1f1   :  { %v3549_v52 = vld [vmem:[#allocation26 + $0x10] sm:$0xff]   ;;  %v3550_v53 = vld [vmem:[#allocation26 + $0x18] sm:$0xff]   ;;  %v3551_v54 = vld [vmem:[#allocation26 + $0x20] sm:$0xff]  }
 0x1f2   :  { %3082 = vmatpush3.bf16.msra.mxu0 %v3514_v9  ;;  %3102 = vmatpush3.bf16.msra.mxu1 %v3515_v10  ;;  %v3552_v55 = vld [vmem:[#allocation26 + $0x28] sm:$0xff]   ;;  %v3553_v56 = vld [vmem:[#allocation26 + $0x30] sm:$0xff]   ;;  %v3554_v57 = vld [vmem:[#allocation26 + $0x38] sm:$0xff]  }
 0x1f3   :  { %3083 = vmatprep.subr.bf16.mxu0 %v4296_v0  ;;  %3103 = vmatprep.subr.bf16.mxu1 %v4296_v0  ;;  %v2730_v60 = vld [vmem:[%s5160_s23] ss:$0 sm:$0xff]  ;;  %v3555_v10 = vld [vmem:[#allocation13] sm:$0xff]   ;;  %v3561_v33 = vld [vmem:[#allocation13 + $0x30] sm:$0xff]  }
 0x1f4   :  { %v3558_v14 = vld [vmem:[#allocation13 + $0x18] sm:$0xff]   ;;  %v3559_v15 = vld [vmem:[#allocation13 + $0x20] sm:$0xff]  }
 0x1f6   :  { %3084 = vmatpush3.bf16.msra.mxu0 %v3516_v11  ;;  %3104 = vmatpush3.bf16.msra.mxu1 %v3517_v12  ;;  %v3556_v12 = vld [vmem:[#allocation13 + $0x8] sm:$0xff]  }
 0x1f7   :  { %3085 = vmatprep.subr.bf16.mxu0 %v4296_v0  ;;  %3105 = vmatprep.subr.bf16.mxu1 %v4296_v0 }
 0x1fa   :  { %3086 = vmatpush3.bf16.msra.mxu0 %v3518_v13  ;;  %3106 = vmatpush3.bf16.msra.mxu1 %v3519_v16  ;;  %v3557_v13 = vld [vmem:[#allocation13 + $0x10] sm:$0xff]   ;;  %v3560_v16 = vld [vmem:[#allocation13 + $0x28] sm:$0xff]  }
 0x1fb   :  { %3087 = vmatprep.subr.bf16.mxu0 %v4296_v0  ;;  %3107 = vmatprep.subr.bf16.mxu1 %v4296_v0 }
 0x1fe   :  { %3088 = vmatpush3.bf16.msra.mxu0 %v3520_v17  ;;  %3108 = vmatpush3.bf16.msra.mxu1 %v3521_v18 }
 0x1ff   :  { %3113 = vmatprep.subr.bf16.mxu0 %v4296_v0  ;;  %3133 = vmatprep.subr.bf16.mxu1 %v4296_v0 }
 0x201   :  { %3090 = vmatmul.mubr.bf16.vlgmr.msra.gmra.mrb[0].mxu0 %v4792_v19  ;;  %3110 = vmatmul.mubr.msk.bf16.vlgmr.msra.gmra.mrb[0].mxu1 %vm2727_vm6, %v2728_v21 }
 0x202   :  { %3114 = vmatpush3.bf16.msra.mxu0 %v3523_v20  ;;  %3134 = vmatpush3.bf16.msra.mxu1 %v3524_v22 }
 0x203   :  { %3115 = vmatprep.subr.bf16.mxu0 %v4296_v0  ;;  %3135 = vmatprep.subr.bf16.mxu1 %v4296_v0 }
 0x204   :  { %3129 = vmatprep.mubr.msk.bf16.mxu0 %vm4297_vm0, %v4296_v0  ;;  %3149 = vmatprep.mubr.msk.bf16.mxu1 %vm4297_vm0, %v4296_v0 }
 0x206   :  { %3116 = vmatpush3.bf16.msra.mxu0 %v3525_v23  ;;  %3136 = vmatpush3.bf16.msra.mxu1 %v3526_v24 }
 0x207   :  { %3117 = vmatprep.subr.bf16.mxu0 %v4296_v0  ;;  %3137 = vmatprep.subr.bf16.mxu1 %v4296_v0 }
 0x20a   :  { %3118 = vmatpush3.bf16.msra.mxu0 %v3527_v25  ;;  %3138 = vmatpush3.bf16.msra.mxu1 %v3528_v28 }
 0x20b   :  { %3119 = vmatprep.subr.bf16.mxu0 %v4296_v0  ;;  %3139 = vmatprep.subr.bf16.mxu1 %v4296_v0 }
 0x20e   :  { %3120 = vmatpush3.bf16.msra.mxu0 %v3529_v29  ;;  %3140 = vmatpush3.bf16.msra.mxu1 %v3530_v30 }
 0x20f   :  { %3121 = vmatprep.subr.bf16.mxu0 %v4296_v0  ;;  %3141 = vmatprep.subr.bf16.mxu1 %v4296_v0 }
 0x212   :  { %3122 = vmatpush3.bf16.msra.mxu0 %v3531_v31  ;;  %3142 = vmatpush3.bf16.msra.mxu1 %v3532_v34  ;;  %v3562_v34 = vld [vmem:[#allocation13 + $0x38] sm:$0xff]  }
 0x213   :  { %3123 = vmatprep.subr.bf16.mxu0 %v4296_v0  ;;  %3143 = vmatprep.subr.bf16.mxu1 %v4296_v0 }
 0x216   :  { %3124 = vmatpush3.bf16.msra.mxu0 %v3533_v35  ;;  %3144 = vmatpush3.bf16.msra.mxu1 %v3534_v36  ;;  %v3563_v35 = vld [vmem:[#allocation28] sm:$0xff]   ;;  %v3564_v36 = vld [vmem:[#allocation28 + $0x8] sm:$0xff]  }
 0x217   :  { %3125 = vmatprep.subr.bf16.mxu0 %v4296_v0  ;;  %3145 = vmatprep.subr.bf16.mxu1 %v4296_v0 }
 0x21a   :  { %3126 = vmatpush3.bf16.msra.mxu0 %v3535_v37  ;;  %3146 = vmatpush3.bf16.msra.mxu1 %v3536_v38  ;;  %v3565_v37 = vld [vmem:[#allocation28 + $0x10] sm:$0xff]   ;;  %v3566_v38 = vld [vmem:[#allocation28 + $0x18] sm:$0xff]  }
 0x21b   :  { %3127 = vmatprep.subr.bf16.mxu0 %v4296_v0  ;;  %3147 = vmatprep.subr.bf16.mxu1 %v4296_v0 }
 0x21e   :  { %3128 = vmatpush3.bf16.msra.mxu0 %v3537_v39  ;;  %3148 = vmatpush3.bf16.msra.mxu1 %v3538_v40  ;;  %v3567_v39 = vld [vmem:[#allocation28 + $0x20] sm:$0xff]   ;;  %v3568_v40 = vld [vmem:[#allocation28 + $0x28] sm:$0xff]  }
 0x21f   :  { %3153 = vmatprep.subr.bf16.mxu0 %v4296_v0  ;;  %3173 = vmatprep.subr.bf16.mxu1 %v4296_v0 }
 0x221   :  { %3130 = vmatmul.mubr.bf16.vlgmr.msra.gmra.mrb[4].mxu0 %v4792_v19  ;;  %3150 = vmatmul.mubr.msk.bf16.vlgmr.msra.gmra.mrb[4].mxu1 %vm2747_vm11, %v2748_v42  ;;  %v2750_v19 = vld [vmem:[%s5160_s23 + $0x8] ss:$0 sm:$0xff]  ;;  %v3570_v42 = vld [vmem:[#allocation28 + $0x38] sm:$0xff]  }
 0x222   :  { %3154 = vmatpush3.bf16.msra.mxu0 %v3539_v41  ;;  %3169 = vmatprep.mubr.msk.bf16.mxu0 %vm4297_vm0, %v4296_v0  ;;  %v3569_v41 = vld [vmem:[#allocation28 + $0x30] sm:$0xff]  }
 0x223   :  { %3155 = vmatprep.subr.bf16.mxu0 %v4296_v0  ;;  %3189 = vmatprep.mubr.msk.bf16.mxu1 %vm4297_vm0, %v4296_v0 }
 0x224   :  { %3174 = vmatpush3.bf16.msra.mxu1 %v3547_v50 }
 0x225   :  { %3175 = vmatprep.subr.bf16.mxu1 %v4296_v0 }
 0x226   :  { %3156 = vmatpush3.bf16.msra.mxu0 %v3540_v43  ;;  %v2751_v43 = vld [vmem:[%s5160_s23 + $0x1] ss:$0 sm:$0xff] }
 0x227   :  { %3157 = vmatprep.subr.bf16.mxu0 %v4296_v0 }
 0x228   :  { %3176 = vmatpush3.bf16.msra.mxu1 %v3548_v51 }
 0x229   :  { %3177 = vmatprep.subr.bf16.mxu1 %v4296_v0 }
 0x22a   :  { %3158 = vmatpush3.bf16.msra.mxu0 %v3541_v44 }
 0x22b   :  { %3159 = vmatprep.subr.bf16.mxu0 %v4296_v0 }
 0x22c   :  { %3178 = vmatpush3.bf16.msra.mxu1 %v3549_v52  ;;  %v3571_v52 = vld [vmem:[#allocation14] sm:$0xff]  }
 0x22d   :  { %3179 = vmatprep.subr.bf16.mxu1 %v4296_v0 }
 0x22e   :  { %3160 = vmatpush3.bf16.msra.mxu0 %v3542_v45 }
 0x22f   :  { %3161 = vmatprep.subr.bf16.mxu0 %v4296_v0 }
 0x230   :  { %3180 = vmatpush3.bf16.msra.mxu1 %v3550_v53 }
 0x231   :  { %3181 = vmatprep.subr.bf16.mxu1 %v4296_v0 }
 0x232   :  { %3162 = vmatpush3.bf16.msra.mxu0 %v3543_v46 }
 0x233   :  { %3163 = vmatprep.subr.bf16.mxu0 %v4296_v0 }
 0x234   :  { %3182 = vmatpush3.bf16.msra.mxu1 %v3551_v54  ;;  %v3572_v54 = vld [vmem:[#allocation14 + $0x8] sm:$0xff]  }
 0x235   :  { %3183 = vmatprep.subr.bf16.mxu1 %v4296_v0 }
 0x236   :  { %3164 = vmatpush3.bf16.msra.mxu0 %v3544_v47 }
 0x237   :  { %3165 = vmatprep.subr.bf16.mxu0 %v4296_v0 }
 0x238   :  { %3184 = vmatpush3.bf16.msra.mxu1 %v3552_v55  ;;  %v3573_v55 = vld [vmem:[#allocation14 + $0x10] sm:$0xff]  }
 0x239   :  { %3185 = vmatprep.subr.bf16.mxu1 %v4296_v0 }
 0x23a   :  { %3166 = vmatpush3.bf16.msra.mxu0 %v3545_v48 }
 0x23b   :  { %3167 = vmatprep.subr.bf16.mxu0 %v4296_v0 }
 0x23c   :  { %3186 = vmatpush3.bf16.msra.mxu1 %v3553_v56  ;;  %v3574_v56 = vld [vmem:[#allocation14 + $0x18] sm:$0xff]  }
 0x23d   :  { %3187 = vmatprep.subr.bf16.mxu1 %v4296_v0 }
 0x23e   :  { %3168 = vmatpush3.bf16.msra.mxu0 %v3546_v49 }
 0x23f   :  { %3193 = vmatprep.subr.bf16.mxu0 %v4296_v0 }
 0x240   :  { %3188 = vmatpush3.bf16.msra.mxu1 %v3554_v57  ;;  %v3575_v57 = vld [vmem:[#allocation14 + $0x20] sm:$0xff]  }
 0x241   :  { %3213 = vmatprep.subr.bf16.mxu1 %v4296_v0 }
 0x2d4   :  { %v523_v58 = vpop.f32.mrb[0].mxu0  ;;  %v612_v59 = vpop.f32.mrb[0].mxu1 }
 0x2d5   :  { %v3091_v61 = vpop.f32.mrb[1].mxu0  ;;  %v613_v62 = vadd.f32 %v612_v59, %v523_v58  ;;  %v3111_v63 = vpop.f32.mrb[1].mxu1  ;;  %v3576_v58 = vld [vmem:[#allocation14 + $0x28] sm:$0xff]   ;;  %v2760_v59 = vld [vmem:[%s5160_s23 + $0x9] ss:$0 sm:$0xff] }
 0x2d6   :  { %v526_v1 = vpop.f32.mrb[2].mxu0  ;;  %v615_v2 = vpop.f32.mrb[2].mxu1 }
 0x2d7   :  { %v3092_v3 = vpop.f32.mrb[3].mxu0  ;;  %v624_v4 = vadd.f32 %v2730_v60, %v613_v62  ;;  %v616_v5 = vadd.f32 %v615_v2, %v526_v1  ;;  %v3112_v6 = vpop.f32.mrb[3].mxu1 }
 0x2d8   :  { %v3577_v6 = vld [vmem:[#allocation14 + $0x30] sm:$0xff]  }
 0x2d9   :  { %v626_v7 = vmax.f32 %v624_v4, 0.0  ;;  %v625_v8 = vadd.f32 %v2730_v60, %v616_v5 }
 0x2db   :  { %v627_v9 = vmax.f32 %v625_v8, 0.0  ;;  %v3579_v8 = vld [vmem:[%s5154_s17] sm:$0xff]  }
 0x2dd   :  { %v628_v11 = vpack.c.bf16 %v627_v9, %v626_v7  ;;  %v3578_v7 = vld [vmem:[#allocation14 + $0x38] sm:$0xff]   ;;  %v3580_v9 = vld [vmem:[%s5154_s17 + $0x8] sm:$0xff]  }
 0x2df   :  { %3170 = vmatmul.mubr.bf16.vlgmr.msra.gmra.mrb[8].mxu0 %v628_v11  ;;  %v3582_v11 = vld [vmem:[%s5154_s17 + $0x18] sm:$0xff]  }
 0x2e0   :  { %3194 = vmatpush3.bf16.msra.mxu0 %v3555_v10  ;;  %3209 = vmatprep.mubr.msk.bf16.mxu0 %vm4297_vm0, %v4296_v0  ;;  %v3581_v10 = vld [vmem:[%s5154_s17 + $0x10] sm:$0xff]  }
 0x2e1   :  { %3195 = vmatprep.subr.bf16.mxu0 %v4296_v0 }
 0x2e4   :  { %3196 = vmatpush3.bf16.msra.mxu0 %v3556_v12  ;;  %v3583_v12 = vld [vmem:[%s5154_s17 + $0x20] sm:$0xff]  }
 0x2e5   :  { %3197 = vmatprep.subr.bf16.mxu0 %v4296_v0 }
 0x2e8   :  { %3198 = vmatpush3.bf16.msra.mxu0 %v3557_v13  ;;  %v3584_v13 = vld [vmem:[%s5154_s17 + $0x28] sm:$0xff]  }
 0x2e9   :  { %3199 = vmatprep.subr.bf16.mxu0 %v4296_v0 }
 0x2ec   :  { %3200 = vmatpush3.bf16.msra.mxu0 %v3558_v14  ;;  %v3585_v14 = vld [vmem:[%s5154_s17 + $0x30] sm:$0xff]  }
 0x2ed   :  { %3201 = vmatprep.subr.bf16.mxu0 %v4296_v0 }
 0x2f0   :  { %3202 = vmatpush3.bf16.msra.mxu0 %v3559_v15  ;;  %v3586_v15 = vld [vmem:[%s5154_s17 + $0x38] sm:$0xff]  }
 0x2f1   :  { %3203 = vmatprep.subr.bf16.mxu0 %v4296_v0 }
 0x2f4   :  { %v743_v17 = vpop.f32.mrb[4].mxu0  ;;  %v832_v18 = vpop.f32.mrb[4].mxu1  ;;  %3204 = vmatpush3.bf16.msra.mxu0 %v3560_v16  ;;  %v2769_v16 = vld [vmem:[%s5160_s23 + $0x2] ss:$0 sm:$0xff] }
 0x2f5   :  { %v3131_v20 = vpop.f32.mrb[5].mxu0  ;;  %v833_v21 = vadd.f32 %v832_v18, %v743_v17  ;;  %v3151_v22 = vpop.f32.mrb[5].mxu1  ;;  %3205 = vmatprep.subr.bf16.mxu0 %v4296_v0 }
 0x2f6   :  { %v746_v23 = vpop.f32.mrb[6].mxu0  ;;  %v835_v24 = vpop.f32.mrb[6].mxu1 }
 0x2f7   :  { %v3132_v25 = vpop.f32.mrb[7].mxu0  ;;  %v844_v26 = vadd.f32 %v2750_v19, %v833_v21  ;;  %v836_v27 = vadd.f32 %v835_v24, %v746_v23  ;;  %v3152_v28 = vpop.f32.mrb[7].mxu1  ;;  %v3587_v23 = vld [vmem:[#allocation17] sm:$0xff]  }
 0x2f8   :  { %3206 = vmatpush3.bf16.msra.mxu0 %v3561_v33  ;;  %v3589_v25 = vld [vmem:[#allocation17 + $0x8] sm:$0xff]   ;;  %v3595_v28 = vld [vmem:[#allocation17 + $0x20] sm:$0xff]  }
 0x2f9   :  { %v845_v29 = vadd.f32 %v2750_v19, %v836_v27  ;;  %v846_v30 = vmax.f32 %v844_v26, 0.0  ;;  %3207 = vmatprep.subr.bf16.mxu0 %v4296_v0  ;;  %v3591_v26 = vld [vmem:[#allocation17 + $0x10] sm:$0xff]   ;;  %v3593_v27 = vld [vmem:[#allocation17 + $0x18] sm:$0xff]  }
 0x2fb   :  { %v847_v31 = vmax.f32 %v845_v29, 0.0  ;;  %v3597_v29 = vld [vmem:[#allocation17 + $0x28] sm:$0xff]  }
 0x2fc   :  { %3208 = vmatpush3.bf16.msra.mxu0 %v3562_v34 }
 0x2fd   :  { %v848_v32 = vpack.c.bf16 %v847_v31, %v846_v30  ;;  %3233 = vmatprep.subr.bf16.mxu0 %v4296_v0  ;;  %v3599_v30 = vld [vmem:[#allocation17 + $0x30] sm:$0xff]   ;;  %v2778_v31 = vld [vmem:[%s5160_s23 + $0xa] ss:$0 sm:$0xff] }
 0x2ff   :  { %3190 = vmatmul.mubr.bf16.vlgmr.msra.gmra.mrb[8].mxu1 %v848_v32 }
 0x300   :  { %3229 = vmatprep.mubr.msk.bf16.mxu1 %vm4297_vm0, %v4296_v0  ;;  %3214 = vmatpush3.bf16.msra.mxu1 %v3563_v35 }
 0x301   :  { %3215 = vmatprep.subr.bf16.mxu1 %v4296_v0 }
 0x304   :  { %3216 = vmatpush3.bf16.msra.mxu1 %v3564_v36 }
 0x305   :  { %3217 = vmatprep.subr.bf16.mxu1 %v4296_v0 }
 0x308   :  { %3218 = vmatpush3.bf16.msra.mxu1 %v3565_v37 }
 0x309   :  { %3219 = vmatprep.subr.bf16.mxu1 %v4296_v0 }
 0x30c   :  { %3220 = vmatpush3.bf16.msra.mxu1 %v3566_v38  ;;  %v3588_v38 = vld [vmem:[#allocation16] sm:$0xff]  }
 0x30d   :  { %3221 = vmatprep.subr.bf16.mxu1 %v4296_v0 }
 0x310   :  { %3222 = vmatpush3.bf16.msra.mxu1 %v3567_v39 }
 0x311   :  { %3223 = vmatprep.subr.bf16.mxu1 %v4296_v0 }
 0x314   :  { %3224 = vmatpush3.bf16.msra.mxu1 %v3568_v40  ;;  %v3590_v40 = vld [vmem:[#allocation16 + $0x8] sm:$0xff]  }
 0x315   :  { %3225 = vmatprep.subr.bf16.mxu1 %v4296_v0 }
 0x318   :  { %3226 = vmatpush3.bf16.msra.mxu1 %v3569_v41  ;;  %v3592_v41 = vld [vmem:[#allocation16 + $0x10] sm:$0xff]  }
 0x319   :  { %3227 = vmatprep.subr.bf16.mxu1 %v4296_v0 }
 0x31c   :  { %3228 = vmatpush3.bf16.msra.mxu1 %v3570_v42  ;;  %v3594_v42 = vld [vmem:[#allocation16 + $0x18] sm:$0xff]  }
 0x31d   :  { %3253 = vmatprep.subr.bf16.mxu1 %v4296_v0 }
 0x3b2   :  { %v952_v44 = vpop.f32.mrb[8].mxu0 }
 0x3b3   :  { %v953_v45 = vadd.f32 %v2751_v43, %v952_v44  ;;  %v3171_v46 = vpop.f32.mrb[9].mxu0  ;;  %v3598_v44 = vld [vmem:[#allocation16 + $0x28] sm:$0xff]  }
 0x3b4   :  { %v955_v47 = vpop.f32.mrb[10].mxu0  ;;  %v3601_v46 = vld [vmem:[#allocation17 + $0x38] sm:$0xff]  }
 0x3b5   :  { %v956_v48 = vadd.f32 %v2751_v43, %v955_v47  ;;  %v3172_v49 = vpop.f32.mrb[11].mxu0  ;;  %v959_v50 = vmax.f32 %v953_v45, 0.0  ;;  %v3596_v43 = vld [vmem:[#allocation16 + $0x20] sm:$0xff]   ;;  %v3600_v45 = vld [vmem:[#allocation16 + $0x30] sm:$0xff]   ;;  %v3602_v47 = vld [vmem:[#allocation16 + $0x38] sm:$0xff]  }
 0x3b6   :  { %v3667_v49 = vld [vmem:[#allocation7] sm:$0xff]  }
 0x3b7   :  { %v960_v51 = vmax.f32 %v956_v48, 0.0  ;;  %v3603_v48 = vld [vmem:[#allocation31] sm:$0xff]  }
 0x3b9   :  { %v961_v53 = vpack.c.bf16 %v960_v51, %v959_v50  ;;  %v3605_v50 = vld [vmem:[#allocation31 + $0x8] sm:$0xff]   ;;  %v3607_v51 = vld [vmem:[#allocation31 + $0x10] sm:$0xff]  }
 0x3bb   :  { %3210 = vmatmul.mubr.bf16.vlgmr.msra.gmra.mrb[12].mxu0 %v961_v53  ;;  %v3611_v53 = vld [vmem:[#allocation31 + $0x20] sm:$0xff]  }
 0x3bc   :  { %3234 = vmatpush3.bf16.msra.mxu0 %v3571_v52  ;;  %3249 = vmatprep.mubr.msk.bf16.mxu0 %vm4297_vm0, %v4296_v0  ;;  %v3609_v52 = vld [vmem:[#allocation31 + $0x18] sm:$0xff]  }
 0x3bd   :  { %3235 = vmatprep.subr.bf16.mxu0 %v4296_v0 }
 0x3c0   :  { %3236 = vmatpush3.bf16.msra.mxu0 %v3572_v54  ;;  %v3613_v54 = vld [vmem:[#allocation31 + $0x28] sm:$0xff]  }
 0x3c1   :  { %3237 = vmatprep.subr.bf16.mxu0 %v4296_v0 }
 0x3c4   :  { %3238 = vmatpush3.bf16.msra.mxu0 %v3573_v55  ;;  %v3615_v55 = vld [vmem:[#allocation31 + $0x30] sm:$0xff]  }
 0x3c5   :  { %3239 = vmatprep.subr.bf16.mxu0 %v4296_v0 }
 0x3c8   :  { %3240 = vmatpush3.bf16.msra.mxu0 %v3574_v56  ;;  %v3617_v56 = vld [vmem:[#allocation31 + $0x38] sm:$0xff]  }
 0x3c9   :  { %3241 = vmatprep.subr.bf16.mxu0 %v4296_v0 }
 0x3cc   :  { %3242 = vmatpush3.bf16.msra.mxu0 %v3575_v57  ;;  %v3619_v57 = vld [vmem:[#allocation19] sm:$0xff]  }
 0x3cd   :  { %3243 = vmatprep.subr.bf16.mxu0 %v4296_v0 }
 0x3d0   :  { %3244 = vmatpush3.bf16.msra.mxu0 %v3576_v58  ;;  %v3620_v58 = vld [vmem:[#allocation19 + $0x8] sm:$0xff]  }
 0x3d1   :  { %3245 = vmatprep.subr.bf16.mxu0 %v4296_v0 }
 0x3d2   :  { %v1065_v60 = vpop.f32.mrb[8].mxu1 }
 0x3d3   :  { %v1066_v61 = vadd.f32 %v2760_v59, %v1065_v60  ;;  %v3191_v62 = vpop.f32.mrb[9].mxu1  ;;  %v3622_v60 = vld [vmem:[#allocation19 + $0x18] sm:$0xff]  }
 0x3d4   :  { %v1068_v63 = vpop.f32.mrb[10].mxu1  ;;  %3246 = vmatpush3.bf16.msra.mxu0 %v3577_v6  ;;  %v2787_v62 = vld [vmem:[%s5160_s23 + $0x3] ss:$0 sm:$0xff]  ;;  %v3604_v6 = vld [vmem:[#allocation29] sm:$0xff]  }
 0x3d5   :  { %v1069_v1 = vadd.f32 %v2760_v59, %v1068_v63  ;;  %v3192_v2 = vpop.f32.mrb[11].mxu1  ;;  %v1072_v3 = vmax.f32 %v1066_v61, 0.0  ;;  %3247 = vmatprep.subr.bf16.mxu0 %v4296_v0  ;;  %v3621_v59 = vld [vmem:[#allocation19 + $0x10] sm:$0xff]   ;;  %v3623_v61 = vld [vmem:[#allocation19 + $0x20] sm:$0xff]  }
 0x3d7   :  { %v1073_v4 = vmax.f32 %v1069_v1, 0.0 }
 0x3d8   :  { %3248 = vmatpush3.bf16.msra.mxu0 %v3578_v7 }
 0x3d9   :  { %v1074_v5 = vpack.c.bf16 %v1073_v4, %v1072_v3  ;;  %3273 = vmatprep.subr.bf16.mxu0 %v4296_v0 }
 0x3db   :  { %3230 = vmatmul.mubr.bf16.vlgmr.msra.gmra.mrb[12].mxu1 %v1074_v5 }
 0x3dc   :  { %3269 = vmatprep.mubr.msk.bf16.mxu1 %vm4297_vm0, %v4296_v0  ;;  %3254 = vmatpush3.bf16.msra.mxu1 %v3579_v8  ;;  %v3606_v8 = vld [vmem:[#allocation29 + $0x8] sm:$0xff]  }
 0x3dd   :  { %3255 = vmatprep.subr.bf16.mxu1 %v4296_v0 }
 0x3e0   :  { %3256 = vmatpush3.bf16.msra.mxu1 %v3580_v9  ;;  %v3608_v9 = vld [vmem:[#allocation29 + $0x10] sm:$0xff]  }
 0x3e1   :  { %3257 = vmatprep.subr.bf16.mxu1 %v4296_v0 }
 0x3e4   :  { %3258 = vmatpush3.bf16.msra.mxu1 %v3581_v10  ;;  %v3610_v10 = vld [vmem:[#allocation29 + $0x18] sm:$0xff]  }
 0x3e5   :  { %3259 = vmatprep.subr.bf16.mxu1 %v4296_v0 }
 0x3e8   :  { %3260 = vmatpush3.bf16.msra.mxu1 %v3582_v11  ;;  %v3612_v11 = vld [vmem:[#allocation29 + $0x20] sm:$0xff]  }
 0x3e9   :  { %3261 = vmatprep.subr.bf16.mxu1 %v4296_v0 }
 0x3ec   :  { %3262 = vmatpush3.bf16.msra.mxu1 %v3583_v12  ;;  %v3614_v12 = vld [vmem:[#allocation29 + $0x28] sm:$0xff]  }
 0x3ed   :  { %3263 = vmatprep.subr.bf16.mxu1 %v4296_v0 }
 0x3f0   :  { %3264 = vmatpush3.bf16.msra.mxu1 %v3584_v13  ;;  %v3616_v13 = vld [vmem:[#allocation29 + $0x30] sm:$0xff]  }
 0x3f1   :  { %3265 = vmatprep.subr.bf16.mxu1 %v4296_v0 }
 0x3f4   :  { %3266 = vmatpush3.bf16.msra.mxu1 %v3585_v14  ;;  %v2796_v14 = vld [vmem:[%s5160_s23 + $0xb] ss:$0 sm:$0xff] }
 0x3f5   :  { %3267 = vmatprep.subr.bf16.mxu1 %v4296_v0 }
 0x3f8   :  { %3268 = vmatpush3.bf16.msra.mxu1 %v3586_v15 }
 0x3f9   :  { %3293 = vmatprep.subr.bf16.mxu1 %v4296_v0 }
 0x48e   :  { %v1178_v17 = vpop.f32.mrb[12].mxu0 }
 0x48f   :  { %v3211_v18 = vpop.f32.mrb[13].mxu0  ;;  %v1179_v20 = vadd.f32 %v2769_v16, %v1178_v17 }
 0x490   :  { %v1181_v19 = vpop.f32.mrb[14].mxu0 }
 0x491   :  { %v1182_v21 = vadd.f32 %v2769_v16, %v1181_v19  ;;  %v3212_v22 = vpop.f32.mrb[15].mxu0  ;;  %v3618_v16 = vld [vmem:[#allocation29 + $0x38] sm:$0xff]  }
 0x493   :  { %v1185_v24 = vpack.c.bf16 %v1182_v21, %v1179_v20 }
 0x495   :  { %3250 = vmatmul.mubr.bf16.vlgmr.msra.gmra.mrb[16].mxu0 %v1185_v24 }
 0x496   :  { %3274 = vmatpush3.bf16.msra.mxu0 %v3587_v23  ;;  %3289 = vmatprep.mubr.msk.bf16.mxu0 %vm4297_vm0, %v4296_v0 }
 0x497   :  { %3275 = vmatprep.subr.bf16.mxu0 %v4296_v0 }
 0x49a   :  { %3276 = vmatpush3.bf16.msra.mxu0 %v3589_v25  ;;  %v3624_v25 = vld [vmem:[#allocation19 + $0x28] sm:$0xff]  }
 0x49b   :  { %3277 = vmatprep.subr.bf16.mxu0 %v4296_v0 }
 0x49e   :  { %3278 = vmatpush3.bf16.msra.mxu0 %v3591_v26 }
 0x49f   :  { %3279 = vmatprep.subr.bf16.mxu0 %v4296_v0 }
 0x4a2   :  { %3280 = vmatpush3.bf16.msra.mxu0 %v3593_v27 }
 0x4a3   :  { %3281 = vmatprep.subr.bf16.mxu0 %v4296_v0 }
 0x4a6   :  { %3282 = vmatpush3.bf16.msra.mxu0 %v3595_v28  ;;  %v3625_v28 = vld [vmem:[#allocation19 + $0x30] sm:$0xff]  }
 0x4a7   :  { %3283 = vmatprep.subr.bf16.mxu0 %v4296_v0 }
 0x4aa   :  { %3284 = vmatpush3.bf16.msra.mxu0 %v3597_v29  ;;  %v3626_v29 = vld [vmem:[#allocation19 + $0x38] sm:$0xff]  }
 0x4ab   :  { %3285 = vmatprep.subr.bf16.mxu0 %v4296_v0 }
 0x4ae   :  { %v1289_v32 = vpop.f32.mrb[12].mxu1  ;;  %3286 = vmatpush3.bf16.msra.mxu0 %v3599_v30  ;;  %v3627_v30 = vld [vmem:[#allocation32] sm:$0xff]  }
 0x4af   :  { %v3231_v33 = vpop.f32.mrb[13].mxu1  ;;  %3287 = vmatprep.subr.bf16.mxu0 %v4296_v0  ;;  %v1290_v35 = vadd.f32 %v2778_v31, %v1289_v32  ;;  %v3629_v32 = vld [vmem:[#allocation32 + $0x10] sm:$0xff]  }
 0x4b0   :  { %v1292_v34 = vpop.f32.mrb[14].mxu1  ;;  %v3630_v33 = vld [vmem:[#allocation32 + $0x18] sm:$0xff]  }
 0x4b1   :  { %v1293_v36 = vadd.f32 %v2778_v31, %v1292_v34  ;;  %v3232_v37 = vpop.f32.mrb[15].mxu1  ;;  %v3628_v31 = vld [vmem:[#allocation32 + $0x8] sm:$0xff]   ;;  %v3631_v34 = vld [vmem:[#allocation32 + $0x20] sm:$0xff]  }
 0x4b2   :  { %3288 = vmatpush3.bf16.msra.mxu0 %v3601_v46  ;;  %v3632_v37 = vld [vmem:[#allocation32 + $0x28] sm:$0xff]  }
 0x4b3   :  { %v1296_v39 = vpack.c.bf16 %v1293_v36, %v1290_v35  ;;  %3313 = vmatprep.subr.bf16.mxu0 %v4296_v0 }
 0x4b5   :  { %3270 = vmatmul.mubr.bf16.vlgmr.msra.gmra.mrb[16].mxu1 %v1296_v39  ;;  %3290 = vmatmul.mubr.bf16.vlgmr.msra.gmra.mrb[20].mxu0 %v3667_v49 }
 0x4b6   :  { %3294 = vmatpush3.bf16.msra.mxu1 %v3588_v38  ;;  %3309 = vmatprep.mubr.msk.bf16.mxu1 %vm4297_vm0, %v4296_v0 }
 0x4b7   :  { %3295 = vmatprep.subr.bf16.mxu1 %v4296_v0  ;;  %3314 = vmatpush3.bf16.msra.mxu0 %v3603_v48 }
 0x4b8   :  { %3315 = vmatprep.subr.bf16.mxu0 %v4296_v0  ;;  %3329 = vmatprep.mubr.msk.bf16.mxu0 %vm4297_vm0, %v4296_v0 }
 0x4ba   :  { %3296 = vmatpush3.bf16.msra.mxu1 %v3590_v40  ;;  %v3633_v40 = vld [vmem:[#allocation32 + $0x30] sm:$0xff]  }
 0x4bb   :  { %3297 = vmatprep.subr.bf16.mxu1 %v4296_v0  ;;  %3316 = vmatpush3.bf16.msra.mxu0 %v3605_v50 }
 0x4bc   :  { %3317 = vmatprep.subr.bf16.mxu0 %v4296_v0 }
 0x4be   :  { %3298 = vmatpush3.bf16.msra.mxu1 %v3592_v41  ;;  %v3634_v41 = vld [vmem:[#allocation32 + $0x38] sm:$0xff]  }
 0x4bf   :  { %3299 = vmatprep.subr.bf16.mxu1 %v4296_v0  ;;  %3318 = vmatpush3.bf16.msra.mxu0 %v3607_v51 }
 0x4c0   :  { %3319 = vmatprep.subr.bf16.mxu0 %v4296_v0 }
 0x4c2   :  { %3300 = vmatpush3.bf16.msra.mxu1 %v3594_v42 }
 0x4c3   :  { %3301 = vmatprep.subr.bf16.mxu1 %v4296_v0  ;;  %3320 = vmatpush3.bf16.msra.mxu0 %v3609_v52 }
 0x4c4   :  { %3321 = vmatprep.subr.bf16.mxu0 %v4296_v0 }
 0x4c6   :  { %3302 = vmatpush3.bf16.msra.mxu1 %v3596_v43  ;;  %v2821_v43 = vld [vmem:[%s5160_s23 + $0x4] ss:$0 sm:$0xff] }
 0x4c7   :  { %3303 = vmatprep.subr.bf16.mxu1 %v4296_v0  ;;  %3322 = vmatpush3.bf16.msra.mxu0 %v3611_v53  ;;  %v3635_v53 = vld [vmem:[#allocation20] sm:$0xff]  }
 0x4c8   :  { %3323 = vmatprep.subr.bf16.mxu0 %v4296_v0 }
 0x4ca   :  { %3304 = vmatpush3.bf16.msra.mxu1 %v3598_v44 }
 0x4cb   :  { %3305 = vmatprep.subr.bf16.mxu1 %v4296_v0  ;;  %3324 = vmatpush3.bf16.msra.mxu0 %v3613_v54 }
 0x4cc   :  { %3325 = vmatprep.subr.bf16.mxu0 %v4296_v0 }
 0x4ce   :  { %3306 = vmatpush3.bf16.msra.mxu1 %v3600_v45 }
 0x4cf   :  { %3307 = vmatprep.subr.bf16.mxu1 %v4296_v0  ;;  %3326 = vmatpush3.bf16.msra.mxu0 %v3615_v55  ;;  %v3636_v55 = vld [vmem:[#allocation20 + $0x8] sm:$0xff]  }
 0x4d0   :  { %3327 = vmatprep.subr.bf16.mxu0 %v4296_v0 }
 0x4d2   :  { %3308 = vmatpush3.bf16.msra.mxu1 %v3602_v47 }
 0x4d3   :  { %3333 = vmatprep.subr.bf16.mxu1 %v4296_v0  ;;  %3328 = vmatpush3.bf16.msra.mxu0 %v3617_v56  ;;  %v3637_v56 = vld [vmem:[#allocation20 + $0x10] sm:$0xff]  }
 0x4d4   :  { %3353 = vmatprep.subr.bf16.mxu0 %v4296_v0 }
 0x4d6   :  { %3330 = vmatmul.mubr.bf16.vlgmr.msra.gmra.mrb[24].mxu0 %v3667_v49 }
 0x4d7   :  { %3369 = vmatprep.mubr.msk.bf16.mxu0 %vm4297_vm0, %v4296_v0  ;;  %3354 = vmatpush3.bf16.msra.mxu0 %v3619_v57  ;;  %v3638_v57 = vld [vmem:[#allocation20 + $0x18] sm:$0xff]  }
 0x4d8   :  { %3355 = vmatprep.subr.bf16.mxu0 %v4296_v0 }
 0x4db   :  { %3356 = vmatpush3.bf16.msra.mxu0 %v3620_v58  ;;  %v3639_v58 = vld [vmem:[#allocation20 + $0x20] sm:$0xff]  }
 0x4dc   :  { %3357 = vmatprep.subr.bf16.mxu0 %v4296_v0 }
 0x4df   :  { %3358 = vmatpush3.bf16.msra.mxu0 %v3621_v59  ;;  %v3640_v59 = vld [vmem:[#allocation20 + $0x28] sm:$0xff]  }
 0x4e0   :  { %3359 = vmatprep.subr.bf16.mxu0 %v4296_v0 }
 0x4e3   :  { %3360 = vmatpush3.bf16.msra.mxu0 %v3622_v60 }
 0x4e4   :  { %3361 = vmatprep.subr.bf16.mxu0 %v4296_v0 }
 0x4e7   :  { %3362 = vmatpush3.bf16.msra.mxu0 %v3623_v61  ;;  %v2838_v61 = vld [vmem:[%s5160_s23 + $0xc] ss:$0 sm:$0xff] }
 0x4e8   :  { %3363 = vmatprep.subr.bf16.mxu0 %v4296_v0 }
 0x4eb   :  { %3364 = vmatpush3.bf16.msra.mxu0 %v3624_v25 }
 0x4ec   :  { %3365 = vmatprep.subr.bf16.mxu0 %v4296_v0 }
 0x4ef   :  { %3366 = vmatpush3.bf16.msra.mxu0 %v3625_v28  ;;  %v3651_v28 = vld [vmem:[#allocation22] sm:$0xff]  }
 0x4f0   :  { %3367 = vmatprep.subr.bf16.mxu0 %v4296_v0 }
 0x4f3   :  { %3368 = vmatpush3.bf16.msra.mxu0 %v3626_v29 }
 0x4f4   :  { %3393 = vmatprep.subr.bf16.mxu0 %v4296_v0 }
 0x568   :  { %v1400_v63 = vpop.f32.mrb[16].mxu0 }
 0x569   :  { %v1401_v1 = vadd.f32 %v2787_v62, %v1400_v63  ;;  %v3251_v2 = vpop.f32.mrb[17].mxu0 }
 0x56a   :  { %v1403_v3 = vpop.f32.mrb[18].mxu0 }
 0x56b   :  { %1407 = vst [vmem:[#allocation37] sm:$0xff] %v1401_v1  ;;  %v1404_v4 = vadd.f32 %v2787_v62, %v1403_v3  ;;  %v3252_v5 = vpop.f32.mrb[19].mxu0 }
 0x56d   :  { %1408 = vst [vmem:[#allocation37 + $0x8] sm:$0xff] %v1404_v4  ;;  %v1409_v7 = vpack.c.bf16 %v1404_v4, %v1401_v1 }
 0x56f   :  { %3310 = vmatmul.mubr.bf16.vlgmr.msra.gmra.mrb[20].mxu1 %v1409_v7 }
 0x570   :  { %3334 = vmatpush3.bf16.msra.mxu1 %v3604_v6  ;;  %3349 = vmatprep.mubr.msk.bf16.mxu1 %vm4297_vm0, %v4296_v0 }
 0x571   :  { %3335 = vmatprep.subr.bf16.mxu1 %v4296_v0 }
 0x574   :  { %3336 = vmatpush3.bf16.msra.mxu1 %v3606_v8 }
 0x575   :  { %3337 = vmatprep.subr.bf16.mxu1 %v4296_v0 }
 0x578   :  { %3338 = vmatpush3.bf16.msra.mxu1 %v3608_v9  ;;  %v3641_v9 = vld [vmem:[#allocation20 + $0x30] sm:$0xff]  }
 0x579   :  { %3339 = vmatprep.subr.bf16.mxu1 %v4296_v0 }
 0x57c   :  { %3340 = vmatpush3.bf16.msra.mxu1 %v3610_v10  ;;  %v3642_v10 = vld [vmem:[#allocation20 + $0x38] sm:$0xff]  }
 0x57d   :  { %3341 = vmatprep.subr.bf16.mxu1 %v4296_v0 }
 0x580   :  { %3342 = vmatpush3.bf16.msra.mxu1 %v3612_v11  ;;  %v3643_v11 = vld [vmem:[#allocation34] sm:$0xff]  }
 0x581   :  { %3343 = vmatprep.subr.bf16.mxu1 %v4296_v0 }
 0x584   :  { %3344 = vmatpush3.bf16.msra.mxu1 %v3614_v12  ;;  %v3644_v12 = vld [vmem:[#allocation34 + $0x8] sm:$0xff]  }
 0x585   :  { %3345 = vmatprep.subr.bf16.mxu1 %v4296_v0 }
 0x588   :  { %v1513_v15 = vpop.f32.mrb[16].mxu1  ;;  %3346 = vmatpush3.bf16.msra.mxu1 %v3616_v13  ;;  %v1637_v23 = vpop.f32.mrb[20].mxu0  ;;  %v3645_v13 = vld [vmem:[#allocation34 + $0x10] sm:$0xff]  }
 0x589   :  { %v1514_v17 = vadd.f32 %v2796_v14, %v1513_v15  ;;  %v3271_v18 = vpop.f32.mrb[17].mxu1  ;;  %3347 = vmatprep.subr.bf16.mxu1 %v4296_v0  ;;  %v3291_v24 = vpop.f32.mrb[21].mxu0  ;;  %v3647_v15 = vld [vmem:[#allocation34 + $0x20] sm:$0xff]  }
 0x58a   :  { %v1516_v19 = vpop.f32.mrb[18].mxu1  ;;  %v1640_v26 = vpop.f32.mrb[22].mxu0  ;;  %v3650_v18 = vld [vmem:[#allocation34 + $0x38] sm:$0xff]  }
 0x58b   :  { %1520 = vst [vmem:[#allocation40] sm:$0xff] %v1514_v17  ;;  %v1517_v20 = vadd.f32 %v2796_v14, %v1516_v19  ;;  %v3272_v21 = vpop.f32.mrb[19].mxu1  ;;  %v3292_v27 = vpop.f32.mrb[23].mxu0  ;;  %v3646_v14 = vld [vmem:[#allocation34 + $0x18] sm:$0xff]  }
 0x58c   :  { %3348 = vmatpush3.bf16.msra.mxu1 %v3618_v16  ;;  %v3648_v16 = vld [vmem:[#allocation34 + $0x28] sm:$0xff]   ;;  %v2839_v19 = vld [vmem:[%s5160_s23 + $0x5] ss:$0 sm:$0xff] }
 0x58d   :  { %1521 = vst [vmem:[#allocation40 + $0x8] sm:$0xff] %v1517_v20  ;;  %v1522_v22 = vpack.c.bf16 %v1517_v20, %v1514_v17  ;;  %3373 = vmatprep.subr.bf16.mxu1 %v4296_v0  ;;  %v3649_v17 = vld [vmem:[#allocation34 + $0x30] sm:$0xff]  }
 0x58f   :  { %3350 = vmatmul.mubr.bf16.vlgmr.msra.gmra.mrb[24].mxu1 %v1522_v22 }
 0x590   :  { %3389 = vmatprep.mubr.msk.bf16.mxu1 %vm4297_vm0, %v4296_v0  ;;  %3374 = vmatpush3.bf16.msra.mxu1 %v3627_v30  ;;  %v3652_v30 = vld [vmem:[#allocation22 + $0x8] sm:$0xff]  }
 0x591   :  { %3375 = vmatprep.subr.bf16.mxu1 %v4296_v0 }
 0x594   :  { %3376 = vmatpush3.bf16.msra.mxu1 %v3628_v31  ;;  %v3653_v31 = vld [vmem:[#allocation22 + $0x10] sm:$0xff]  }
 0x595   :  { %3377 = vmatprep.subr.bf16.mxu1 %v4296_v0 }
 0x598   :  { %3378 = vmatpush3.bf16.msra.mxu1 %v3629_v32  ;;  %v3654_v32 = vld [vmem:[#allocation22 + $0x18] sm:$0xff]  }
 0x599   :  { %3379 = vmatprep.subr.bf16.mxu1 %v4296_v0 }
 0x59c   :  { %3380 = vmatpush3.bf16.msra.mxu1 %v3630_v33  ;;  %v3655_v33 = vld [vmem:[#allocation22 + $0x20] sm:$0xff]  }
 0x59d   :  { %3381 = vmatprep.subr.bf16.mxu1 %v4296_v0 }
 0x5a0   :  { %3382 = vmatpush3.bf16.msra.mxu1 %v3631_v34  ;;  %v3656_v34 = vld [vmem:[#allocation22 + $0x28] sm:$0xff]  }
 0x5a1   :  { %3383 = vmatprep.subr.bf16.mxu1 %v4296_v0 }
 0x5a4   :  { %3384 = vmatpush3.bf16.msra.mxu1 %v3632_v37 }
 0x5a5   :  { %3385 = vmatprep.subr.bf16.mxu1 %v4296_v0 }
 0x5a8   :  { %3386 = vmatpush3.bf16.msra.mxu1 %v3633_v40 }
 0x5a9   :  { %v1857_v35 = vpop.f32.mrb[24].mxu0  ;;  %3387 = vmatprep.subr.bf16.mxu1 %v4296_v0 }
 0x5aa   :  { %v3331_v36 = vpop.f32.mrb[25].mxu0 }
 0x5ab   :  { %v1860_v38 = vpop.f32.mrb[26].mxu0 }
 0x5ac   :  { %v3332_v39 = vpop.f32.mrb[27].mxu0  ;;  %3388 = vmatpush3.bf16.msra.mxu1 %v3634_v41 }
 0x5ad   :  { %3413 = vmatprep.subr.bf16.mxu1 %v4296_v0 }
 0x642   :  { %v1726_v42 = vpop.f32.mrb[20].mxu1 }
 0x643   :  { %v1727_v44 = vadd.f32 %v1726_v42, %v1637_v23  ;;  %v3311_v45 = vpop.f32.mrb[21].mxu1 }
 0x644   :  { %v1729_v46 = vpop.f32.mrb[22].mxu1  ;;  %v3657_v45 = vld [vmem:[#allocation22 + $0x30] sm:$0xff]  }
 0x645   :  { %v1738_v47 = vadd.f32 %v2821_v43, %v1727_v44  ;;  %v1730_v48 = vadd.f32 %v1729_v46, %v1640_v26  ;;  %v3312_v49 = vpop.f32.mrb[23].mxu1  ;;  %v3658_v46 = vld [vmem:[#allocation22 + $0x38] sm:$0xff]  }
 0x646   :  { %v3661_v49 = vld [vmem:[#allocation35 + $0x10] sm:$0xff]  }
 0x647   :  { %v1739_v50 = vadd.f32 %v2821_v43, %v1730_v48  ;;  %v1740_v51 = vmax.f32 %v1738_v47, 0.0  ;;  %v3659_v47 = vld [vmem:[#allocation35] sm:$0xff]   ;;  %v3660_v48 = vld [vmem:[#allocation35 + $0x8] sm:$0xff]  }
 0x649   :  { %v1741_v52 = vmax.f32 %v1739_v50, 0.0  ;;  %v3662_v50 = vld [vmem:[#allocation35 + $0x18] sm:$0xff]  }
 0x64b   :  { %v1742_v54 = vpack.c.bf16 %v1741_v52, %v1740_v51  ;;  %v3663_v51 = vld [vmem:[#allocation35 + $0x20] sm:$0xff]   ;;  %v3664_v52 = vld [vmem:[#allocation35 + $0x28] sm:$0xff]  }
 0x64d   :  { %3370 = vmatmul.mubr.bf16.vlgmr.msra.gmra.mrb[28].mxu0 %v1742_v54  ;;  %v3666_v54 = vld [vmem:[#allocation35 + $0x38] sm:$0xff]  }
 0x64e   :  { %3394 = vmatpush3.bf16.msra.mxu0 %v3635_v53  ;;  %3409 = vmatprep.mubr.msk.bf16.mxu0 %vm4297_vm0, %v4296_v0  ;;  %v3665_v53 = vld [vmem:[#allocation35 + $0x30] sm:$0xff]  }
 0x64f   :  { %3395 = vmatprep.subr.bf16.mxu0 %v4296_v0 }
 0x652   :  { %3396 = vmatpush3.bf16.msra.mxu0 %v3636_v55  ;;  %v2857_v55 = vld [vmem:[%s5160_s23 + $0x6] ss:$0 sm:$0xff] }
 0x653   :  { %3397 = vmatprep.subr.bf16.mxu0 %v4296_v0 }
 0x656   :  { %3398 = vmatpush3.bf16.msra.mxu0 %v3637_v56 }
 0x657   :  { %3399 = vmatprep.subr.bf16.mxu0 %v4296_v0 }
 0x65a   :  { %3400 = vmatpush3.bf16.msra.mxu0 %v3638_v57 }
 0x65b   :  { %3401 = vmatprep.subr.bf16.mxu0 %v4296_v0 }
 0x65e   :  { %3402 = vmatpush3.bf16.msra.mxu0 %v3639_v58 }
 0x65f   :  { %3403 = vmatprep.subr.bf16.mxu0 %v4296_v0 }
 0x662   :  { %v1946_v60 = vpop.f32.mrb[24].mxu1  ;;  %3404 = vmatpush3.bf16.msra.mxu0 %v3640_v59 }
 0x663   :  { %v1947_v62 = vadd.f32 %v1946_v60, %v1857_v35  ;;  %v3351_v63 = vpop.f32.mrb[25].mxu1  ;;  %3405 = vmatprep.subr.bf16.mxu0 %v4296_v0  ;;  %v2848_v35 = vld [vmem:[%s5160_s23 + $0xd] ss:$0 sm:$0xff] }
 0x664   :  { %v1949_v1 = vpop.f32.mrb[26].mxu1  ;;  %v2866_v63 = vld [vmem:[%s5160_s23 + $0xe] ss:$0 sm:$0xff] }
 0x665   :  { %v1958_v2 = vadd.f32 %v2838_v61, %v1947_v62  ;;  %v1950_v3 = vadd.f32 %v1949_v1, %v1860_v38  ;;  %v3352_v4 = vpop.f32.mrb[27].mxu1 }
 0x666   :  { %3406 = vmatpush3.bf16.msra.mxu0 %v3641_v9 }
 0x667   :  { %v1959_v5 = vadd.f32 %v2838_v61, %v1950_v3  ;;  %v1960_v6 = vmax.f32 %v1958_v2, 0.0  ;;  %3407 = vmatprep.subr.bf16.mxu0 %v4296_v0 }
 0x669   :  { %v1961_v7 = vmax.f32 %v1959_v5, 0.0 }
 0x66a   :  { %3408 = vmatpush3.bf16.msra.mxu0 %v3642_v10 }
 0x66b   :  { %v1962_v8 = vpack.c.bf16 %v1961_v7, %v1960_v6  ;;  %3433 = vmatprep.subr.bf16.mxu0 %v4296_v0 }
 0x66d   :  { %3390 = vmatmul.mubr.bf16.vlgmr.msra.gmra.mrb[28].mxu1 %v1962_v8 }
 0x66e   :  { %3429 = vmatprep.mubr.msk.bf16.mxu1 %vm4297_vm0, %v4296_v0  ;;  %3414 = vmatpush3.bf16.msra.mxu1 %v3643_v11 }
 0x66f   :  { %3415 = vmatprep.subr.bf16.mxu1 %v4296_v0 }
 0x672   :  { %3416 = vmatpush3.bf16.msra.mxu1 %v3644_v12 }
 0x673   :  { %3417 = vmatprep.subr.bf16.mxu1 %v4296_v0 }
 0x676   :  { %3418 = vmatpush3.bf16.msra.mxu1 %v3645_v13 }
 0x677   :  { %3419 = vmatprep.subr.bf16.mxu1 %v4296_v0 }
 0x67a   :  { %3420 = vmatpush3.bf16.msra.mxu1 %v3646_v14 }
 0x67b   :  { %3421 = vmatprep.subr.bf16.mxu1 %v4296_v0 }
 0x67e   :  { %3422 = vmatpush3.bf16.msra.mxu1 %v3647_v15 }
 0x67f   :  { %3423 = vmatprep.subr.bf16.mxu1 %v4296_v0 }
 0x682   :  { %3424 = vmatpush3.bf16.msra.mxu1 %v3648_v16 }
 0x683   :  { %3425 = vmatprep.subr.bf16.mxu1 %v4296_v0 }
 0x686   :  { %3426 = vmatpush3.bf16.msra.mxu1 %v3649_v17 }
 0x687   :  { %3427 = vmatprep.subr.bf16.mxu1 %v4296_v0 }
 0x68a   :  { %3428 = vmatpush3.bf16.msra.mxu1 %v3650_v18 }
 0x68b   :  { %3453 = vmatprep.subr.bf16.mxu1 %v4296_v0 }
 0x720   :  { %v2066_v20 = vpop.f32.mrb[28].mxu0 }
 0x721   :  { %v2067_v21 = vadd.f32 %v2839_v19, %v2066_v20  ;;  %v3371_v22 = vpop.f32.mrb[29].mxu0 }
 0x722   :  { %v2069_v23 = vpop.f32.mrb[30].mxu0 }
 0x723   :  { %v2070_v24 = vadd.f32 %v2839_v19, %v2069_v23  ;;  %v3372_v25 = vpop.f32.mrb[31].mxu0  ;;  %v2073_v26 = vmax.f32 %v2067_v21, 0.0 }
 0x725   :  { %v2074_v27 = vmax.f32 %v2070_v24, 0.0 }
 0x727   :  { %v2075_v29 = vpack.c.bf16 %v2074_v27, %v2073_v26 }
 0x729   :  { %3410 = vmatmul.mubr.bf16.vlgmr.msra.gmra.mrb[32].mxu0 %v2075_v29 }
 0x72a   :  { %3434 = vmatpush3.bf16.msra.mxu0 %v3651_v28  ;;  %3449 = vmatprep.mubr.msk.bf16.mxu0 %vm4297_vm0, %v4296_v0 }
 0x72b   :  { %3435 = vmatprep.subr.bf16.mxu0 %v4296_v0 }
 0x72e   :  { %3436 = vmatpush3.bf16.msra.mxu0 %v3652_v30 }
 0x72f   :  { %3437 = vmatprep.subr.bf16.mxu0 %v4296_v0 }
 0x732   :  { %3438 = vmatpush3.bf16.msra.mxu0 %v3653_v31 }
 0x733   :  { %3439 = vmatprep.subr.bf16.mxu0 %v4296_v0 }
 0x736   :  { %3440 = vmatpush3.bf16.msra.mxu0 %v3654_v32 }
 0x737   :  { %3441 = vmatprep.subr.bf16.mxu0 %v4296_v0 }
 0x73a   :  { %3442 = vmatpush3.bf16.msra.mxu0 %v3655_v33 }
 0x73b   :  { %3443 = vmatprep.subr.bf16.mxu0 %v4296_v0 }
 0x73e   :  { %3444 = vmatpush3.bf16.msra.mxu0 %v3656_v34 }
 0x73f   :  { %3445 = vmatprep.subr.bf16.mxu0 %v4296_v0 }
 0x740   :  { %v2179_v36 = vpop.f32.mrb[28].mxu1 }
 0x741   :  { %v2180_v37 = vadd.f32 %v2848_v35, %v2179_v36  ;;  %v3391_v38 = vpop.f32.mrb[29].mxu1 }
 0x742   :  { %v2182_v39 = vpop.f32.mrb[30].mxu1  ;;  %3446 = vmatpush3.bf16.msra.mxu0 %v3657_v45 }
 0x743   :  { %v2183_v40 = vadd.f32 %v2848_v35, %v2182_v39  ;;  %v3392_v41 = vpop.f32.mrb[31].mxu1  ;;  %v2186_v42 = vmax.f32 %v2180_v37, 0.0  ;;  %3447 = vmatprep.subr.bf16.mxu0 %v4296_v0 }
 0x745   :  { %v2187_v43 = vmax.f32 %v2183_v40, 0.0 }
 0x746   :  { %3448 = vmatpush3.bf16.msra.mxu0 %v3658_v46 }
 0x747   :  { %v2188_v44 = vpack.c.bf16 %v2187_v43, %v2186_v42 }
 0x749   :  { %3430 = vmatmul.mubr.bf16.vlgmr.msra.gmra.mrb[32].mxu1 %v2188_v44 }
 0x74a   :  { %3469 = vmatprep.mubr.msk.bf16.mxu1 %vm4297_vm0, %v4296_v0  ;;  %3454 = vmatpush3.bf16.msra.mxu1 %v3659_v47 }
 0x74b   :  { %3455 = vmatprep.subr.bf16.mxu1 %v4296_v0 }
 0x74e   :  { %3456 = vmatpush3.bf16.msra.mxu1 %v3660_v48 }
 0x74f   :  { %3457 = vmatprep.subr.bf16.mxu1 %v4296_v0 }
 0x752   :  { %3458 = vmatpush3.bf16.msra.mxu1 %v3661_v49 }
 0x753   :  { %3459 = vmatprep.subr.bf16.mxu1 %v4296_v0 }
 0x756   :  { %3460 = vmatpush3.bf16.msra.mxu1 %v3662_v50 }
 0x757   :  { %3461 = vmatprep.subr.bf16.mxu1 %v4296_v0 }
 0x75a   :  { %3462 = vmatpush3.bf16.msra.mxu1 %v3663_v51 }
 0x75b   :  { %3463 = vmatprep.subr.bf16.mxu1 %v4296_v0 }
 0x75e   :  { %3464 = vmatpush3.bf16.msra.mxu1 %v3664_v52 }
 0x75f   :  { %3465 = vmatprep.subr.bf16.mxu1 %v4296_v0 }
 0x762   :  { %3466 = vmatpush3.bf16.msra.mxu1 %v3665_v53 }
 0x763   :  { %3467 = vmatprep.subr.bf16.mxu1 %v4296_v0 }
 0x766   :  { %3468 = vmatpush3.bf16.msra.mxu1 %v3666_v54 }
 0x7fc   :  { %v2292_v56 = vpop.f32.mrb[32].mxu0 }
 0x7fd   :  { %v3411_v57 = vpop.f32.mrb[33].mxu0  ;;  %v2293_v59 = vadd.f32 %v2857_v55, %v2292_v56 }
 0x7fe   :  { %v2295_v58 = vpop.f32.mrb[34].mxu0 }
 0x7ff   :  { %v2296_v60 = vadd.f32 %v2857_v55, %v2295_v58  ;;  %v3412_v61 = vpop.f32.mrb[35].mxu0 }
 0x801   :  { %v2299_v62 = vpack.c.bf16 %v2296_v60, %v2293_v59 }
 0x803   :  { %3450 = vmatmul.mubr.bf16.vlgmr.msra.gmra.mrb[36].mxu0 %v2299_v62 }
 0x81c   :  { %v2403_v1 = vpop.f32.mrb[32].mxu1 }
 0x81d   :  { %v3431_v0 = vpop.f32.mrb[33].mxu1  ;;  %v2404_v3 = vadd.f32 %v2866_v63, %v2403_v1 }
 0x81e   :  { %v2406_v2 = vpop.f32.mrb[34].mxu1 }
 0x81f   :  { %v2407_v4 = vadd.f32 %v2866_v63, %v2406_v2  ;;  %v3432_v5 = vpop.f32.mrb[35].mxu1 }
 0x821   :  { %v2410_v6 = vpack.c.bf16 %v2407_v4, %v2404_v3 }
 0x823   :  { %3470 = vmatmul.mubr.bf16.vlgmr.msra.gmra.mrb[36].mxu1 %v2410_v6 }
 0x824   :  { %4163 = shalt.err (!%p4160_p12)
}
 0x825   :  { %s4164_s16 = scalar_lea.hbm %s5161_s24, 256 }
 0x826   :  { %p4165_p13 = scmp.ne.s32.totalorder %s5161_s24, %s4164_s16  ;;  %p4168_p0 = scmp.lt.u32.totalorder %s4164_s16, %s5161_s24 }
 0x828   :  { %p4170_p1 = pnand %p4168_p0, %p4165_p13 }
 0x82a   :  { %4173 = shalt.err (!%p4170_p1)
}
 0x82b   :  { %2646 = dma.vmem_to_hbm [thread:$0]  %s2641_s18, 256, %s5161_s24, [#allocation4], %s5207_s10, %s5207_s10, %s5206_s20  }
 0x82c   :  { %v2875_v7 = vld [vmem:[%s5160_s23 + $0x7] ss:$0 sm:$0xff]  ;;  %s4300_s11 = smov [#allocation38]   ;;  %s4301_s1 = smov [#allocation40]  }
 0x82d   :  { %s2652_s15 = sshll.u32 %s4300_s11, 4  ;;  %s2664_s4 = sshll.u32 %s4301_s1, 4  ;;  %s2653_s15 = int_to_ptr.vmem [resolvable:$true] %s2652_s15  ;;  %s5082_s4 = int_to_ptr.vmem [resolvable:$true] %s2664_s4 }
 0x82e   :  { %s4174_s24 = scalar_lea.vmem %s2653_s15, 256  ;;  %p4179_p3 = scmp.lt.s32.totalorder %s2653_s15, %s2653_s15 }
 0x82f   :  { %p4175_p2 = scmp.ne.s32.totalorder %s2653_s15, %s4174_s24  ;;  %p4180_p4 = scmp.lt.s32.totalorder %s4174_s24, %s4174_s24 }
 0x831   :  { %p4181_p5 = por %p4180_p4, %p4179_p3 }
 0x833   :  { %p4182_p6 = pnand %p4181_p5, %p4175_p2 }
 0x8d6   :  { %v2514_v8 = vpop.f32.mrb[36].mxu0 }
 0x8d7   :  { %v2515_v9 = vadd.f32 %v2875_v7, %v2514_v8  ;;  %v3451_v10 = vpop.f32.mrb[37].mxu0 }
 0x8d8   :  { %v2517_v11 = vpop.f32.mrb[38].mxu0 }
 0x8d9   :  { %2521 = vst [vmem:[#allocation38] sm:$0xff] %v2515_v9  ;;  %v2518_v12 = vadd.f32 %v2875_v7, %v2517_v11  ;;  %v3452_v13 = vpop.f32.mrb[39].mxu0 }
 0x8db   :  { %2522 = vst [vmem:[#allocation38 + $0x8] sm:$0xff] %v2518_v12 }
 0x8dc   :  { %4185 = shalt.err (!%p4182_p6)
}
 0x8dd   :  { %s5217_s6 = sld [smem:[#allocation70_spill]] }
 0x8e3   :  { %s4186_s3 = scalar_lea.hbm %s5217_s6, 256 }
 0x8e4   :  { %p4187_p7 = scmp.ne.s32.totalorder %s5217_s6, %s4186_s3  ;;  %p4190_p8 = scmp.lt.u32.totalorder %s4186_s3, %s5217_s6 }
 0x8e6   :  { %p4192_p9 = pnand %p4190_p8, %p4187_p7 }
 0x8e8   :  { %4195 = shalt.err (!%p4192_p9)
}
 0x8e9   :  { %2658 = dma.vmem_to_hbm [thread:$0]  %s2653_s15, 256, %s5217_s6, [#allocation39], %s5207_s10, %s5207_s10, %s5206_s20  }
 0x8ea   :  { %s4196_s18 = scalar_lea.vmem %s5082_s4, 256  ;;  %p4201_p11 = scmp.lt.s32.totalorder %s5082_s4, %s5082_s4 }
 0x8eb   :  { %p4197_p10 = scmp.ne.s32.totalorder %s5082_s4, %s4196_s18  ;;  %p4202_p12 = scmp.lt.s32.totalorder %s4196_s18, %s4196_s18 }
 0x8ed   :  { %p4203_p13 = por %p4202_p12, %p4201_p11 }
 0x8ef   :  { %p4204_p0 = pnand %p4203_p13, %p4197_p10 }
 0x8f1   :  { %4207 = shalt.err (!%p4204_p0)
}
 0x8f2   :  { %s5218_s0 = sld [smem:[#allocation71_spill]] }
 0x8f8   :  { %s4208_s16 = scalar_lea.hbm %s5218_s0, 256 }
 0x8f9   :  { %p4209_p1 = scmp.ne.s32.totalorder %s5218_s0, %s4208_s16  ;;  %p4212_p2 = scmp.lt.u32.totalorder %s4208_s16, %s5218_s0 }
 0x8fb   :  { %p4214_p3 = pnand %p4212_p2, %p4209_p1 }
 0x8fd   :  { %4217 = shalt.err (!%p4214_p3)
}
 0x8fe   :  { %2670 = dma.vmem_to_hbm [thread:$0]  %s5082_s4, 256, %s5218_s0, [#allocation39], %s5207_s10, %s5207_s10, %s5206_s20   ;;  %v2626_v15 = vpop.f32.mrb[36].mxu1 }
 0x8ff   :  { %v2884_v14 = vld [vmem:[%s5160_s23 + $0xf] ss:$0 sm:$0xff]  ;;  %s4302_s11 = smov [#allocation41]   ;;  %v3471_v17 = vpop.f32.mrb[37].mxu1 }
 0x900   :  { %s2676_s15 = sshll.u32 %s4302_s11, 4  ;;  %v2627_v16 = vadd.f32 %v2884_v14, %v2626_v15  ;;  %v2629_v18 = vpop.f32.mrb[38].mxu1  ;;  %s2677_s15 = int_to_ptr.vmem [resolvable:$true] %s2676_s15 }
 0x901   :  { %v2630_v19 = vadd.f32 %v2884_v14, %v2629_v18  ;;  %v3472_v20 = vpop.f32.mrb[39].mxu1  ;;  %s4218_s1 = scalar_lea.vmem %s2677_s15, 256  ;;  %p4223_p5 = scmp.lt.s32.totalorder %s2677_s15, %s2677_s15 }
 0x902   :  { %2633 = vst [vmem:[#allocation41] sm:$0xff] %v2627_v16  ;;  %p4219_p4 = scmp.ne.s32.totalorder %s2677_s15, %s4218_s1  ;;  %p4224_p6 = scmp.lt.s32.totalorder %s4218_s1, %s4218_s1 }
 0x903   :  { %2634 = vst [vmem:[#allocation41 + $0x8] sm:$0xff] %v2630_v19 }
 0x904   :  { %p4225_p7 = por %p4224_p6, %p4223_p5 }
 0x906   :  { %p4226_p8 = pnand %p4225_p7, %p4219_p4 }
 0x908   :  { %4229 = shalt.err (!%p4226_p8)
}
 0x909   :  { %s5219_s24 = sld [smem:[#allocation72_spill]] }
 0x90f   :  { %s4230_s25 = scalar_lea.hbm %s5219_s24, 256 }
 0x910   :  { %p4231_p9 = scmp.ne.s32.totalorder %s5219_s24, %s4230_s25  ;;  %p4234_p10 = scmp.lt.u32.totalorder %s4230_s25, %s5219_s24 }
 0x912   :  { %p4236_p11 = pnand %p4234_p10, %p4231_p9 }
 0x914   :  { %4239 = shalt.err (!%p4236_p11)
}
 0x915   :  { %2682 = dma.vmem_to_hbm [thread:$0]  %s2677_s15, 256, %s5219_s24, [#allocation42], %s5207_s10, %s5207_s10, %s5206_s20  }
 0x916   :  { %4264 = dma.done.wait [#allocation4], 256  }
 0x917   :  { %4265 = vsyncadd [#allocation4], 4294967040 }
 0x918   :  { %4266 = dma.done.wait [#allocation39], 512  }
 0x919   :  { %4267 = vsyncadd [#allocation39], 4294966784 }
 0x91a   :  { %4268 = dma.done.wait [#allocation42], 256  }
 0x91b   :  { %4269 = vsyncadd [#allocation42], 4294967040 }
 0x91c   :  { %2695 = vsyncpa [#allocation3], 1 }
 0x91d   :  { %2696 = vsyncpa [#allocation6], 1 }
 0x91e   :  { %2697 = vsyncpa [#allocation9], 1 }
 0x91f   :  { %2698 = vsyncpa [#allocation12], 1 }
 0x920   :  { %2699 = vsyncpa [#allocation15], 1 }
 0x921   :  { %2700 = vsyncpa [#allocation18], 1 }
 0x922   :  { %2701 = vsyncpa [#allocation21], 1 }
 0x923   :  { %2702 = vsyncpa [#allocation24], 1 }
 0x924   :  { %2703 = vsyncpa [#allocation27], 1 }
 0x925   :  { %2704 = vsyncpa [#allocation30], 1 }
 0x926   :  { %2705 = vsyncpa [#allocation33], 1 }
 0x927   :  { %2706 = vsyncpa [#allocation36], 1 }
 0x928   :  { %2707 = vsyncpa [#allocation4], 1 }
 0x929   :  { %2708 = vsyncpa [#allocation39], 1 }
 0x92a   :  { %2709 = vsyncpa [#allocation42], 1 }

// kernel: tpu_custom_call.1
= control target key start
LH: loop header
LB: loop body
LE: loop exit
PB: predicated region body
PF: predicated region fallthrough
CT: control target
= control target key end

     0   :  { %s5137_s0 = inlined_call_operand.hbm [shape: f32[16,128], index: 0, kind: input, shape index: {}]   ;;  %s5138_s1 = inlined_call_operand.hbm [shape: f32[16,128], index: 1, kind: input, shape index: {}]   ;;  %s5139_s2 = inlined_call_operand.hbm [shape: bf16[16,128], index: 2, kind: input, shape index: {}]   ;;  %s5140_s3 = inlined_call_operand.hbm [shape: bf16[128,128], index: 3, kind: input, shape index: {}]   ;;  %s5141_s4 = inlined_call_operand.hbm [shape: bf16[128,128], index: 4, kind: input, shape index: {}]   ;;  %s5142_s5 = inlined_call_operand.hbm [shape: bf16[128,128], index: 5, kind: input, shape index: {}]   ;;  %s5143_s6 = inlined_call_operand.hbm [shape: bf16[128,128], index: 6, kind: input, shape index: {}]   ;;  %s5144_s7 = inlined_call_operand.hbm [shape: bf16[128,128], index: 7, kind: input, shape index: {}]   ;;  %s5145_s8 = inlined_call_operand.hbm [shape: bf16[128,128], index: 8, kind: input, shape index: {}]   ;;  %s5146_s9 = inlined_call_operand.hbm [shape: bf16[128,128], index: 9, kind: input, shape index: {}]   ;;  %s5147_s10 = inlined_call_operand.hbm [shape: bf16[128,128], index: 10, kind: input, shape index: {}]   ;;  %s5148_s11 = inlined_call_operand.hbm [shape: bf16[128,128], index: 11, kind: input, shape index: {}]   ;;  %s5149_s12 = inlined_call_operand.hbm [shape: bf16[128,128], index: 12, kind: input, shape index: {}]   ;;  %s5150_s13 = inlined_call_operand.hbm [shape: bf16[128,128], index: 13, kind: input, shape index: {}]   ;;  %s5151_s14 = inlined_call_operand.hbm [shape: bf16[128,128], index: 14, kind: input, shape index: {}]   ;;  %s5152_s15 = inlined_call_operand.hbm [shape: bf16[128,128], index: 15, kind: input, shape index: {}]   ;;  %s5153_s16 = inlined_call_operand.hbm [shape: bf16[128,128], index: 16, kind: input, shape index: {}]   ;;  %s5154_s17 = inlined_call_operand.vmem [shape: bf16[128,128], index: 17, kind: input, shape index: {}]   ;;  %s5155_s18 = inlined_call_operand.hbm [shape: bf16[128,128], index: 18, kind: input, shape index: {}]   ;;  %s5156_s19 = inlined_call_operand.hbm [shape: bf16[128,128], index: 19, kind: input, shape index: {}]   ;;  %s5157_s20 = inlined_call_operand.hbm [shape: bf16[128,128], index: 20, kind: input, shape index: {}]   ;;  %s5158_s21 = inlined_call_operand.hbm [shape: bf16[128,128], index: 21, kind: input, shape index: {}]   ;;  %s5159_s22 = inlined_call_operand.hbm [shape: bf16[128,128], index: 22, kind: input, shape index: {}]   ;;  %s5160_s23 = inlined_call_operand.vmem [shape: f32[16,128], index: 23, kind: input, shape index: {}]   ;;  %s5161_s24 = inlined_call_operand.hbm [shape: f32[16,128], index: 24, kind: output, shape index: {0}]   ;;  %s5162_s25 = inlined_call_operand.hbm [shape: f32[16,128], index: 25, kind: output, shape index: {1}]   ;;  %s5163_s26 = inlined_call_operand.hbm [shape: f32[16,128], index: 26, kind: output, shape index: {2}]   ;;  %s5164_s27 = inlined_call_operand.hbm [shape: f32[16,128], index: 27, kind: output, shape index: {3}]  }
   0x1   :  { %5184 = sst [smem:[#allocation58_spill]] %s5137_s0 }
   0x2   :  { %5185 = sst [smem:[#allocation59_spill]] %s5138_s1 }
   0x3   :  { %5186 = sst [smem:[#allocation60_spill]] %s5139_s2 }
   0x4   :  { %5187 = sst [smem:[#allocation61_spill]] %s5140_s3 }
   0x5   :  { %5188 = sst [smem:[#allocation62_spill]] %s5141_s4 }
   0x6   :  { %5189 = sst [smem:[#allocation63_spill]] %s5142_s5 }
   0x7   :  { %5190 = sst [smem:[#allocation64_spill]] %s5143_s6 }
   0x8   :  { %5191 = sst [smem:[#allocation65_spill]] %s5144_s7 }
   0x9   :  { %5192 = sst [smem:[#allocation66_spill]] %s5145_s8 }
   0xa   :  { %5193 = sst [smem:[#allocation67_spill]] %s5146_s9 }
   0xb   :  { %5194 = sst [smem:[#allocation68_spill]] %s5147_s10 }
   0xc   :  { %5195 = sst [smem:[#allocation69_spill]] %s5148_s11 }
   0xd   :  { %5196 = sst [smem:[#allocation70_spill]] %s5162_s25 }
   0xe   :  { %5197 = sst [smem:[#allocation71_spill]] %s5163_s26 }
   0xf   :  { %5198 = sst [smem:[#allocation72_spill]] %s5164_s27 }
  0x10   :  { %33 = vsyncpa [#allocation3], 0 }
  0x11   :  { %34 = vsyncpa [#allocation6], 0 }
  0x12   :  { %35 = vsyncpa [#allocation9], 0 }
  0x13   :  { %36 = vsyncpa [#allocation12], 0 }
  0x14   :  { %37 = vsyncpa [#allocation15], 0 }
  0x15   :  { %38 = vsyncpa [#allocation18], 0 }
  0x16   :  { %39 = vsyncpa [#allocation21], 0 }
  0x17   :  { %40 = vsyncpa [#allocation24], 0 }
  0x18   :  { %41 = vsyncpa [#allocation27], 0 }
  0x19   :  { %42 = vsyncpa [#allocation30], 0 }
  0x1a   :  { %43 = vsyncpa [#allocation33], 0 }
  0x1b   :  { %44 = vsyncpa [#allocation36], 0 }
  0x1c   :  { %45 = vsyncpa [#allocation4], 0 }
  0x1d   :  { %46 = vsyncpa [#allocation39], 0 }
  0x1e   :  { %47 = vsyncpa [#allocation42], 0  ;;  %s4270_s7 = smov [#allocation5]   ;;  %s5199_s9 = sld [smem:[#allocation59_spill]] }
  0x1f   :  { %s65_s4 = sshll.u32 %s4270_s7, 4  ;;  %s66_s4 = int_to_ptr.vmem [resolvable:$true] %s65_s4 }
  0x24   :  { %s3668_s5 = scalar_lea.hbm %s5199_s9, 256 }
  0x25   :  { %p3669_p0 = scmp.ne.s32.totalorder %s5199_s9, %s3668_s5  ;;  %p3672_p1 = scmp.lt.u32.totalorder %s3668_s5, %s5199_s9 }
  0x27   :  { %p3674_p2 = pnand %p3672_p1, %p3669_p0 }
  0x29   :  { %3677 = shalt.err (!%p3674_p2)
}
  0x2a   :  { %s3678_s1 = scalar_lea.vmem %s66_s4, 256  ;;  %p3683_p4 = scmp.lt.s32.totalorder %s66_s4, %s66_s4 }
  0x2b   :  { %p3679_p3 = scmp.ne.s32.totalorder %s66_s4, %s3678_s1  ;;  %p3684_p5 = scmp.lt.s32.totalorder %s3678_s1, %s3678_s1 }
  0x2d   :  { %p3685_p6 = por %p3684_p5, %p3683_p4 }
  0x2f   :  { %p3686_p7 = pnand %p3685_p6, %p3679_p3 }
  0x31   :  { %3689 = shalt.err (!%p3686_p7)
}
  0x32   :  { %s5180_s6 = smov 128   ;;  %s5182_s11 = smov 8  }
  0x33   :  { %71 = dma.hbm_to_vmem [thread:$0]  %s5199_s9, 256, %s66_s4, [#allocation6], %s5180_s6, %s5180_s6, %s5182_s11  }
  0x34   :  { %s4273_s7 = smov [#allocation8]   ;;  %s4274_s30 = smov [#allocation11]  }
  0x35   :  { %s89_s8 = sshll.u32 %s4273_s7, 4  ;;  %s113_s5 = sshll.u32 %s4274_s30, 4  ;;  %s90_s8 = int_to_ptr.vmem [resolvable:$true] %s89_s8  ;;  %s114_s5 = int_to_ptr.vmem [resolvable:$true] %s113_s5 }
  0x36   :  { %s5200_s10 = sld [smem:[#allocation61_spill]] }
  0x3c   :  { %s3690_s29 = scalar_lea.hbm %s5200_s10, 1024 }
  0x3d   :  { %p3691_p8 = scmp.ne.s32.totalorder %s5200_s10, %s3690_s29  ;;  %p3694_p9 = scmp.lt.u32.totalorder %s3690_s29, %s5200_s10 }
  0x3f   :  { %p3696_p10 = pnand %p3694_p9, %p3691_p8 }
  0x41   :  { %3699 = shalt.err (!%p3696_p10)
}
  0x42   :  { %s3700_s4 = scalar_lea.vmem %s90_s8, 1024  ;;  %p3705_p12 = scmp.lt.s32.totalorder %s90_s8, %s90_s8 }
  0x43   :  { %p3701_p11 = scmp.ne.s32.totalorder %s90_s8, %s3700_s4  ;;  %p3706_p13 = scmp.lt.s32.totalorder %s3700_s4, %s3700_s4 }
  0x45   :  { %p3707_p0 = por %p3706_p13, %p3705_p12 }
  0x47   :  { %p3708_p1 = pnand %p3707_p0, %p3701_p11 }
  0x49   :  { %3711 = shalt.err (!%p3708_p1)
}
  0x4a   :  { %s4275_s9 = smov 64   ;;  %s4276_s2 = smov 4  }
  0x4b   :  { %95 = dma.hbm_to_vmem [thread:$0]  %s5200_s10, 1024, %s90_s8, [#allocation9], %s4275_s9, %s4275_s9, %s4276_s2  }
  0x4c   :  { %s5201_s7 = sld [smem:[#allocation63_spill]] }
  0x52   :  { %s3712_s30 = scalar_lea.hbm %s5201_s7, 1024 }
  0x53   :  { %p3713_p2 = scmp.ne.s32.totalorder %s5201_s7, %s3712_s30  ;;  %p3716_p3 = scmp.lt.u32.totalorder %s3712_s30, %s5201_s7 }
  0x55   :  { %p3718_p4 = pnand %p3716_p3, %p3713_p2 }
  0x57   :  { %3721 = shalt.err (!%p3718_p4)
}
  0x58   :  { %s3722_s4 = scalar_lea.vmem %s114_s5, 1024  ;;  %p3727_p6 = scmp.lt.s32.totalorder %s114_s5, %s114_s5 }
  0x59   :  { %p3723_p5 = scmp.ne.s32.totalorder %s114_s5, %s3722_s4  ;;  %p3728_p7 = scmp.lt.s32.totalorder %s3722_s4, %s3722_s4 }
  0x5b   :  { %p3729_p8 = por %p3728_p7, %p3727_p6 }
  0x5d   :  { %p3730_p9 = pnand %p3729_p8, %p3723_p5 }
  0x5f   :  { %3733 = shalt.err (!%p3730_p9)
}
  0x60   :  { %119 = dma.hbm_to_vmem [thread:$0]  %s5201_s7, 1024, %s114_s5, [#allocation12], %s4275_s9, %s4275_s9, %s4276_s2  }
  0x61   :  { %s4277_s27 = smov [#allocation14]   ;;  %s4278_s25 = smov [#allocation17]  }
  0x62   :  { %s137_s3 = sshll.u32 %s4277_s27, 4  ;;  %s161_s26 = sshll.u32 %s4278_s25, 4  ;;  %s138_s3 = int_to_ptr.vmem [resolvable:$true] %s137_s3  ;;  %s162_s26 = int_to_ptr.vmem [resolvable:$true] %s161_s26 }
  0x63   :  { %s5202_s0 = sld [smem:[#allocation65_spill]] }
  0x69   :  { %s3734_s29 = scalar_lea.hbm %s5202_s0, 1024 }
  0x6a   :  { %p3735_p10 = scmp.ne.s32.totalorder %s5202_s0, %s3734_s29  ;;  %p3738_p11 = scmp.lt.u32.totalorder %s3734_s29, %s5202_s0 }
  0x6c   :  { %p3740_p12 = pnand %p3738_p11, %p3735_p10 }
  0x6e   :  { %3743 = shalt.err (!%p3740_p12)
}
  0x6f   :  { %s3744_s5 = scalar_lea.vmem %s138_s3, 1024  ;;  %p3749_p0 = scmp.lt.s32.totalorder %s138_s3, %s138_s3 }
  0x70   :  { %p3745_p13 = scmp.ne.s32.totalorder %s138_s3, %s3744_s5  ;;  %p3750_p1 = scmp.lt.s32.totalorder %s3744_s5, %s3744_s5 }
  0x72   :  { %p3751_p2 = por %p3750_p1, %p3749_p0 }
  0x74   :  { %p3752_p3 = pnand %p3751_p2, %p3745_p13 }
  0x76   :  { %3755 = shalt.err (!%p3752_p3)
}
  0x77   :  { %143 = dma.hbm_to_vmem [thread:$0]  %s5202_s0, 1024, %s138_s3, [#allocation15], %s4275_s9, %s4275_s9, %s4276_s2  }
  0x78   :  { %s5203_s11 = sld [smem:[#allocation67_spill]] }
  0x7e   :  { %s3756_s27 = scalar_lea.hbm %s5203_s11, 1024 }
  0x7f   :  { %p3757_p4 = scmp.ne.s32.totalorder %s5203_s11, %s3756_s27  ;;  %p3760_p5 = scmp.lt.u32.totalorder %s3756_s27, %s5203_s11 }
  0x81   :  { %p3762_p6 = pnand %p3760_p5, %p3757_p4 }
  0x83   :  { %3765 = shalt.err (!%p3762_p6)
}
  0x84   :  { %s3766_s1 = scalar_lea.vmem %s162_s26, 1024  ;;  %p3771_p8 = scmp.lt.s32.totalorder %s162_s26, %s162_s26 }
  0x85   :  { %p3767_p7 = scmp.ne.s32.totalorder %s162_s26, %s3766_s1  ;;  %p3772_p9 = scmp.lt.s32.totalorder %s3766_s1, %s3766_s1 }
  0x87   :  { %p3773_p10 = por %p3772_p9, %p3771_p8 }
  0x89   :  { %p3774_p11 = pnand %p3773_p10, %p3767_p7 }
  0x8b   :  { %3777 = shalt.err (!%p3774_p11)
}
  0x8c   :  { %167 = dma.hbm_to_vmem [thread:$0]  %s5203_s11, 1024, %s162_s26, [#allocation18], %s4275_s9, %s4275_s9, %s4276_s2  }
  0x8d   :  { %s4279_s4 = smov [#allocation20]   ;;  %s4280_s7 = smov [#allocation23]  }
  0x8e   :  { %s185_s5 = sshll.u32 %s4279_s4, 4  ;;  %s209_s8 = sshll.u32 %s4280_s7, 4  ;;  %s186_s5 = int_to_ptr.vmem [resolvable:$true] %s185_s5  ;;  %s210_s8 = int_to_ptr.vmem [resolvable:$true] %s209_s8 }
  0x8f   :  { %s5204_s27 = sld [smem:[#allocation69_spill]] }
  0x95   :  { %s3778_s25 = scalar_lea.hbm %s5204_s27, 1024 }
  0x96   :  { %p3779_p12 = scmp.ne.s32.totalorder %s5204_s27, %s3778_s25  ;;  %p3782_p13 = scmp.lt.u32.totalorder %s3778_s25, %s5204_s27 }
  0x98   :  { %p3784_p0 = pnand %p3782_p13, %p3779_p12 }
  0x9a   :  { %3787 = shalt.err (!%p3784_p0)
}
  0x9b   :  { %s3788_s26 = scalar_lea.vmem %s186_s5, 1024  ;;  %p3793_p2 = scmp.lt.s32.totalorder %s186_s5, %s186_s5 }
  0x9c   :  { %p3789_p1 = scmp.ne.s32.totalorder %s186_s5, %s3788_s26  ;;  %p3794_p3 = scmp.lt.s32.totalorder %s3788_s26, %s3788_s26 }
  0x9e   :  { %p3795_p4 = por %p3794_p3, %p3793_p2 }
  0xa0   :  { %p3796_p5 = pnand %p3795_p4, %p3789_p1 }
  0xa2   :  { %3799 = shalt.err (!%p3796_p5)
}
  0xa3   :  { %191 = dma.hbm_to_vmem [thread:$0]  %s5204_s27, 1024, %s186_s5, [#allocation21], %s4275_s9, %s4275_s9, %s4276_s2  }
  0xa4   :  { %s3800_s7 = scalar_lea.hbm %s5150_s13, 1024 }
  0xa5   :  { %p3801_p6 = scmp.ne.s32.totalorder %s5150_s13, %s3800_s7  ;;  %p3804_p7 = scmp.lt.u32.totalorder %s3800_s7, %s5150_s13 }
  0xa7   :  { %p3806_p8 = pnand %p3804_p7, %p3801_p6 }
  0xa9   :  { %3809 = shalt.err (!%p3806_p8)
}
  0xaa   :  { %s3810_s28 = scalar_lea.vmem %s210_s8, 1024  ;;  %p3815_p10 = scmp.lt.s32.totalorder %s210_s8, %s210_s8 }
  0xab   :  { %p3811_p9 = scmp.ne.s32.totalorder %s210_s8, %s3810_s28  ;;  %p3816_p11 = scmp.lt.s32.totalorder %s3810_s28, %s3810_s28 }
  0xad   :  { %p3817_p12 = por %p3816_p11, %p3815_p10 }
  0xaf   :  { %p3818_p13 = pnand %p3817_p12, %p3811_p9 }
  0xb1   :  { %3821 = shalt.err (!%p3818_p13)
}
  0xb2   :  { %215 = dma.hbm_to_vmem [thread:$0]  %s5150_s13, 1024, %s210_s8, [#allocation24], %s4275_s9, %s4275_s9, %s4276_s2  }
  0xb3   :  { %s4281_s29 = smov [#allocation26]   ;;  %s4282_s26 = smov [#allocation29]  }
  0xb4   :  { %s233_s1 = sshll.u32 %s4281_s29, 4  ;;  %s259_s11 = sshll.u32 %s4282_s26, 4  ;;  %s234_s1 = int_to_ptr.vmem [resolvable:$true] %s233_s1  ;;  %s260_s11 = int_to_ptr.vmem [resolvable:$true] %s259_s11 }
  0xb5   :  { %s3822_s4 = scalar_lea.hbm %s5152_s15, 1024 }
  0xb6   :  { %p3823_p0 = scmp.ne.s32.totalorder %s5152_s15, %s3822_s4  ;;  %p3826_p1 = scmp.lt.u32.totalorder %s3822_s4, %s5152_s15 }
  0xb8   :  { %p3828_p2 = pnand %p3826_p1, %p3823_p0 }
  0xba   :  { %3831 = shalt.err (!%p3828_p2)
}
  0xbb   :  { %s3832_s13 = scalar_lea.vmem %s234_s1, 1024  ;;  %p3837_p4 = scmp.lt.s32.totalorder %s234_s1, %s234_s1 }
  0xbc   :  { %p3833_p3 = scmp.ne.s32.totalorder %s234_s1, %s3832_s13  ;;  %p3838_p5 = scmp.lt.s32.totalorder %s3832_s13, %s3832_s13 }
  0xbe   :  { %p3839_p6 = por %p3838_p5, %p3837_p4 }
  0xc0   :  { %p3840_p7 = pnand %p3839_p6, %p3833_p3 }
  0xc2   :  { %3843 = shalt.err (!%p3840_p7)
}
  0xc3   :  { %239 = dma.hbm_to_vmem [thread:$0]  %s5152_s15, 1024, %s234_s1, [#allocation27], %s4275_s9, %s4275_s9, %s4276_s2  }
  0xc4   :  { %s3844_s27 = scalar_lea.hbm %s5155_s18, 1024 }
  0xc5   :  { %p3845_p8 = scmp.ne.s32.totalorder %s5155_s18, %s3844_s27  ;;  %p3848_p9 = scmp.lt.u32.totalorder %s3844_s27, %s5155_s18 }
  0xc7   :  { %p3850_p10 = pnand %p3848_p9, %p3845_p8 }
  0xc9   :  { %3853 = shalt.err (!%p3850_p10)
}
  0xca   :  { %s3854_s4 = scalar_lea.vmem %s260_s11, 1024  ;;  %p3859_p12 = scmp.lt.s32.totalorder %s260_s11, %s260_s11 }
  0xcb   :  { %p3855_p11 = scmp.ne.s32.totalorder %s260_s11, %s3854_s4  ;;  %p3860_p13 = scmp.lt.s32.totalorder %s3854_s4, %s3854_s4 }
  0xcd   :  { %p3861_p0 = por %p3860_p13, %p3859_p12 }
  0xcf   :  { %p3862_p1 = pnand %p3861_p0, %p3855_p11 }
  0xd1   :  { %3865 = shalt.err (!%p3862_p1)
}
  0xd2   :  { %265 = dma.hbm_to_vmem [thread:$0]  %s5155_s18, 1024, %s260_s11, [#allocation30], %s4275_s9, %s4275_s9, %s4276_s2  }
  0xd3   :  { %s4283_s7 = smov [#allocation32]   ;;  %s4284_s6 = smov [#allocation2]  }
  0xd4   :  { %s283_s10 = sshll.u32 %s4283_s7, 4  ;;  %s53_s25 = sshll.u32 %s4284_s6, 4  ;;  %s284_s10 = int_to_ptr.vmem [resolvable:$true] %s283_s10  ;;  %s54_s25 = int_to_ptr.vmem [resolvable:$true] %s53_s25 }
  0xd5   :  { %s3866_s30 = scalar_lea.hbm %s5157_s20, 1024 }
  0xd6   :  { %p3867_p2 = scmp.ne.s32.totalorder %s5157_s20, %s3866_s30  ;;  %p3870_p3 = scmp.lt.u32.totalorder %s3866_s30, %s5157_s20 }
  0xd8   :  { %p3872_p4 = pnand %p3870_p3, %p3867_p2 }
  0xda   :  { %3875 = shalt.err (!%p3872_p4)
}
  0xdb   :  { %s3876_s18 = scalar_lea.vmem %s284_s10, 1024  ;;  %p3881_p6 = scmp.lt.s32.totalorder %s284_s10, %s284_s10 }
  0xdc   :  { %p3877_p5 = scmp.ne.s32.totalorder %s284_s10, %s3876_s18  ;;  %p3882_p7 = scmp.lt.s32.totalorder %s3876_s18, %s3876_s18 }
  0xde   :  { %p3883_p8 = por %p3882_p7, %p3881_p6 }
  0xe0   :  { %p3884_p9 = pnand %p3883_p8, %p3877_p5 }
  0xe2   :  { %3887 = shalt.err (!%p3884_p9)
}
  0xe3   :  { %289 = dma.hbm_to_vmem [thread:$0]  %s5157_s20, 1024, %s284_s10, [#allocation33], %s4275_s9, %s4275_s9, %s4276_s2  }
  0xe4   :  { %s5205_s4 = sld [smem:[#allocation58_spill]] }
  0xea   :  { %s3888_s15 = scalar_lea.hbm %s5205_s4, 256 }
  0xeb   :  { %p3889_p10 = scmp.ne.s32.totalorder %s5205_s4, %s3888_s15  ;;  %p3892_p11 = scmp.lt.u32.totalorder %s3888_s15, %s5205_s4 }
  0xed   :  { %p3894_p12 = pnand %p3892_p11, %p3889_p10 }
  0xef   :  { %3897 = shalt.err (!%p3894_p12)
}
  0xf0   :  { %s3898_s8 = scalar_lea.vmem %s54_s25, 256  ;;  %p3903_p0 = scmp.lt.s32.totalorder %s54_s25, %s54_s25 }
  0xf1   :  { %p3899_p13 = scmp.ne.s32.totalorder %s54_s25, %s3898_s8  ;;  %p3904_p1 = scmp.lt.s32.totalorder %s3898_s8, %s3898_s8 }
  0xf3   :  { %p3905_p2 = por %p3904_p1, %p3903_p0 }
  0xf5   :  { %p3906_p3 = pnand %p3905_p2, %p3899_p13 }
  0xf7   :  { %3909 = shalt.err (!%p3906_p3)
}
  0xf8   :  { %s5206_s20 = smov 8   ;;  %s5207_s10 = smov 128  }
  0xf9   :  { %59 = dma.hbm_to_vmem [thread:$0]  %s5205_s4, 256, %s54_s25, [#allocation3], %s5207_s10, %s5207_s10, %s5206_s20  }
  0xfa   :  { %s4285_s5 = smov [#allocation7]   ;;  %s4286_s29 = smov [#allocation10]  }
  0xfb   :  { %s77_s27 = sshll.u32 %s4285_s5, 4  ;;  %s101_s18 = sshll.u32 %s4286_s29, 4  ;;  %s78_s27 = int_to_ptr.vmem [resolvable:$true] %s77_s27  ;;  %s102_s18 = int_to_ptr.vmem [resolvable:$true] %s101_s18 }
  0xfc   :  { %s5208_s3 = sld [smem:[#allocation60_spill]] }
 0x102   :  { %s3910_s0 = scalar_lea.hbm %s5208_s3, 128 }
 0x103   :  { %p3911_p4 = scmp.ne.s32.totalorder %s5208_s3, %s3910_s0  ;;  %p3914_p5 = scmp.lt.u32.totalorder %s3910_s0, %s5208_s3 }
 0x105   :  { %p3916_p6 = pnand %p3914_p5, %p3911_p4 }
 0x107   :  { %3919 = shalt.err (!%p3916_p6)
}
 0x108   :  { %s3920_s25 = scalar_lea.vmem %s78_s27, 128  ;;  %p3925_p8 = scmp.lt.s32.totalorder %s78_s27, %s78_s27 }
 0x109   :  { %p3921_p7 = scmp.ne.s32.totalorder %s78_s27, %s3920_s25  ;;  %p3926_p9 = scmp.lt.s32.totalorder %s3920_s25, %s3920_s25 }
 0x10b   :  { %p3927_p10 = por %p3926_p9, %p3925_p8 }
 0x10d   :  { %p3928_p11 = pnand %p3927_p10, %p3921_p7 }
 0x10f   :  { %3931 = shalt.err (!%p3928_p11)
}
 0x110   :  { %83 = dma.hbm_to_vmem [thread:$0]  %s5208_s3, 128, %s78_s27, [#allocation6], %s4275_s9, %s4275_s9, %s4276_s2  }
 0x111   :  { %s5209_s28 = sld [smem:[#allocation62_spill]] }
 0x117   :  { %s3932_s5 = scalar_lea.hbm %s5209_s28, 1024 }
 0x118   :  { %p3933_p12 = scmp.ne.s32.totalorder %s5209_s28, %s3932_s5  ;;  %p3936_p13 = scmp.lt.u32.totalorder %s3932_s5, %s5209_s28 }
 0x11a   :  { %p3938_p0 = pnand %p3936_p13, %p3933_p12 }
 0x11c   :  { %3941 = shalt.err (!%p3938_p0)
}
 0x11d   :  { %s3942_s15 = scalar_lea.vmem %s102_s18, 1024  ;;  %p3947_p2 = scmp.lt.s32.totalorder %s102_s18, %s102_s18 }
 0x11e   :  { %p3943_p1 = scmp.ne.s32.totalorder %s102_s18, %s3942_s15  ;;  %p3948_p3 = scmp.lt.s32.totalorder %s3942_s15, %s3942_s15 }
 0x120   :  { %p3949_p4 = por %p3948_p3, %p3947_p2 }
 0x122   :  { %p3950_p5 = pnand %p3949_p4, %p3943_p1 }
 0x124   :  { %3953 = shalt.err (!%p3950_p5)
}
 0x125   :  { %107 = dma.hbm_to_vmem [thread:$0]  %s5209_s28, 1024, %s102_s18, [#allocation9], %s4275_s9, %s4275_s9, %s4276_s2  }
 0x126   :  { %s4287_s1 = smov [#allocation13]   ;;  %s4288_s6 = smov [#allocation16]  }
 0x127   :  { %s125_s7 = sshll.u32 %s4287_s1, 4  ;;  %s149_s25 = sshll.u32 %s4288_s6, 4  ;;  %s126_s7 = int_to_ptr.vmem [resolvable:$true] %s125_s7  ;;  %s150_s25 = int_to_ptr.vmem [resolvable:$true] %s149_s25 }
 0x128   :  { %s5210_s8 = sld [smem:[#allocation64_spill]] }
 0x12e   :  { %s3954_s30 = scalar_lea.hbm %s5210_s8, 1024 }
 0x12f   :  { %p3955_p6 = scmp.ne.s32.totalorder %s5210_s8, %s3954_s30  ;;  %p3958_p7 = scmp.lt.u32.totalorder %s3954_s30, %s5210_s8 }
 0x131   :  { %p3960_p8 = pnand %p3958_p7, %p3955_p6 }
 0x133   :  { %3963 = shalt.err (!%p3960_p8)
}
 0x134   :  { %s3964_s18 = scalar_lea.vmem %s126_s7, 1024  ;;  %p3969_p10 = scmp.lt.s32.totalorder %s126_s7, %s126_s7 }
 0x135   :  { %p3965_p9 = scmp.ne.s32.totalorder %s126_s7, %s3964_s18  ;;  %p3970_p11 = scmp.lt.s32.totalorder %s3964_s18, %s3964_s18 }
 0x137   :  { %p3971_p12 = por %p3970_p11, %p3969_p10 }
 0x139   :  { %p3972_p13 = pnand %p3971_p12, %p3965_p9 }
 0x13b   :  { %3975 = shalt.err (!%p3972_p13)
}
 0x13c   :  { %131 = dma.hbm_to_vmem [thread:$0]  %s5210_s8, 1024, %s126_s7, [#allocation12], %s4275_s9, %s4275_s9, %s4276_s2  }
 0x13d   :  { %s5211_s3 = sld [smem:[#allocation66_spill]] }
 0x143   :  { %s3976_s1 = scalar_lea.hbm %s5211_s3, 1024 }
 0x144   :  { %p3977_p0 = scmp.ne.s32.totalorder %s5211_s3, %s3976_s1  ;;  %p3980_p1 = scmp.lt.u32.totalorder %s3976_s1, %s5211_s3 }
 0x146   :  { %p3982_p2 = pnand %p3980_p1, %p3977_p0 }
 0x148   :  { %3985 = shalt.err (!%p3982_p2)
}
 0x149   :  { %s3986_s5 = scalar_lea.vmem %s150_s25, 1024  ;;  %p3991_p4 = scmp.lt.s32.totalorder %s150_s25, %s150_s25 }
 0x14a   :  { %p3987_p3 = scmp.ne.s32.totalorder %s150_s25, %s3986_s5  ;;  %p3992_p5 = scmp.lt.s32.totalorder %s3986_s5, %s3986_s5 }
 0x14c   :  { %p3993_p6 = por %p3992_p5, %p3991_p4 }
 0x14e   :  { %p3994_p7 = pnand %p3993_p6, %p3987_p3 }
 0x150   :  { %3997 = shalt.err (!%p3994_p7)
}
 0x151   :  { %155 = dma.hbm_to_vmem [thread:$0]  %s5211_s3, 1024, %s150_s25, [#allocation15], %s4275_s9, %s4275_s9, %s4276_s2  }
 0x152   :  { %s4289_s29 = smov [#allocation19]   ;;  %s4290_s26 = smov [#allocation22]  }
 0x153   :  { %s173_s11 = sshll.u32 %s4289_s29, 4  ;;  %s197_s18 = sshll.u32 %s4290_s26, 4  ;;  %s174_s11 = int_to_ptr.vmem [resolvable:$true] %s173_s11  ;;  %s198_s18 = int_to_ptr.vmem [resolvable:$true] %s197_s18 }
 0x154   :  { %s5212_s15 = sld [smem:[#allocation68_spill]] }
 0x15a   :  { %s3998_s27 = scalar_lea.hbm %s5212_s15, 1024 }
 0x15b   :  { %p3999_p8 = scmp.ne.s32.totalorder %s5212_s15, %s3998_s27  ;;  %p4002_p9 = scmp.lt.u32.totalorder %s3998_s27, %s5212_s15 }
 0x15d   :  { %p4004_p10 = pnand %p4002_p9, %p3999_p8 }
 0x15f   :  { %4007 = shalt.err (!%p4004_p10)
}
 0x160   :  { %s4008_s25 = scalar_lea.vmem %s174_s11, 1024  ;;  %p4013_p12 = scmp.lt.s32.totalorder %s174_s11, %s174_s11 }
 0x161   :  { %p4009_p11 = scmp.ne.s32.totalorder %s174_s11, %s4008_s25  ;;  %p4014_p13 = scmp.lt.s32.totalorder %s4008_s25, %s4008_s25 }
 0x163   :  { %p4015_p0 = por %p4014_p13, %p4013_p12 }
 0x165   :  { %p4016_p1 = pnand %p4015_p0, %p4009_p11 }
 0x167   :  { %4019 = shalt.err (!%p4016_p1)
}
 0x168   :  { %179 = dma.hbm_to_vmem [thread:$0]  %s5212_s15, 1024, %s174_s11, [#allocation18], %s4275_s9, %s4275_s9, %s4276_s2  }
 0x169   :  { %s4020_s8 = scalar_lea.hbm %s5149_s12, 1024 }
 0x16a   :  { %p4021_p2 = scmp.ne.s32.totalorder %s5149_s12, %s4020_s8  ;;  %p4024_p3 = scmp.lt.u32.totalorder %s4020_s8, %s5149_s12 }
 0x16c   :  { %p4026_p4 = pnand %p4024_p3, %p4021_p2 }
 0x16e   :  { %4029 = shalt.err (!%p4026_p4)
}
 0x16f   :  { %s4030_s27 = scalar_lea.vmem %s198_s18, 1024  ;;  %p4035_p6 = scmp.lt.s32.totalorder %s198_s18, %s198_s18 }
 0x170   :  { %p4031_p5 = scmp.ne.s32.totalorder %s198_s18, %s4030_s27  ;;  %p4036_p7 = scmp.lt.s32.totalorder %s4030_s27, %s4030_s27 }
 0x172   :  { %p4037_p8 = por %p4036_p7, %p4035_p6 }
 0x174   :  { %p4038_p9 = pnand %p4037_p8, %p4031_p5 }
 0x176   :  { %4041 = shalt.err (!%p4038_p9)
}
 0x177   :  { %203 = dma.hbm_to_vmem [thread:$0]  %s5149_s12, 1024, %s198_s18, [#allocation21], %s4275_s9, %s4275_s9, %s4276_s2  }
 0x178   :  { %s4291_s1 = smov [#allocation25]   ;;  %s4292_s4 = smov [#allocation28]  }
 0x179   :  { %s221_s6 = sshll.u32 %s4291_s1, 4  ;;  %s245_s13 = sshll.u32 %s4292_s4, 4  ;;  %s222_s6 = int_to_ptr.vmem [resolvable:$true] %s221_s6  ;;  %s246_s13 = int_to_ptr.vmem [resolvable:$true] %s245_s13 }
 0x17a   :  { %s4042_s30 = scalar_lea.hbm %s5151_s14, 1024 }
 0x17b   :  { %p4043_p10 = scmp.ne.s32.totalorder %s5151_s14, %s4042_s30  ;;  %p4046_p11 = scmp.lt.u32.totalorder %s4042_s30, %s5151_s14 }
 0x17d   :  { %p4048_p12 = pnand %p4046_p11, %p4043_p10 }
 0x17f   :  { %4051 = shalt.err (!%p4048_p12)
}
 0x180   :  { %s4052_s12 = scalar_lea.vmem %s222_s6, 1024  ;;  %p4057_p0 = scmp.lt.s32.totalorder %s222_s6, %s222_s6 }
 0x181   :  { %p4053_p13 = scmp.ne.s32.totalorder %s222_s6, %s4052_s12  ;;  %p4058_p1 = scmp.lt.s32.totalorder %s4052_s12, %s4052_s12 }
 0x183   :  { %p4059_p2 = por %p4058_p1, %p4057_p0 }
 0x185   :  { %p4060_p3 = pnand %p4059_p2, %p4053_p13 }
 0x187   :  { %4063 = shalt.err (!%p4060_p3)
}
 0x188   :  { %227 = dma.hbm_to_vmem [thread:$0]  %s5151_s14, 1024, %s222_s6, [#allocation24], %s4275_s9, %s4275_s9, %s4276_s2  }
 0x189   :  { %s4064_s27 = scalar_lea.hbm %s5153_s16, 1024 }
 0x18a   :  { %p4065_p4 = scmp.ne.s32.totalorder %s5153_s16, %s4064_s27  ;;  %p4068_p5 = scmp.lt.u32.totalorder %s4064_s27, %s5153_s16 }
 0x18c   :  { %p4070_p6 = pnand %p4068_p5, %p4065_p4 }
 0x18e   :  { %4073 = shalt.err (!%p4070_p6)
}
 0x18f   :  { %s4074_s25 = scalar_lea.vmem %s246_s13, 1024  ;;  %p4079_p8 = scmp.lt.s32.totalorder %s246_s13, %s246_s13 }
 0x190   :  { %p4075_p7 = scmp.ne.s32.totalorder %s246_s13, %s4074_s25  ;;  %p4080_p9 = scmp.lt.s32.totalorder %s4074_s25, %s4074_s25 }
 0x192   :  { %p4081_p10 = por %p4080_p9, %p4079_p8 }
 0x194   :  { %p4082_p11 = pnand %p4081_p10, %p4075_p7 }
 0x196   :  { %4085 = shalt.err (!%p4082_p11)
}
 0x197   :  { %251 = dma.hbm_to_vmem [thread:$0]  %s5153_s16, 1024, %s246_s13, [#allocation27], %s4275_s9, %s4275_s9, %s4276_s2  }
 0x198   :  { %s4293_s3 = smov [#allocation31]   ;;  %s4294_s5 = smov [#allocation34]  }
 0x199   :  { %s271_s30 = sshll.u32 %s4293_s3, 4  ;;  %s295_s7 = sshll.u32 %s4294_s5, 4  ;;  %s272_s30 = int_to_ptr.vmem [resolvable:$true] %s271_s30  ;;  %s296_s7 = int_to_ptr.vmem [resolvable:$true] %s295_s7 }
 0x19a   :  { %s4086_s12 = scalar_lea.hbm %s5156_s19, 1024 }
 0x19b   :  { %p4087_p12 = scmp.ne.s32.totalorder %s5156_s19, %s4086_s12  ;;  %p4090_p13 = scmp.lt.u32.totalorder %s4086_s12, %s5156_s19 }
 0x19d   :  { %p4092_p0 = pnand %p4090_p13, %p4087_p12 }
 0x19f   :  { %4095 = shalt.err (!%p4092_p0)
}
 0x1a0   :  { %s4096_s16 = scalar_lea.vmem %s272_s30, 1024  ;;  %p4101_p2 = scmp.lt.s32.totalorder %s272_s30, %s272_s30 }
 0x1a1   :  { %p4097_p1 = scmp.ne.s32.totalorder %s272_s30, %s4096_s16  ;;  %p4102_p3 = scmp.lt.s32.totalorder %s4096_s16, %s4096_s16 }
 0x1a3   :  { %p4103_p4 = por %p4102_p3, %p4101_p2 }
 0x1a5   :  { %p4104_p5 = pnand %p4103_p4, %p4097_p1 }
 0x1a7   :  { %4107 = shalt.err (!%p4104_p5)
}
 0x1a8   :  { %277 = dma.hbm_to_vmem [thread:$0]  %s5156_s19, 1024, %s272_s30, [#allocation30], %s4275_s9, %s4275_s9, %s4276_s2  }
 0x1a9   :  { %s4108_s1 = scalar_lea.hbm %s5158_s21, 1024 }
 0x1aa   :  { %p4109_p6 = scmp.ne.s32.totalorder %s5158_s21, %s4108_s1  ;;  %p4112_p7 = scmp.lt.u32.totalorder %s4108_s1, %s5158_s21 }
 0x1ac   :  { %p4114_p8 = pnand %p4112_p7, %p4109_p6 }
 0x1ae   :  { %4117 = shalt.err (!%p4114_p8)
}
 0x1af   :  { %s4118_s3 = scalar_lea.vmem %s296_s7, 1024  ;;  %p4123_p10 = scmp.lt.s32.totalorder %s296_s7, %s296_s7 }
 0x1b0   :  { %p4119_p9 = scmp.ne.s32.totalorder %s296_s7, %s4118_s3  ;;  %p4124_p11 = scmp.lt.s32.totalorder %s4118_s3, %s4118_s3 }
 0x1b2   :  { %p4125_p12 = por %p4124_p11, %p4123_p10 }
 0x1b4   :  { %p4126_p13 = pnand %p4125_p12, %p4119_p9 }
 0x1b6   :  { %4129 = shalt.err (!%p4126_p13)
}
 0x1b7   :  { %301 = dma.hbm_to_vmem [thread:$0]  %s5158_s21, 1024, %s296_s7, [#allocation33], %s4275_s9, %s4275_s9, %s4276_s2  }
 0x1b8   :  { %s4295_s5 = smov [#allocation35]   ;;  %s4130_s18 = scalar_lea.hbm %s5159_s22, 1024 }
 0x1b9   :  { %s307_s8 = sshll.u32 %s4295_s5, 4  ;;  %p4131_p0 = scmp.ne.s32.totalorder %s5159_s22, %s4130_s18  ;;  %s308_s8 = int_to_ptr.vmem [resolvable:$true] %s307_s8 }
 0x1ba   :  { %p4134_p1 = scmp.lt.u32.totalorder %s4130_s18, %s5159_s22 }
 0x1bc   :  { %p4136_p2 = pnand %p4134_p1, %p4131_p0 }
 0x1be   :  { %4139 = shalt.err (!%p4136_p2)
}
 0x1bf   :  { %s4140_s13 = scalar_lea.vmem %s308_s8, 1024  ;;  %p4145_p4 = scmp.lt.s32.totalorder %s308_s8, %s308_s8 }
 0x1c0   :  { %p4141_p3 = scmp.ne.s32.totalorder %s308_s8, %s4140_s13  ;;  %p4146_p5 = scmp.lt.s32.totalorder %s4140_s13, %s4140_s13 }
 0x1c2   :  { %p4147_p6 = por %p4146_p5, %p4145_p4 }
 0x1c4   :  { %p4148_p7 = pnand %p4147_p6, %p4141_p3 }
 0x1c6   :  { %4151 = shalt.err (!%p4148_p7)
}
 0x1c7   :  { %313 = dma.hbm_to_vmem [thread:$0]  %s5159_s22, 1024, %s308_s8, [#allocation36], %s4275_s9, %s4275_s9, %s4276_s2  }
 0x1c8   :  { %4240 = dma.done.wait [#allocation3], 256  }
 0x1c9   :  { %4241 = vsyncadd [#allocation3], 4294967040 }
 0x1ca   :  { %4242 = dma.done.wait [#allocation6], 384  }
 0x1cb   :  { %4243 = vsyncadd [#allocation6], 4294966912 }
 0x1cc   :  { %4244 = dma.done.wait [#allocation9], 2048  }
 0x1cd   :  { %4245 = vsyncadd [#allocation9], 4294965248 }
 0x1ce   :  { %4246 = dma.done.wait [#allocation12], 2048  }
 0x1cf   :  { %4247 = vsyncadd [#allocation12], 4294965248 }
 0x1d0   :  { %4248 = dma.done.wait [#allocation15], 2048  }
 0x1d1   :  { %4249 = vsyncadd [#allocation15], 4294965248 }
 0x1d2   :  { %4250 = dma.done.wait [#allocation18], 2048  }
 0x1d3   :  { %4251 = vsyncadd [#allocation18], 4294965248 }
 0x1d4   :  { %4252 = dma.done.wait [#allocation21], 2048  }
 0x1d5   :  { %4253 = vsyncadd [#allocation21], 4294965248 }
 0x1d6   :  { %4254 = dma.done.wait [#allocation24], 2048  }
 0x1d7   :  { %4255 = vsyncadd [#allocation24], 4294965248 }
 0x1d8   :  { %4256 = dma.done.wait [#allocation27], 2048  }
 0x1d9   :  { %4257 = vsyncadd [#allocation27], 4294965248 }
 0x1da   :  { %4258 = dma.done.wait [#allocation30], 2048  }
 0x1db   :  { %4259 = vsyncadd [#allocation30], 4294965248 }
 0x1dc   :  { %4260 = dma.done.wait [#allocation33], 2048  }
 0x1dd   :  { %4261 = vsyncadd [#allocation33], 4294965248 }
 0x1de   :  { %4262 = dma.done.wait [#allocation36], 1024  }
 0x1df   :  { %4263 = vsyncadd [#allocation36], 4294966272  ;;  %v4296_v0 = vmov 0.0   ;;  %vm4297_vm0 = vmmov 0   ;;  %v3506_v1 = vld [vmem:[#allocation10] sm:$0xff]   ;;  %v3508_v3 = vld [vmem:[#allocation10 + $0x8] sm:$0xff]  }
 0x1e0   :  { %3073 = vmatprep.subr.bf16.mxu0 %v4296_v0  ;;  %3093 = vmatprep.subr.bf16.mxu1 %v4296_v0  ;;  %v3507_v2 = vld [vmem:[#allocation8] sm:$0xff]   ;;  %v3509_v4 = vld [vmem:[#allocation8 + $0x8] sm:$0xff]   ;;  %v3510_v5 = vld [vmem:[#allocation10 + $0x10] sm:$0xff]   ;;  %vm4298_vm3 = vmmov 1   ;;  %s4299_s12 = smov [#allocation37]  }
 0x1e1   :  { %3089 = vmatprep.mubr.msk.bf16.mxu0 %vm4297_vm0, %v4296_v0  ;;  %3109 = vmatprep.mubr.msk.bf16.mxu1 %vm4297_vm0, %v4296_v0  ;;  %v3511_v6 = vld [vmem:[#allocation8 + $0x10] sm:$0xff]   ;;  %v3512_v7 = vld [vmem:[#allocation10 + $0x18] sm:$0xff]   ;;  %v3514_v9 = vld [vmem:[#allocation10 + $0x20] sm:$0xff]   ;;  %s2640_s18 = sshll.u32 %s4299_s12, 4  ;;  %s2641_s18 = int_to_ptr.vmem [resolvable:$true] %s2640_s18 }
 0x1e2   :  { %3074 = vmatpush3.bf16.msra.mxu0 %v3506_v1  ;;  %3094 = vmatpush3.bf16.msra.mxu1 %v3507_v2  ;;  %v3513_v8 = vld [vmem:[#allocation8 + $0x18] sm:$0xff]   ;;  %v3515_v10 = vld [vmem:[#allocation8 + $0x20] sm:$0xff]   ;;  %v3516_v11 = vld [vmem:[#allocation10 + $0x28] sm:$0xff]   ;;  %s4152_s26 = scalar_lea.vmem %s2641_s18, 256  ;;  %p4157_p9 = scmp.lt.s32.totalorder %s2641_s18, %s2641_s18 }
 0x1e3   :  { %3075 = vmatprep.subr.bf16.mxu0 %v4296_v0  ;;  %3095 = vmatprep.subr.bf16.mxu1 %v4296_v0  ;;  %v3517_v12 = vld [vmem:[#allocation8 + $0x28] sm:$0xff]   ;;  %v3518_v13 = vld [vmem:[#allocation10 + $0x30] sm:$0xff]   ;;  %v385_v14 = vld [vmem:[#allocation2] sm:$0xff]  ;;  %p4153_p8 = scmp.ne.s32.totalorder %s2641_s18, %s4152_s26  ;;  %p4158_p10 = scmp.lt.s32.totalorder %s4152_s26, %s4152_s26 }
 0x1e4   :  { %v386_v15 = vld [vmem:[#allocation2 + $0x8] sm:$0xff]  ;;  %v3519_v16 = vld [vmem:[#allocation8 + $0x30] sm:$0xff]   ;;  %vm387_vm1 = vweird.f32 %v385_v14  ;;  %v3520_v17 = vld [vmem:[#allocation10 + $0x38] sm:$0xff]  }
 0x1e5   :  { %vm388_vm2 = vweird.f32 %v386_v15  ;;  %v3521_v18 = vld [vmem:[#allocation8 + $0x38] sm:$0xff]   ;;  %vm389_vm4 = vmxor %vm387_vm1, %vm4298_vm3  ;;  %v3523_v20 = vld [vmem:[#allocation25] sm:$0xff]   ;;  %v2728_v21 = vpack.c.bf16 %v386_v15, %v385_v14  ;;  %p4159_p11 = por %p4158_p10, %p4157_p9 }
 0x1e6   :  { %3076 = vmatpush3.bf16.msra.mxu0 %v3508_v3  ;;  %3096 = vmatpush3.bf16.msra.mxu1 %v3509_v4  ;;  %v4792_v19 = vld [vmem:[#allocation7] sm:$0xff]   ;;  %vm390_vm5 = vmxor %vm388_vm2, %vm4298_vm3  ;;  %v3524_v22 = vld [vmem:[#allocation23] sm:$0xff]  }
 0x1e7   :  { %3077 = vmatprep.subr.bf16.mxu0 %v4296_v0  ;;  %3097 = vmatprep.subr.bf16.mxu1 %v4296_v0  ;;  %vm2727_vm6 = vmpackc.low %vm390_vm5, %vm389_vm4  ;;  %v3525_v23 = vld [vmem:[#allocation25 + $0x8] sm:$0xff]   ;;  %v3527_v25 = vld [vmem:[#allocation25 + $0x10] sm:$0xff]   ;;  %p4160_p12 = pnand %p4159_p11, %p4153_p8 }
 0x1e8   :  { %v3526_v24 = vld [vmem:[#allocation23 + $0x8] sm:$0xff]   ;;  %v395_v27 = vld [vmem:[#allocation5 + $0x8] sm:$0xff]  ;;  %v3529_v29 = vld [vmem:[#allocation25 + $0x18] sm:$0xff]  }
 0x1e9   :  { %v394_v26 = vld [vmem:[#allocation5] sm:$0xff]  ;;  %v3528_v28 = vld [vmem:[#allocation23 + $0x10] sm:$0xff]   ;;  %v3530_v30 = vld [vmem:[#allocation23 + $0x18] sm:$0xff]   ;;  %vm397_vm8 = vweird.f32 %v395_v27 }
 0x1ea   :  { %3078 = vmatpush3.bf16.msra.mxu0 %v3510_v5  ;;  %3098 = vmatpush3.bf16.msra.mxu1 %v3511_v6  ;;  %vm396_vm7 = vweird.f32 %v394_v26  ;;  %v3531_v31 = vld [vmem:[#allocation25 + $0x20] sm:$0xff]   ;;  %vm4816_vm10 = vmxor %vm397_vm8, %vm4298_vm3  ;;  %v3533_v35 = vld [vmem:[#allocation25 + $0x28] sm:$0xff]   ;;  %v2748_v42 = vpack.c.bf16 %v395_v27, %v394_v26 }
 0x1eb   :  { %3079 = vmatprep.subr.bf16.mxu0 %v4296_v0  ;;  %3099 = vmatprep.subr.bf16.mxu1 %v4296_v0  ;;  %vm4811_vm9 = vmxor %vm396_vm7, %vm4298_vm3  ;;  %v3532_v34 = vld [vmem:[#allocation23 + $0x20] sm:$0xff]   ;;  %v3534_v36 = vld [vmem:[#allocation23 + $0x28] sm:$0xff]  }
 0x1ec   :  { %v3535_v37 = vld [vmem:[#allocation25 + $0x30] sm:$0xff]   ;;  %vm2747_vm11 = vmpackc.low %vm4816_vm10, %vm4811_vm9  ;;  %v3537_v39 = vld [vmem:[#allocation25 + $0x38] sm:$0xff]  }
 0x1ed   :  { %v3536_v38 = vld [vmem:[#allocation23 + $0x30] sm:$0xff]   ;;  %v3538_v40 = vld [vmem:[#allocation23 + $0x38] sm:$0xff]   ;;  %v3539_v41 = vld [vmem:[#allocation11] sm:$0xff]  }
 0x1ee   :  { %3080 = vmatpush3.bf16.msra.mxu0 %v3512_v7  ;;  %3100 = vmatpush3.bf16.msra.mxu1 %v3513_v8  ;;  %v3540_v43 = vld [vmem:[#allocation11 + $0x8] sm:$0xff]   ;;  %v3541_v44 = vld [vmem:[#allocation11 + $0x10] sm:$0xff]   ;;  %v3542_v45 = vld [vmem:[#allocation11 + $0x18] sm:$0xff]  }
 0x1ef   :  { %3081 = vmatprep.subr.bf16.mxu0 %v4296_v0  ;;  %3101 = vmatprep.subr.bf16.mxu1 %v4296_v0  ;;  %v3543_v46 = vld [vmem:[#allocation11 + $0x20] sm:$0xff]   ;;  %v3544_v47 = vld [vmem:[#allocation11 + $0x28] sm:$0xff]   ;;  %v3545_v48 = vld [vmem:[#allocation11 + $0x30] sm:$0xff]  }
 0x1f0   :  { %v3546_v49 = vld [vmem:[#allocation11 + $0x38] sm:$0xff]   ;;  %v3547_v50 = vld [vmem:[#allocation26] sm:$0xff]   ;;  %v3548_v51 = vld [vmem:[#allocation26 + $0x8] sm:$0xff]  }
 0x1f1   :  { %v3549_v52 = vld [vmem:[#allocation26 + $0x10] sm:$0xff]   ;;  %v3550_v53 = vld [vmem:[#allocation26 + $0x18] sm:$0xff]   ;;  %v3551_v54 = vld [vmem:[#allocation26 + $0x20] sm:$0xff]  }
 0x1f2   :  { %3082 = vmatpush3.bf16.msra.mxu0 %v3514_v9  ;;  %3102 = vmatpush3.bf16.msra.mxu1 %v3515_v10  ;;  %v3552_v55 = vld [vmem:[#allocation26 + $0x28] sm:$0xff]   ;;  %v3553_v56 = vld [vmem:[#allocation26 + $0x30] sm:$0xff]   ;;  %v3554_v57 = vld [vmem:[#allocation26 + $0x38] sm:$0xff]  }
 0x1f3   :  { %3083 = vmatprep.subr.bf16.mxu0 %v4296_v0  ;;  %3103 = vmatprep.subr.bf16.mxu1 %v4296_v0  ;;  %v2730_v60 = vld [vmem:[%s5160_s23] ss:$0 sm:$0xff]  ;;  %v3555_v10 = vld [vmem:[#allocation13] sm:$0xff]   ;;  %v3561_v33 = vld [vmem:[#allocation13 + $0x30] sm:$0xff]  }
 0x1f4   :  { %v3558_v14 = vld [vmem:[#allocation13 + $0x18] sm:$0xff]   ;;  %v3559_v15 = vld [vmem:[#allocation13 + $0x20] sm:$0xff]  }
 0x1f6   :  { %3084 = vmatpush3.bf16.msra.mxu0 %v3516_v11  ;;  %3104 = vmatpush3.bf16.msra.mxu1 %v3517_v12  ;;  %v3556_v12 = vld [vmem:[#allocation13 + $0x8] sm:$0xff]  }
 0x1f7   :  { %3085 = vmatprep.subr.bf16.mxu0 %v4296_v0  ;;  %3105 = vmatprep.subr.bf16.mxu1 %v4296_v0 }
 0x1fa   :  { %3086 = vmatpush3.bf16.msra.mxu0 %v3518_v13  ;;  %3106 = vmatpush3.bf16.msra.mxu1 %v3519_v16  ;;  %v3557_v13 = vld [vmem:[#allocation13 + $0x10] sm:$0xff]   ;;  %v3560_v16 = vld [vmem:[#allocation13 + $0x28] sm:$0xff]  }
 0x1fb   :  { %3087 = vmatprep.subr.bf16.mxu0 %v4296_v0  ;;  %3107 = vmatprep.subr.bf16.mxu1 %v4296_v0 }
 0x1fe   :  { %3088 = vmatpush3.bf16.msra.mxu0 %v3520_v17  ;;  %3108 = vmatpush3.bf16.msra.mxu1 %v3521_v18 }
 0x1ff   :  { %3113 = vmatprep.subr.bf16.mxu0 %v4296_v0  ;;  %3133 = vmatprep.subr.bf16.mxu1 %v4296_v0 }
 0x201   :  { %3090 = vmatmul.mubr.bf16.vlgmr.msra.gmra.mrb[0].mxu0 %v4792_v19  ;;  %3110 = vmatmul.mubr.msk.bf16.vlgmr.msra.gmra.mrb[0].mxu1 %vm2727_vm6, %v2728_v21 }
 0x202   :  { %3114 = vmatpush3.bf16.msra.mxu0 %v3523_v20  ;;  %3134 = vmatpush3.bf16.msra.mxu1 %v3524_v22 }
 0x203   :  { %3115 = vmatprep.subr.bf16.mxu0 %v4296_v0  ;;  %3135 = vmatprep.subr.bf16.mxu1 %v4296_v0 }
 0x204   :  { %3129 = vmatprep.mubr.msk.bf16.mxu0 %vm4297_vm0, %v4296_v0  ;;  %3149 = vmatprep.mubr.msk.bf16.mxu1 %vm4297_vm0, %v4296_v0 }
 0x206   :  { %3116 = vmatpush3.bf16.msra.mxu0 %v3525_v23  ;;  %3136 = vmatpush3.bf16.msra.mxu1 %v3526_v24 }
 0x207   :  { %3117 = vmatprep.subr.bf16.mxu0 %v4296_v0  ;;  %3137 = vmatprep.subr.bf16.mxu1 %v4296_v0 }
 0x20a   :  { %3118 = vmatpush3.bf16.msra.mxu0 %v3527_v25  ;;  %3138 = vmatpush3.bf16.msra.mxu1 %v3528_v28 }
 0x20b   :  { %3119 = vmatprep.subr.bf16.mxu0 %v4296_v0  ;;  %3139 = vmatprep.subr.bf16.mxu1 %v4296_v0 }
 0x20e   :  { %3120 = vmatpush3.bf16.msra.mxu0 %v3529_v29  ;;  %3140 = vmatpush3.bf16.msra.mxu1 %v3530_v30 }
 0x20f   :  { %3121 = vmatprep.subr.bf16.mxu0 %v4296_v0  ;;  %3141 = vmatprep.subr.bf16.mxu1 %v4296_v0 }
 0x212   :  { %3122 = vmatpush3.bf16.msra.mxu0 %v3531_v31  ;;  %3142 = vmatpush3.bf16.msra.mxu1 %v3532_v34  ;;  %v3562_v34 = vld [vmem:[#allocation13 + $0x38] sm:$0xff]  }
 0x213   :  { %3123 = vmatprep.subr.bf16.mxu0 %v4296_v0  ;;  %3143 = vmatprep.subr.bf16.mxu1 %v4296_v0 }
 0x216   :  { %3124 = vmatpush3.bf16.msra.mxu0 %v3533_v35  ;;  %3144 = vmatpush3.bf16.msra.mxu1 %v3534_v36  ;;  %v3563_v35 = vld [vmem:[#allocation28] sm:$0xff]   ;;  %v3564_v36 = vld [vmem:[#allocation28 + $0x8] sm:$0xff]  }
 0x217   :  { %3125 = vmatprep.subr.bf16.mxu0 %v4296_v0  ;;  %3145 = vmatprep.subr.bf16.mxu1 %v4296_v0 }
 0x21a   :  { %3126 = vmatpush3.bf16.msra.mxu0 %v3535_v37  ;;  %3146 = vmatpush3.bf16.msra.mxu1 %v3536_v38  ;;  %v3565_v37 = vld [vmem:[#allocation28 + $0x10] sm:$0xff]   ;;  %v3566_v38 = vld [vmem:[#allocation28 + $0x18] sm:$0xff]  }
 0x21b   :  { %3127 = vmatprep.subr.bf16.mxu0 %v4296_v0  ;;  %3147 = vmatprep.subr.bf16.mxu1 %v4296_v0 }
 0x21e   :  { %3128 = vmatpush3.bf16.msra.mxu0 %v3537_v39  ;;  %3148 = vmatpush3.bf16.msra.mxu1 %v3538_v40  ;;  %v3567_v39 = vld [vmem:[#allocation28 + $0x20] sm:$0xff]   ;;  %v3568_v40 = vld [vmem:[#allocation28 + $0x28] sm:$0xff]  }
 0x21f   :  { %3153 = vmatprep.subr.bf16.mxu0 %v4296_v0  ;;  %3173 = vmatprep.subr.bf16.mxu1 %v4296_v0 }
 0x221   :  { %3130 = vmatmul.mubr.bf16.vlgmr.msra.gmra.mrb[4].mxu0 %v4792_v19  ;;  %3150 = vmatmul.mubr.msk.bf16.vlgmr.msra.gmra.mrb[4].mxu1 %vm2747_vm11, %v2748_v42  ;;  %v2750_v19 = vld [vmem:[%s5160_s23 + $0x8] ss:$0 sm:$0xff]  ;;  %v3570_v42 = vld [vmem:[#allocation28 + $0x38] sm:$0xff]  }
 0x222   :  { %3154 = vmatpush3.bf16.msra.mxu0 %v3539_v41  ;;  %3169 = vmatprep.mubr.msk.bf16.mxu0 %vm4297_vm0, %v4296_v0  ;;  %v3569_v41 = vld [vmem:[#allocation28 + $0x30] sm:$0xff]  }
 0x223   :  { %3155 = vmatprep.subr.bf16.mxu0 %v4296_v0  ;;  %3189 = vmatprep.mubr.msk.bf16.mxu1 %vm4297_vm0, %v4296_v0 }
 0x224   :  { %3174 = vmatpush3.bf16.msra.mxu1 %v3547_v50 }
 0x225   :  { %3175 = vmatprep.subr.bf16.mxu1 %v4296_v0 }
 0x226   :  { %3156 = vmatpush3.bf16.msra.mxu0 %v3540_v43  ;;  %v2751_v43 = vld [vmem:[%s5160_s23 + $0x1] ss:$0 sm:$0xff] }
 0x227   :  { %3157 = vmatprep.subr.bf16.mxu0 %v4296_v0 }
 0x228   :  { %3176 = vmatpush3.bf16.msra.mxu1 %v3548_v51 }
 0x229   :  { %3177 = vmatprep.subr.bf16.mxu1 %v4296_v0 }
 0x22a   :  { %3158 = vmatpush3.bf16.msra.mxu0 %v3541_v44 }
 0x22b   :  { %3159 = vmatprep.subr.bf16.mxu0 %v4296_v0 }
 0x22c   :  { %3178 = vmatpush3.bf16.msra.mxu1 %v3549_v52  ;;  %v3571_v52 = vld [vmem:[#allocation14] sm:$0xff]  }
 0x22d   :  { %3179 = vmatprep.subr.bf16.mxu1 %v4296_v0 }
 0x22e   :  { %3160 = vmatpush3.bf16.msra.mxu0 %v3542_v45 }
 0x22f   :  { %3161 = vmatprep.subr.bf16.mxu0 %v4296_v0 }
 0x230   :  { %3180 = vmatpush3.bf16.msra.mxu1 %v3550_v53 }
 0x231   :  { %3181 = vmatprep.subr.bf16.mxu1 %v4296_v0 }
 0x232   :  { %3162 = vmatpush3.bf16.msra.mxu0 %v3543_v46 }
 0x233   :  { %3163 = vmatprep.subr.bf16.mxu0 %v4296_v0 }
 0x234   :  { %3182 = vmatpush3.bf16.msra.mxu1 %v3551_v54  ;;  %v3572_v54 = vld [vmem:[#allocation14 + $0x8] sm:$0xff]  }
 0x235   :  { %3183 = vmatprep.subr.bf16.mxu1 %v4296_v0 }
 0x236   :  { %3164 = vmatpush3.bf16.msra.mxu0 %v3544_v47 }
 0x237   :  { %3165 = vmatprep.subr.bf16.mxu0 %v4296_v0 }
 0x238   :  { %3184 = vmatpush3.bf16.msra.mxu1 %v3552_v55  ;;  %v3573_v55 = vld [vmem:[#allocation14 + $0x10] sm:$0xff]  }
 0x239   :  { %3185 = vmatprep.subr.bf16.mxu1 %v4296_v0 }
 0x23a   :  { %3166 = vmatpush3.bf16.msra.mxu0 %v3545_v48 }
 0x23b   :  { %3167 = vmatprep.subr.bf16.mxu0 %v4296_v0 }
 0x23c   :  { %3186 = vmatpush3.bf16.msra.mxu1 %v3553_v56  ;;  %v3574_v56 = vld [vmem:[#allocation14 + $0x18] sm:$0xff]  }
 0x23d   :  { %3187 = vmatprep.subr.bf16.mxu1 %v4296_v0 }
 0x23e   :  { %3168 = vmatpush3.bf16.msra.mxu0 %v3546_v49 }
 0x23f   :  { %3193 = vmatprep.subr.bf16.mxu0 %v4296_v0 }
 0x240   :  { %3188 = vmatpush3.bf16.msra.mxu1 %v3554_v57  ;;  %v3575_v57 = vld [vmem:[#allocation14 + $0x20] sm:$0xff]  }
 0x241   :  { %3213 = vmatprep.subr.bf16.mxu1 %v4296_v0 }
 0x2d4   :  { %v523_v58 = vpop.f32.mrb[0].mxu0  ;;  %v612_v59 = vpop.f32.mrb[0].mxu1 }
 0x2d5   :  { %v3091_v61 = vpop.f32.mrb[1].mxu0  ;;  %v613_v62 = vadd.f32 %v612_v59, %v523_v58  ;;  %v3111_v63 = vpop.f32.mrb[1].mxu1  ;;  %v3576_v58 = vld [vmem:[#allocation14 + $0x28] sm:$0xff]   ;;  %v2760_v59 = vld [vmem:[%s5160_s23 + $0x9] ss:$0 sm:$0xff] }
 0x2d6   :  { %v526_v1 = vpop.f32.mrb[2].mxu0  ;;  %v615_v2 = vpop.f32.mrb[2].mxu1 }
 0x2d7   :  { %v3092_v3 = vpop.f32.mrb[3].mxu0  ;;  %v624_v4 = vadd.f32 %v2730_v60, %v613_v62  ;;  %v616_v5 = vadd.f32 %v615_v2, %v526_v1  ;;  %v3112_v6 = vpop.f32.mrb[3].mxu1 }
 0x2d8   :  { %v3577_v6 = vld [vmem:[#allocation14 + $0x30] sm:$0xff]  }
 0x2d9   :  { %v626_v7 = vmax.f32 %v624_v4, 0.0  ;;  %v625_v8 = vadd.f32 %v2730_v60, %v616_v5 }
 0x2db   :  { %v627_v9 = vmax.f32 %v625_v8, 0.0  ;;  %v3579_v8 = vld [vmem:[%s5154_s17] sm:$0xff]  }
 0x2dd   :  { %v628_v11 = vpack.c.bf16 %v627_v9, %v626_v7  ;;  %v3578_v7 = vld [vmem:[#allocation14 + $0x38] sm:$0xff]   ;;  %v3580_v9 = vld [vmem:[%s5154_s17 + $0x8] sm:$0xff]  }
 0x2df   :  { %3170 = vmatmul.mubr.bf16.vlgmr.msra.gmra.mrb[8].mxu0 %v628_v11  ;;  %v3582_v11 = vld [vmem:[%s5154_s17 + $0x18] sm:$0xff]  }
 0x2e0   :  { %3194 = vmatpush3.bf16.msra.mxu0 %v3555_v10  ;;  %3209 = vmatprep.mubr.msk.bf16.mxu0 %vm4297_vm0, %v4296_v0  ;;  %v3581_v10 = vld [vmem:[%s5154_s17 + $0x10] sm:$0xff]  }
 0x2e1   :  { %3195 = vmatprep.subr.bf16.mxu0 %v4296_v0 }
 0x2e4   :  { %3196 = vmatpush3.bf16.msra.mxu0 %v3556_v12  ;;  %v3583_v12 = vld [vmem:[%s5154_s17 + $0x20] sm:$0xff]  }
 0x2e5   :  { %3197 = vmatprep.subr.bf16.mxu0 %v4296_v0 }
 0x2e8   :  { %3198 = vmatpush3.bf16.msra.mxu0 %v3557_v13  ;;  %v3584_v13 = vld [vmem:[%s5154_s17 + $0x28] sm:$0xff]  }
 0x2e9   :  { %3199 = vmatprep.subr.bf16.mxu0 %v4296_v0 }
 0x2ec   :  { %3200 = vmatpush3.bf16.msra.mxu0 %v3558_v14  ;;  %v3585_v14 = vld [vmem:[%s5154_s17 + $0x30] sm:$0xff]  }
 0x2ed   :  { %3201 = vmatprep.subr.bf16.mxu0 %v4296_v0 }
 0x2f0   :  { %3202 = vmatpush3.bf16.msra.mxu0 %v3559_v15  ;;  %v3586_v15 = vld [vmem:[%s5154_s17 + $0x38] sm:$0xff]  }
 0x2f1   :  { %3203 = vmatprep.subr.bf16.mxu0 %v4296_v0 }
 0x2f4   :  { %v743_v17 = vpop.f32.mrb[4].mxu0  ;;  %v832_v18 = vpop.f32.mrb[4].mxu1  ;;  %3204 = vmatpush3.bf16.msra.mxu0 %v3560_v16  ;;  %v2769_v16 = vld [vmem:[%s5160_s23 + $0x2] ss:$0 sm:$0xff] }
 0x2f5   :  { %v3131_v20 = vpop.f32.mrb[5].mxu0  ;;  %v833_v21 = vadd.f32 %v832_v18, %v743_v17  ;;  %v3151_v22 = vpop.f32.mrb[5].mxu1  ;;  %3205 = vmatprep.subr.bf16.mxu0 %v4296_v0 }
 0x2f6   :  { %v746_v23 = vpop.f32.mrb[6].mxu0  ;;  %v835_v24 = vpop.f32.mrb[6].mxu1 }
 0x2f7   :  { %v3132_v25 = vpop.f32.mrb[7].mxu0  ;;  %v844_v26 = vadd.f32 %v2750_v19, %v833_v21  ;;  %v836_v27 = vadd.f32 %v835_v24, %v746_v23  ;;  %v3152_v28 = vpop.f32.mrb[7].mxu1  ;;  %v3587_v23 = vld [vmem:[#allocation17] sm:$0xff]  }
 0x2f8   :  { %3206 = vmatpush3.bf16.msra.mxu0 %v3561_v33  ;;  %v3589_v25 = vld [vmem:[#allocation17 + $0x8] sm:$0xff]   ;;  %v3595_v28 = vld [vmem:[#allocation17 + $0x20] sm:$0xff]  }
 0x2f9   :  { %v845_v29 = vadd.f32 %v2750_v19, %v836_v27  ;;  %v846_v30 = vmax.f32 %v844_v26, 0.0  ;;  %3207 = vmatprep.subr.bf16.mxu0 %v4296_v0  ;;  %v3591_v26 = vld [vmem:[#allocation17 + $0x10] sm:$0xff]   ;;  %v3593_v27 = vld [vmem:[#allocation17 + $0x18] sm:$0xff]  }
 0x2fb   :  { %v847_v31 = vmax.f32 %v845_v29, 0.0  ;;  %v3597_v29 = vld [vmem:[#allocation17 + $0x28] sm:$0xff]  }
 0x2fc   :  { %3208 = vmatpush3.bf16.msra.mxu0 %v3562_v34 }
 0x2fd   :  { %v848_v32 = vpack.c.bf16 %v847_v31, %v846_v30  ;;  %3233 = vmatprep.subr.bf16.mxu0 %v4296_v0  ;;  %v3599_v30 = vld [vmem:[#allocation17 + $0x30] sm:$0xff]   ;;  %v2778_v31 = vld [vmem:[%s5160_s23 + $0xa] ss:$0 sm:$0xff] }
 0x2ff   :  { %3190 = vmatmul.mubr.bf16.vlgmr.msra.gmra.mrb[8].mxu1 %v848_v32 }
 0x300   :  { %3229 = vmatprep.mubr.msk.bf16.mxu1 %vm4297_vm0, %v4296_v0  ;;  %3214 = vmatpush3.bf16.msra.mxu1 %v3563_v35 }
 0x301   :  { %3215 = vmatprep.subr.bf16.mxu1 %v4296_v0 }
 0x304   :  { %3216 = vmatpush3.bf16.msra.mxu1 %v3564_v36 }
 0x305   :  { %3217 = vmatprep.subr.bf16.mxu1 %v4296_v0 }
 0x308   :  { %3218 = vmatpush3.bf16.msra.mxu1 %v3565_v37 }
 0x309   :  { %3219 = vmatprep.subr.bf16.mxu1 %v4296_v0 }
 0x30c   :  { %3220 = vmatpush3.bf16.msra.mxu1 %v3566_v38  ;;  %v3588_v38 = vld [vmem:[#allocation16] sm:$0xff]  }
 0x30d   :  { %3221 = vmatprep.subr.bf16.mxu1 %v4296_v0 }
 0x310   :  { %3222 = vmatpush3.bf16.msra.mxu1 %v3567_v39 }
 0x311   :  { %3223 = vmatprep.subr.bf16.mxu1 %v4296_v0 }
 0x314   :  { %3224 = vmatpush3.bf16.msra.mxu1 %v3568_v40  ;;  %v3590_v40 = vld [vmem:[#allocation16 + $0x8] sm:$0xff]  }
 0x315   :  { %3225 = vmatprep.subr.bf16.mxu1 %v4296_v0 }
 0x318   :  { %3226 = vmatpush3.bf16.msra.mxu1 %v3569_v41  ;;  %v3592_v41 = vld [vmem:[#allocation16 + $0x10] sm:$0xff]  }
 0x319   :  { %3227 = vmatprep.subr.bf16.mxu1 %v4296_v0 }
 0x31c   :  { %3228 = vmatpush3.bf16.msra.mxu1 %v3570_v42  ;;  %v3594_v42 = vld [vmem:[#allocation16 + $0x18] sm:$0xff]  }
 0x31d   :  { %3253 = vmatprep.subr.bf16.mxu1 %v4296_v0 }
 0x3b2   :  { %v952_v44 = vpop.f32.mrb[8].mxu0 }
 0x3b3   :  { %v953_v45 = vadd.f32 %v2751_v43, %v952_v44  ;;  %v3171_v46 = vpop.f32.mrb[9].mxu0  ;;  %v3598_v44 = vld [vmem:[#allocation16 + $0x28] sm:$0xff]  }
 0x3b4   :  { %v955_v47 = vpop.f32.mrb[10].mxu0  ;;  %v3601_v46 = vld [vmem:[#allocation17 + $0x38] sm:$0xff]  }
 0x3b5   :  { %v956_v48 = vadd.f32 %v2751_v43, %v955_v47  ;;  %v3172_v49 = vpop.f32.mrb[11].mxu0  ;;  %v959_v50 = vmax.f32 %v953_v45, 0.0  ;;  %v3596_v43 = vld [vmem:[#allocation16 + $0x20] sm:$0xff]   ;;  %v3600_v45 = vld [vmem:[#allocation16 + $0x30] sm:$0xff]   ;;  %v3602_v47 = vld [vmem:[#allocation16 + $0x38] sm:$0xff]  }
 0x3b6   :  { %v3667_v49 = vld [vmem:[#allocation7] sm:$0xff]  }
 0x3b7   :  { %v960_v51 = vmax.f32 %v956_v48, 0.0  ;;  %v3603_v48 = vld [vmem:[#allocation31] sm:$0xff]  }
 0x3b9   :  { %v961_v53 = vpack.c.bf16 %v960_v51, %v959_v50  ;;  %v3605_v50 = vld [vmem:[#allocation31 + $0x8] sm:$0xff]   ;;  %v3607_v51 = vld [vmem:[#allocation31 + $0x10] sm:$0xff]  }
 0x3bb   :  { %3210 = vmatmul.mubr.bf16.vlgmr.msra.gmra.mrb[12].mxu0 %v961_v53  ;;  %v3611_v53 = vld [vmem:[#allocation31 + $0x20] sm:$0xff]  }
 0x3bc   :  { %3234 = vmatpush3.bf16.msra.mxu0 %v3571_v52  ;;  %3249 = vmatprep.mubr.msk.bf16.mxu0 %vm4297_vm0, %v4296_v0  ;;  %v3609_v52 = vld [vmem:[#allocation31 + $0x18] sm:$0xff]  }
 0x3bd   :  { %3235 = vmatprep.subr.bf16.mxu0 %v4296_v0 }
 0x3c0   :  { %3236 = vmatpush3.bf16.msra.mxu0 %v3572_v54  ;;  %v3613_v54 = vld [vmem:[#allocation31 + $0x28] sm:$0xff]  }
 0x3c1   :  { %3237 = vmatprep.subr.bf16.mxu0 %v4296_v0 }
 0x3c4   :  { %3238 = vmatpush3.bf16.msra.mxu0 %v3573_v55  ;;  %v3615_v55 = vld [vmem:[#allocation31 + $0x30] sm:$0xff]  }
 0x3c5   :  { %3239 = vmatprep.subr.bf16.mxu0 %v4296_v0 }
 0x3c8   :  { %3240 = vmatpush3.bf16.msra.mxu0 %v3574_v56  ;;  %v3617_v56 = vld [vmem:[#allocation31 + $0x38] sm:$0xff]  }
 0x3c9   :  { %3241 = vmatprep.subr.bf16.mxu0 %v4296_v0 }
 0x3cc   :  { %3242 = vmatpush3.bf16.msra.mxu0 %v3575_v57  ;;  %v3619_v57 = vld [vmem:[#allocation19] sm:$0xff]  }
 0x3cd   :  { %3243 = vmatprep.subr.bf16.mxu0 %v4296_v0 }
 0x3d0   :  { %3244 = vmatpush3.bf16.msra.mxu0 %v3576_v58  ;;  %v3620_v58 = vld [vmem:[#allocation19 + $0x8] sm:$0xff]  }
 0x3d1   :  { %3245 = vmatprep.subr.bf16.mxu0 %v4296_v0 }
 0x3d2   :  { %v1065_v60 = vpop.f32.mrb[8].mxu1 }
 0x3d3   :  { %v1066_v61 = vadd.f32 %v2760_v59, %v1065_v60  ;;  %v3191_v62 = vpop.f32.mrb[9].mxu1  ;;  %v3622_v60 = vld [vmem:[#allocation19 + $0x18] sm:$0xff]  }
 0x3d4   :  { %v1068_v63 = vpop.f32.mrb[10].mxu1  ;;  %3246 = vmatpush3.bf16.msra.mxu0 %v3577_v6  ;;  %v2787_v62 = vld [vmem:[%s5160_s23 + $0x3] ss:$0 sm:$0xff]  ;;  %v3604_v6 = vld [vmem:[#allocation29] sm:$0xff]  }
 0x3d5   :  { %v1069_v1 = vadd.f32 %v2760_v59, %v1068_v63  ;;  %v3192_v2 = vpop.f32.mrb[11].mxu1  ;;  %v1072_v3 = vmax.f32 %v1066_v61, 0.0  ;;  %3247 = vmatprep.subr.bf16.mxu0 %v4296_v0  ;;  %v3621_v59 = vld [vmem:[#allocation19 + $0x10] sm:$0xff]   ;;  %v3623_v61 = vld [vmem:[#allocation19 + $0x20] sm:$0xff]  }
 0x3d7   :  { %v1073_v4 = vmax.f32 %v1069_v1, 0.0 }
 0x3d8   :  { %3248 = vmatpush3.bf16.msra.mxu0 %v3578_v7 }
 0x3d9   :  { %v1074_v5 = vpack.c.bf16 %v1073_v4, %v1072_v3  ;;  %3273 = vmatprep.subr.bf16.mxu0 %v4296_v0 }
 0x3db   :  { %3230 = vmatmul.mubr.bf16.vlgmr.msra.gmra.mrb[12].mxu1 %v1074_v5 }
 0x3dc   :  { %3269 = vmatprep.mubr.msk.bf16.mxu1 %vm4297_vm0, %v4296_v0  ;;  %3254 = vmatpush3.bf16.msra.mxu1 %v3579_v8  ;;  %v3606_v8 = vld [vmem:[#allocation29 + $0x8] sm:$0xff]  }
 0x3dd   :  { %3255 = vmatprep.subr.bf16.mxu1 %v4296_v0 }
 0x3e0   :  { %3256 = vmatpush3.bf16.msra.mxu1 %v3580_v9  ;;  %v3608_v9 = vld [vmem:[#allocation29 + $0x10] sm:$0xff]  }
 0x3e1   :  { %3257 = vmatprep.subr.bf16.mxu1 %v4296_v0 }
 0x3e4   :  { %3258 = vmatpush3.bf16.msra.mxu1 %v3581_v10  ;;  %v3610_v10 = vld [vmem:[#allocation29 + $0x18] sm:$0xff]  }
 0x3e5   :  { %3259 = vmatprep.subr.bf16.mxu1 %v4296_v0 }
 0x3e8   :  { %3260 = vmatpush3.bf16.msra.mxu1 %v3582_v11  ;;  %v3612_v11 = vld [vmem:[#allocation29 + $0x20] sm:$0xff]  }
 0x3e9   :  { %3261 = vmatprep.subr.bf16.mxu1 %v4296_v0 }
 0x3ec   :  { %3262 = vmatpush3.bf16.msra.mxu1 %v3583_v12  ;;  %v3614_v12 = vld [vmem:[#allocation29 + $0x28] sm:$0xff]  }
 0x3ed   :  { %3263 = vmatprep.subr.bf16.mxu1 %v4296_v0 }
 0x3f0   :  { %3264 = vmatpush3.bf16.msra.mxu1 %v3584_v13  ;;  %v3616_v13 = vld [vmem:[#allocation29 + $0x30] sm:$0xff]  }
 0x3f1   :  { %3265 = vmatprep.subr.bf16.mxu1 %v4296_v0 }
 0x3f4   :  { %3266 = vmatpush3.bf16.msra.mxu1 %v3585_v14  ;;  %v2796_v14 = vld [vmem:[%s5160_s23 + $0xb] ss:$0 sm:$0xff] }
 0x3f5   :  { %3267 = vmatprep.subr.bf16.mxu1 %v4296_v0 }
 0x3f8   :  { %3268 = vmatpush3.bf16.msra.mxu1 %v3586_v15 }
 0x3f9   :  { %3293 = vmatprep.subr.bf16.mxu1 %v4296_v0 }
 0x48e   :  { %v1178_v17 = vpop.f32.mrb[12].mxu0 }
 0x48f   :  { %v3211_v18 = vpop.f32.mrb[13].mxu0  ;;  %v1179_v20 = vadd.f32 %v2769_v16, %v1178_v17 }
 0x490   :  { %v1181_v19 = vpop.f32.mrb[14].mxu0 }
 0x491   :  { %v1182_v21 = vadd.f32 %v2769_v16, %v1181_v19  ;;  %v3212_v22 = vpop.f32.mrb[15].mxu0  ;;  %v3618_v16 = vld [vmem:[#allocation29 + $0x38] sm:$0xff]  }
 0x493   :  { %v1185_v24 = vpack.c.bf16 %v1182_v21, %v1179_v20 }
 0x495   :  { %3250 = vmatmul.mubr.bf16.vlgmr.msra.gmra.mrb[16].mxu0 %v1185_v24 }
 0x496   :  { %3274 = vmatpush3.bf16.msra.mxu0 %v3587_v23  ;;  %3289 = vmatprep.mubr.msk.bf16.mxu0 %vm4297_vm0, %v4296_v0 }
 0x497   :  { %3275 = vmatprep.subr.bf16.mxu0 %v4296_v0 }
 0x49a   :  { %3276 = vmatpush3.bf16.msra.mxu0 %v3589_v25  ;;  %v3624_v25 = vld [vmem:[#allocation19 + $0x28] sm:$0xff]  }
 0x49b   :  { %3277 = vmatprep.subr.bf16.mxu0 %v4296_v0 }
 0x49e   :  { %3278 = vmatpush3.bf16.msra.mxu0 %v3591_v26 }
 0x49f   :  { %3279 = vmatprep.subr.bf16.mxu0 %v4296_v0 }
 0x4a2   :  { %3280 = vmatpush3.bf16.msra.mxu0 %v3593_v27 }
 0x4a3   :  { %3281 = vmatprep.subr.bf16.mxu0 %v4296_v0 }
 0x4a6   :  { %3282 = vmatpush3.bf16.msra.mxu0 %v3595_v28  ;;  %v3625_v28 = vld [vmem:[#allocation19 + $0x30] sm:$0xff]  }
 0x4a7   :  { %3283 = vmatprep.subr.bf16.mxu0 %v4296_v0 }
 0x4aa   :  { %3284 = vmatpush3.bf16.msra.mxu0 %v3597_v29  ;;  %v3626_v29 = vld [vmem:[#allocation19 + $0x38] sm:$0xff]  }
 0x4ab   :  { %3285 = vmatprep.subr.bf16.mxu0 %v4296_v0 }
 0x4ae   :  { %v1289_v32 = vpop.f32.mrb[12].mxu1  ;;  %3286 = vmatpush3.bf16.msra.mxu0 %v3599_v30  ;;  %v3627_v30 = vld [vmem:[#allocation32] sm:$0xff]  }
 0x4af   :  { %v3231_v33 = vpop.f32.mrb[13].mxu1  ;;  %3287 = vmatprep.subr.bf16.mxu0 %v4296_v0  ;;  %v1290_v35 = vadd.f32 %v2778_v31, %v1289_v32  ;;  %v3629_v32 = vld [vmem:[#allocation32 + $0x10] sm:$0xff]  }
 0x4b0   :  { %v1292_v34 = vpop.f32.mrb[14].mxu1  ;;  %v3630_v33 = vld [vmem:[#allocation32 + $0x18] sm:$0xff]  }
 0x4b1   :  { %v1293_v36 = vadd.f32 %v2778_v31, %v1292_v34  ;;  %v3232_v37 = vpop.f32.mrb[15].mxu1  ;;  %v3628_v31 = vld [vmem:[#allocation32 + $0x8] sm:$0xff]   ;;  %v3631_v34 = vld [vmem:[#allocation32 + $0x20] sm:$0xff]  }
 0x4b2   :  { %3288 = vmatpush3.bf16.msra.mxu0 %v3601_v46  ;;  %v3632_v37 = vld [vmem:[#allocation32 + $0x28] sm:$0xff]  }
 0x4b3   :  { %v1296_v39 = vpack.c.bf16 %v1293_v36, %v1290_v35  ;;  %3313 = vmatprep.subr.bf16.mxu0 %v4296_v0 }
 0x4b5   :  { %3270 = vmatmul.mubr.bf16.vlgmr.msra.gmra.mrb[16].mxu1 %v1296_v39  ;;  %3290 = vmatmul.mubr.bf16.vlgmr.msra.gmra.mrb[20].mxu0 %v3667_v49 }
 0x4b6   :  { %3294 = vmatpush3.bf16.msra.mxu1 %v3588_v38  ;;  %3309 = vmatprep.mubr.msk.bf16.mxu1 %vm4297_vm0, %v4296_v0 }
 0x4b7   :  { %3295 = vmatprep.subr.bf16.mxu1 %v4296_v0  ;;  %3314 = vmatpush3.bf16.msra.mxu0 %v3603_v48 }
 0x4b8   :  { %3315 = vmatprep.subr.bf16.mxu0 %v4296_v0  ;;  %3329 = vmatprep.mubr.msk.bf16.mxu0 %vm4297_vm0, %v4296_v0 }
 0x4ba   :  { %3296 = vmatpush3.bf16.msra.mxu1 %v3590_v40  ;;  %v3633_v40 = vld [vmem:[#allocation32 + $0x30] sm:$0xff]  }
 0x4bb   :  { %3297 = vmatprep.subr.bf16.mxu1 %v4296_v0  ;;  %3316 = vmatpush3.bf16.msra.mxu0 %v3605_v50 }
 0x4bc   :  { %3317 = vmatprep.subr.bf16.mxu0 %v4296_v0 }
 0x4be   :  { %3298 = vmatpush3.bf16.msra.mxu1 %v3592_v41  ;;  %v3634_v41 = vld [vmem:[#allocation32 + $0x38] sm:$0xff]  }
 0x4bf   :  { %3299 = vmatprep.subr.bf16.mxu1 %v4296_v0  ;;  %3318 = vmatpush3.bf16.msra.mxu0 %v3607_v51 }
 0x4c0   :  { %3319 = vmatprep.subr.bf16.mxu0 %v4296_v0 }
 0x4c2   :  { %3300 = vmatpush3.bf16.msra.mxu1 %v3594_v42 }
 0x4c3   :  { %3301 = vmatprep.subr.bf16.mxu1 %v4296_v0  ;;  %3320 = vmatpush3.bf16.msra.mxu0 %v3609_v52 }
 0x4c4   :  { %3321 = vmatprep.subr.bf16.mxu0 %v4296_v0 }
 0x4c6   :  { %3302 = vmatpush3.bf16.msra.mxu1 %v3596_v43  ;;  %v2821_v43 = vld [vmem:[%s5160_s23 + $0x4] ss:$0 sm:$0xff] }
 0x4c7   :  { %3303 = vmatprep.subr.bf16.mxu1 %v4296_v0  ;;  %3322 = vmatpush3.bf16.msra.mxu0 %v3611_v53  ;;  %v3635_v53 = vld [vmem:[#allocation20] sm:$0xff]  }
 0x4c8   :  { %3323 = vmatprep.subr.bf16.mxu0 %v4296_v0 }
 0x4ca   :  { %3304 = vmatpush3.bf16.msra.mxu1 %v3598_v44 }
 0x4cb   :  { %3305 = vmatprep.subr.bf16.mxu1 %v4296_v0  ;;  %3324 = vmatpush3.bf16.msra.mxu0 %v3613_v54 }
 0x4cc   :  { %3325 = vmatprep.subr.bf16.mxu0 %v4296_v0 }
 0x4ce   :  { %3306 = vmatpush3.bf16.msra.mxu1 %v3600_v45 }
 0x4cf   :  { %3307 = vmatprep.subr.bf16.mxu1 %v4296_v0  ;;  %3326 = vmatpush3.bf16.msra.mxu0 %v3615_v55  ;;  %v3636_v55 = vld [vmem:[#allocation20 + $0x8] sm:$0xff]  }
 0x4d0   :  { %3327 = vmatprep.subr.bf16.mxu0 %v4296_v0 }
 0x4d2   :  { %3308 = vmatpush3.bf16.msra.mxu1 %v3602_v47 }
 0x4d3   :  { %3333 = vmatprep.subr.bf16.mxu1 %v4296_v0  ;;  %3328 = vmatpush3.bf16.msra.mxu0 %v3617_v56  ;;  %v3637_v56 = vld [vmem:[#allocation20 + $0x10] sm:$0xff]  }
 0x4d4   :  { %3353 = vmatprep.subr.bf16.mxu0 %v4296_v0 }
 0x4d6   :  { %3330 = vmatmul.mubr.bf16.vlgmr.msra.gmra.mrb[24].mxu0 %v3667_v49 }
 0x4d7   :  { %3369 = vmatprep.mubr.msk.bf16.mxu0 %vm4297_vm0, %v4296_v0  ;;  %3354 = vmatpush3.bf16.msra.mxu0 %v3619_v57  ;;  %v3638_v57 = vld [vmem:[#allocation20 + $0x18] sm:$0xff]  }
 0x4d8   :  { %3355 = vmatprep.subr.bf16.mxu0 %v4296_v0 }
 0x4db   :  { %3356 = vmatpush3.bf16.msra.mxu0 %v3620_v58  ;;  %v3639_v58 = vld [vmem:[#allocation20 + $0x20] sm:$0xff]  }
 0x4dc   :  { %3357 = vmatprep.subr.bf16.mxu0 %v4296_v0 }
 0x4df   :  { %3358 = vmatpush3.bf16.msra.mxu0 %v3621_v59  ;;  %v3640_v59 = vld [vmem:[#allocation20 + $0x28] sm:$0xff]  }
 0x4e0   :  { %3359 = vmatprep.subr.bf16.mxu0 %v4296_v0 }
 0x4e3   :  { %3360 = vmatpush3.bf16.msra.mxu0 %v3622_v60 }
 0x4e4   :  { %3361 = vmatprep.subr.bf16.mxu0 %v4296_v0 }
 0x4e7   :  { %3362 = vmatpush3.bf16.msra.mxu0 %v3623_v61  ;;  %v2838_v61 = vld [vmem:[%s5160_s23 + $0xc] ss:$0 sm:$0xff] }
 0x4e8   :  { %3363 = vmatprep.subr.bf16.mxu0 %v4296_v0 }
 0x4eb   :  { %3364 = vmatpush3.bf16.msra.mxu0 %v3624_v25 }
 0x4ec   :  { %3365 = vmatprep.subr.bf16.mxu0 %v4296_v0 }
 0x4ef   :  { %3366 = vmatpush3.bf16.msra.mxu0 %v3625_v28  ;;  %v3651_v28 = vld [vmem:[#allocation22] sm:$0xff]  }
 0x4f0   :  { %3367 = vmatprep.subr.bf16.mxu0 %v4296_v0 }
 0x4f3   :  { %3368 = vmatpush3.bf16.msra.mxu0 %v3626_v29 }
 0x4f4   :  { %3393 = vmatprep.subr.bf16.mxu0 %v4296_v0 }
 0x568   :  { %v1400_v63 = vpop.f32.mrb[16].mxu0 }
 0x569   :  { %v1401_v1 = vadd.f32 %v2787_v62, %v1400_v63  ;;  %v3251_v2 = vpop.f32.mrb[17].mxu0 }
 0x56a   :  { %v1403_v3 = vpop.f32.mrb[18].mxu0 }
 0x56b   :  { %1407 = vst [vmem:[#allocation37] sm:$0xff] %v1401_v1  ;;  %v1404_v4 = vadd.f32 %v2787_v62, %v1403_v3  ;;  %v3252_v5 = vpop.f32.mrb[19].mxu0 }
 0x56d   :  { %1408 = vst [vmem:[#allocation37 + $0x8] sm:$0xff] %v1404_v4  ;;  %v1409_v7 = vpack.c.bf16 %v1404_v4, %v1401_v1 }
 0x56f   :  { %3310 = vmatmul.mubr.bf16.vlgmr.msra.gmra.mrb[20].mxu1 %v1409_v7 }
 0x570   :  { %3334 = vmatpush3.bf16.msra.mxu1 %v3604_v6  ;;  %3349 = vmatprep.mubr.msk.bf16.mxu1 %vm4297_vm0, %v4296_v0 }
 0x571   :  { %3335 = vmatprep.subr.bf16.mxu1 %v4296_v0 }
 0x574   :  { %3336 = vmatpush3.bf16.msra.mxu1 %v3606_v8 }
 0x575   :  { %3337 = vmatprep.subr.bf16.mxu1 %v4296_v0 }
 0x578   :  { %3338 = vmatpush3.bf16.msra.mxu1 %v3608_v9  ;;  %v3641_v9 = vld [vmem:[#allocation20 + $0x30] sm:$0xff]  }
 0x579   :  { %3339 = vmatprep.subr.bf16.mxu1 %v4296_v0 }
 0x57c   :  { %3340 = vmatpush3.bf16.msra.mxu1 %v3610_v10  ;;  %v3642_v10 = vld [vmem:[#allocation20 + $0x38] sm:$0xff]  }
 0x57d   :  { %3341 = vmatprep.subr.bf16.mxu1 %v4296_v0 }
 0x580   :  { %3342 = vmatpush3.bf16.msra.mxu1 %v3612_v11  ;;  %v3643_v11 = vld [vmem:[#allocation34] sm:$0xff]  }
 0x581   :  { %3343 = vmatprep.subr.bf16.mxu1 %v4296_v0 }
 0x584   :  { %3344 = vmatpush3.bf16.msra.mxu1 %v3614_v12  ;;  %v3644_v12 = vld [vmem:[#allocation34 + $0x8] sm:$0xff]  }
 0x585   :  { %3345 = vmatprep.subr.bf16.mxu1 %v4296_v0 }
 0x588   :  { %v1513_v15 = vpop.f32.mrb[16].mxu1  ;;  %3346 = vmatpush3.bf16.msra.mxu1 %v3616_v13  ;;  %v1637_v23 = vpop.f32.mrb[20].mxu0  ;;  %v3645_v13 = vld [vmem:[#allocation34 + $0x10] sm:$0xff]  }
 0x589   :  { %v1514_v17 = vadd.f32 %v2796_v14, %v1513_v15  ;;  %v3271_v18 = vpop.f32.mrb[17].mxu1  ;;  %3347 = vmatprep.subr.bf16.mxu1 %v4296_v0  ;;  %v3291_v24 = vpop.f32.mrb[21].mxu0  ;;  %v3647_v15 = vld [vmem:[#allocation34 + $0x20] sm:$0xff]  }
 0x58a   :  { %v1516_v19 = vpop.f32.mrb[18].mxu1  ;;  %v1640_v26 = vpop.f32.mrb[22].mxu0  ;;  %v3650_v18 = vld [vmem:[#allocation34 + $0x38] sm:$0xff]  }
 0x58b   :  { %1520 = vst [vmem:[#allocation40] sm:$0xff] %v1514_v17  ;;  %v1517_v20 = vadd.f32 %v2796_v14, %v1516_v19  ;;  %v3272_v21 = vpop.f32.mrb[19].mxu1  ;;  %v3292_v27 = vpop.f32.mrb[23].mxu0  ;;  %v3646_v14 = vld [vmem:[#allocation34 + $0x18] sm:$0xff]  }
 0x58c   :  { %3348 = vmatpush3.bf16.msra.mxu1 %v3618_v16  ;;  %v3648_v16 = vld [vmem:[#allocation34 + $0x28] sm:$0xff]   ;;  %v2839_v19 = vld [vmem:[%s5160_s23 + $0x5] ss:$0 sm:$0xff] }
 0x58d   :  { %1521 = vst [vmem:[#allocation40 + $0x8] sm:$0xff] %v1517_v20  ;;  %v1522_v22 = vpack.c.bf16 %v1517_v20, %v1514_v17  ;;  %3373 = vmatprep.subr.bf16.mxu1 %v4296_v0  ;;  %v3649_v17 = vld [vmem:[#allocation34 + $0x30] sm:$0xff]  }
 0x58f   :  { %3350 = vmatmul.mubr.bf16.vlgmr.msra.gmra.mrb[24].mxu1 %v1522_v22 }
 0x590   :  { %3389 = vmatprep.mubr.msk.bf16.mxu1 %vm4297_vm0, %v4296_v0  ;;  %3374 = vmatpush3.bf16.msra.mxu1 %v3627_v30  ;;  %v3652_v30 = vld [vmem:[#allocation22 + $0x8] sm:$0xff]  }
 0x591   :  { %3375 = vmatprep.subr.bf16.mxu1 %v4296_v0 }
 0x594   :  { %3376 = vmatpush3.bf16.msra.mxu1 %v3628_v31  ;;  %v3653_v31 = vld [vmem:[#allocation22 + $0x10] sm:$0xff]  }
 0x595   :  { %3377 = vmatprep.subr.bf16.mxu1 %v4296_v0 }
 0x598   :  { %3378 = vmatpush3.bf16.msra.mxu1 %v3629_v32  ;;  %v3654_v32 = vld [vmem:[#allocation22 + $0x18] sm:$0xff]  }
 0x599   :  { %3379 = vmatprep.subr.bf16.mxu1 %v4296_v0 }
 0x59c   :  { %3380 = vmatpush3.bf16.msra.mxu1 %v3630_v33  ;;  %v3655_v33 = vld [vmem:[#allocation22 + $0x20] sm:$0xff]  }
 0x59d   :  { %3381 = vmatprep.subr.bf16.mxu1 %v4296_v0 }
 0x5a0   :  { %3382 = vmatpush3.bf16.msra.mxu1 %v3631_v34  ;;  %v3656_v34 = vld [vmem:[#allocation22 + $0x28] sm:$0xff]  }
 0x5a1   :  { %3383 = vmatprep.subr.bf16.mxu1 %v4296_v0 }
 0x5a4   :  { %3384 = vmatpush3.bf16.msra.mxu1 %v3632_v37 }
 0x5a5   :  { %3385 = vmatprep.subr.bf16.mxu1 %v4296_v0 }
 0x5a8   :  { %3386 = vmatpush3.bf16.msra.mxu1 %v3633_v40 }
 0x5a9   :  { %v1857_v35 = vpop.f32.mrb[24].mxu0  ;;  %3387 = vmatprep.subr.bf16.mxu1 %v4296_v0 }
 0x5aa   :  { %v3331_v36 = vpop.f32.mrb[25].mxu0 }
 0x5ab   :  { %v1860_v38 = vpop.f32.mrb[26].mxu0 }
 0x5ac   :  { %v3332_v39 = vpop.f32.mrb[27].mxu0  ;;  %3388 = vmatpush3.bf16.msra.mxu1 %v3634_v41 }
 0x5ad   :  { %3413 = vmatprep.subr.bf16.mxu1 %v4296_v0 }
 0x642   :  { %v1726_v42 = vpop.f32.mrb[20].mxu1 }
 0x643   :  { %v1727_v44 = vadd.f32 %v1726_v42, %v1637_v23  ;;  %v3311_v45 = vpop.f32.mrb[21].mxu1 }
 0x644   :  { %v1729_v46 = vpop.f32.mrb[22].mxu1  ;;  %v3657_v45 = vld [vmem:[#allocation22 + $0x30] sm:$0xff]  }
 0x645   :  { %v1738_v47 = vadd.f32 %v2821_v43, %v1727_v44  ;;  %v1730_v48 = vadd.f32 %v1729_v46, %v1640_v26  ;;  %v3312_v49 = vpop.f32.mrb[23].mxu1  ;;  %v3658_v46 = vld [vmem:[#allocation22 + $0x38] sm:$0xff]  }
 0x646   :  { %v3661_v49 = vld [vmem:[#allocation35 + $0x10] sm:$0xff]  }
 0x647   :  { %v1739_v50 = vadd.f32 %v2821_v43, %v1730_v48  ;;  %v1740_v51 = vmax.f32 %v1738_v47, 0.0  ;;  %v3659_v47 = vld [vmem:[#allocation35] sm:$0xff]   ;;  %v3660_v48 = vld [vmem:[#allocation35 + $0x8] sm:$0xff]  }
 0x649   :  { %v1741_v52 = vmax.f32 %v1739_v50, 0.0  ;;  %v3662_v50 = vld [vmem:[#allocation35 + $0x18] sm:$0xff]  }
 0x64b   :  { %v1742_v54 = vpack.c.bf16 %v1741_v52, %v1740_v51  ;;  %v3663_v51 = vld [vmem:[#allocation35 + $0x20] sm:$0xff]   ;;  %v3664_v52 = vld [vmem:[#allocation35 + $0x28] sm:$0xff]  }
 0x64d   :  { %3370 = vmatmul.mubr.bf16.vlgmr.msra.gmra.mrb[28].mxu0 %v1742_v54  ;;  %v3666_v54 = vld [vmem:[#allocation35 + $0x38] sm:$0xff]  }
 0x64e   :  { %3394 = vmatpush3.bf16.msra.mxu0 %v3635_v53  ;;  %3409 = vmatprep.mubr.msk.bf16.mxu0 %vm4297_vm0, %v4296_v0  ;;  %v3665_v53 = vld [vmem:[#allocation35 + $0x30] sm:$0xff]  }
 0x64f   :  { %3395 = vmatprep.subr.bf16.mxu0 %v4296_v0 }
 0x652   :  { %3396 = vmatpush3.bf16.msra.mxu0 %v3636_v55  ;;  %v2857_v55 = vld [vmem:[%s5160_s23 + $0x6] ss:$0 sm:$0xff] }
 0x653   :  { %3397 = vmatprep.subr.bf16.mxu0 %v4296_v0 }
 0x656   :  { %3398 = vmatpush3.bf16.msra.mxu0 %v3637_v56 }
 0x657   :  { %3399 = vmatprep.subr.bf16.mxu0 %v4296_v0 }
 0x65a   :  { %3400 = vmatpush3.bf16.msra.mxu0 %v3638_v57 }
 0x65b   :  { %3401 = vmatprep.subr.bf16.mxu0 %v4296_v0 }
 0x65e   :  { %3402 = vmatpush3.bf16.msra.mxu0 %v3639_v58 }
 0x65f   :  { %3403 = vmatprep.subr.bf16.mxu0 %v4296_v0 }
 0x662   :  { %v1946_v60 = vpop.f32.mrb[24].mxu1  ;;  %3404 = vmatpush3.bf16.msra.mxu0 %v3640_v59 }
 0x663   :  { %v1947_v62 = vadd.f32 %v1946_v60, %v1857_v35  ;;  %v3351_v63 = vpop.f32.mrb[25].mxu1  ;;  %3405 = vmatprep.subr.bf16.mxu0 %v4296_v0  ;;  %v2848_v35 = vld [vmem:[%s5160_s23 + $0xd] ss:$0 sm:$0xff] }
 0x664   :  { %v1949_v1 = vpop.f32.mrb[26].mxu1  ;;  %v2866_v63 = vld [vmem:[%s5160_s23 + $0xe] ss:$0 sm:$0xff] }
 0x665   :  { %v1958_v2 = vadd.f32 %v2838_v61, %v1947_v62  ;;  %v1950_v3 = vadd.f32 %v1949_v1, %v1860_v38  ;;  %v3352_v4 = vpop.f32.mrb[27].mxu1 }
 0x666   :  { %3406 = vmatpush3.bf16.msra.mxu0 %v3641_v9 }
 0x667   :  { %v1959_v5 = vadd.f32 %v2838_v61, %v1950_v3  ;;  %v1960_v6 = vmax.f32 %v1958_v2, 0.0  ;;  %3407 = vmatprep.subr.bf16.mxu0 %v4296_v0 }
 0x669   :  { %v1961_v7 = vmax.f32 %v1959_v5, 0.0 }
 0x66a   :  { %3408 = vmatpush3.bf16.msra.mxu0 %v3642_v10 }
 0x66b   :  { %v1962_v8 = vpack.c.bf16 %v1961_v7, %v1960_v6  ;;  %3433 = vmatprep.subr.bf16.mxu0 %v4296_v0 }
 0x66d   :  { %3390 = vmatmul.mubr.bf16.vlgmr.msra.gmra.mrb[28].mxu1 %v1962_v8 }
 0x66e   :  { %3429 = vmatprep.mubr.msk.bf16.mxu1 %vm4297_vm0, %v4296_v0  ;;  %3414 = vmatpush3.bf16.msra.mxu1 %v3643_v11 }
 0x66f   :  { %3415 = vmatprep.subr.bf16.mxu1 %v4296_v0 }
 0x672   :  { %3416 = vmatpush3.bf16.msra.mxu1 %v3644_v12 }
 0x673   :  { %3417 = vmatprep.subr.bf16.mxu1 %v4296_v0 }
 0x676   :  { %3418 = vmatpush3.bf16.msra.mxu1 %v3645_v13 }
 0x677   :  { %3419 = vmatprep.subr.bf16.mxu1 %v4296_v0 }
 0x67a   :  { %3420 = vmatpush3.bf16.msra.mxu1 %v3646_v14 }
 0x67b   :  { %3421 = vmatprep.subr.bf16.mxu1 %v4296_v0 }
 0x67e   :  { %3422 = vmatpush3.bf16.msra.mxu1 %v3647_v15 }
 0x67f   :  { %3423 = vmatprep.subr.bf16.mxu1 %v4296_v0 }
 0x682   :  { %3424 = vmatpush3.bf16.msra.mxu1 %v3648_v16 }
 0x683   :  { %3425 = vmatprep.subr.bf16.mxu1 %v4296_v0 }
 0x686   :  { %3426 = vmatpush3.bf16.msra.mxu1 %v3649_v17 }
 0x687   :  { %3427 = vmatprep.subr.bf16.mxu1 %v4296_v0 }
 0x68a   :  { %3428 = vmatpush3.bf16.msra.mxu1 %v3650_v18 }
 0x68b   :  { %3453 = vmatprep.subr.bf16.mxu1 %v4296_v0 }
 0x720   :  { %v2066_v20 = vpop.f32.mrb[28].mxu0 }
 0x721   :  { %v2067_v21 = vadd.f32 %v2839_v19, %v2066_v20  ;;  %v3371_v22 = vpop.f32.mrb[29].mxu0 }
 0x722   :  { %v2069_v23 = vpop.f32.mrb[30].mxu0 }
 0x723   :  { %v2070_v24 = vadd.f32 %v2839_v19, %v2069_v23  ;;  %v3372_v25 = vpop.f32.mrb[31].mxu0  ;;  %v2073_v26 = vmax.f32 %v2067_v21, 0.0 }
 0x725   :  { %v2074_v27 = vmax.f32 %v2070_v24, 0.0 }
 0x727   :  { %v2075_v29 = vpack.c.bf16 %v2074_v27, %v2073_v26 }
 0x729   :  { %3410 = vmatmul.mubr.bf16.vlgmr.msra.gmra.mrb[32].mxu0 %v2075_v29 }
 0x72a   :  { %3434 = vmatpush3.bf16.msra.mxu0 %v3651_v28  ;;  %3449 = vmatprep.mubr.msk.bf16.mxu0 %vm4297_vm0, %v4296_v0 }
 0x72b   :  { %3435 = vmatprep.subr.bf16.mxu0 %v4296_v0 }
 0x72e   :  { %3436 = vmatpush3.bf16.msra.mxu0 %v3652_v30 }
 0x72f   :  { %3437 = vmatprep.subr.bf16.mxu0 %v4296_v0 }
 0x732   :  { %3438 = vmatpush3.bf16.msra.mxu0 %v3653_v31 }
 0x733   :  { %3439 = vmatprep.subr.bf16.mxu0 %v4296_v0 }
 0x736   :  { %3440 = vmatpush3.bf16.msra.mxu0 %v3654_v32 }
 0x737   :  { %3441 = vmatprep.subr.bf16.mxu0 %v4296_v0 }
 0x73a   :  { %3442 = vmatpush3.bf16.msra.mxu0 %v3655_v33 }
 0x73b   :  { %3443 = vmatprep.subr.bf16.mxu0 %v4296_v0 }
 0x73e   :  { %3444 = vmatpush3.bf16.msra.mxu0 %v3656_v34 }
 0x73f   :  { %3445 = vmatprep.subr.bf16.mxu0 %v4296_v0 }
 0x740   :  { %v2179_v36 = vpop.f32.mrb[28].mxu1 }
 0x741   :  { %v2180_v37 = vadd.f32 %v2848_v35, %v2179_v36  ;;  %v3391_v38 = vpop.f32.mrb[29].mxu1 }
 0x742   :  { %v2182_v39 = vpop.f32.mrb[30].mxu1  ;;  %3446 = vmatpush3.bf16.msra.mxu0 %v3657_v45 }
 0x743   :  { %v2183_v40 = vadd.f32 %v2848_v35, %v2182_v39  ;;  %v3392_v41 = vpop.f32.mrb[31].mxu1  ;;  %v2186_v42 = vmax.f32 %v2180_v37, 0.0  ;;  %3447 = vmatprep.subr.bf16.mxu0 %v4296_v0 }
 0x745   :  { %v2187_v43 = vmax.f32 %v2183_v40, 0.0 }
 0x746   :  { %3448 = vmatpush3.bf16.msra.mxu0 %v3658_v46 }
 0x747   :  { %v2188_v44 = vpack.c.bf16 %v2187_v43, %v2186_v42 }
 0x749   :  { %3430 = vmatmul.mubr.bf16.vlgmr.msra.gmra.mrb[32].mxu1 %v2188_v44 }
 0x74a   :  { %3469 = vmatprep.mubr.msk.bf16.mxu1 %vm4297_vm0, %v4296_v0  ;;  %3454 = vmatpush3.bf16.msra.mxu1 %v3659_v47 }
 0x74b   :  { %3455 = vmatprep.subr.bf16.mxu1 %v4296_v0 }
 0x74e   :  { %3456 = vmatpush3.bf16.msra.mxu1 %v3660_v48 }
 0x74f   :  { %3457 = vmatprep.subr.bf16.mxu1 %v4296_v0 }
 0x752   :  { %3458 = vmatpush3.bf16.msra.mxu1 %v3661_v49 }
 0x753   :  { %3459 = vmatprep.subr.bf16.mxu1 %v4296_v0 }
 0x756   :  { %3460 = vmatpush3.bf16.msra.mxu1 %v3662_v50 }
 0x757   :  { %3461 = vmatprep.subr.bf16.mxu1 %v4296_v0 }
 0x75a   :  { %3462 = vmatpush3.bf16.msra.mxu1 %v3663_v51 }
 0x75b   :  { %3463 = vmatprep.subr.bf16.mxu1 %v4296_v0 }
 0x75e   :  { %3464 = vmatpush3.bf16.msra.mxu1 %v3664_v52 }
 0x75f   :  { %3465 = vmatprep.subr.bf16.mxu1 %v4296_v0 }
 0x762   :  { %3466 = vmatpush3.bf16.msra.mxu1 %v3665_v53 }
 0x763   :  { %3467 = vmatprep.subr.bf16.mxu1 %v4296_v0 }
 0x766   :  { %3468 = vmatpush3.bf16.msra.mxu1 %v3666_v54 }
 0x7fc   :  { %v2292_v56 = vpop.f32.mrb[32].mxu0 }
 0x7fd   :  { %v3411_v57 = vpop.f32.mrb[33].mxu0  ;;  %v2293_v59 = vadd.f32 %v2857_v55, %v2292_v56 }
 0x7fe   :  { %v2295_v58 = vpop.f32.mrb[34].mxu0 }
 0x7ff   :  { %v2296_v60 = vadd.f32 %v2857_v55, %v2295_v58  ;;  %v3412_v61 = vpop.f32.mrb[35].mxu0 }
 0x801   :  { %v2299_v62 = vpack.c.bf16 %v2296_v60, %v2293_v59 }
 0x803   :  { %3450 = vmatmul.mubr.bf16.vlgmr.msra.gmra.mrb[36].mxu0 %v2299_v62 }
 0x81c   :  { %v2403_v1 = vpop.f32.mrb[32].mxu1 }
 0x81d   :  { %v3431_v0 = vpop.f32.mrb[33].mxu1  ;;  %v2404_v3 = vadd.f32 %v2866_v63, %v2403_v1 }
 0x81e   :  { %v2406_v2 = vpop.f32.mrb[34].mxu1 }
 0x81f   :  { %v2407_v4 = vadd.f32 %v2866_v63, %v2406_v2  ;;  %v3432_v5 = vpop.f32.mrb[35].mxu1 }
 0x821   :  { %v2410_v6 = vpack.c.bf16 %v2407_v4, %v2404_v3 }
 0x823   :  { %3470 = vmatmul.mubr.bf16.vlgmr.msra.gmra.mrb[36].mxu1 %v2410_v6 }
 0x824   :  { %4163 = shalt.err (!%p4160_p12)
}
 0x825   :  { %s4164_s16 = scalar_lea.hbm %s5161_s24, 256 }
 0x826   :  { %p4165_p13 = scmp.ne.s32.totalorder %s5161_s24, %s4164_s16  ;;  %p4168_p0 = scmp.lt.u32.totalorder %s4164_s16, %s5161_s24 }
 0x828   :  { %p4170_p1 = pnand %p4168_p0, %p4165_p13 }
 0x82a   :  { %4173 = shalt.err (!%p4170_p1)
}
 0x82b   :  { %2646 = dma.vmem_to_hbm [thread:$0]  %s2641_s18, 256, %s5161_s24, [#allocation4], %s5207_s10, %s5207_s10, %s5206_s20  }
 0x82c   :  { %v2875_v7 = vld [vmem:[%s5160_s23 + $0x7] ss:$0 sm:$0xff]  ;;  %s4300_s11 = smov [#allocation38]   ;;  %s4301_s1 = smov [#allocation40]  }
 0x82d   :  { %s2652_s15 = sshll.u32 %s4300_s11, 4  ;;  %s2664_s4 = sshll.u32 %s4301_s1, 4  ;;  %s2653_s15 = int_to_ptr.vmem [resolvable:$true] %s2652_s15  ;;  %s5082_s4 = int_to_ptr.vmem [resolvable:$true] %s2664_s4 }
 0x82e   :  { %s4174_s24 = scalar_lea.vmem %s2653_s15, 256  ;;  %p4179_p3 = scmp.lt.s32.totalorder %s2653_s15, %s2653_s15 }
 0x82f   :  { %p4175_p2 = scmp.ne.s32.totalorder %s2653_s15, %s4174_s24  ;;  %p4180_p4 = scmp.lt.s32.totalorder %s4174_s24, %s4174_s24 }
 0x831   :  { %p4181_p5 = por %p4180_p4, %p4179_p3 }
 0x833   :  { %p4182_p6 = pnand %p4181_p5, %p4175_p2 }
 0x8d6   :  { %v2514_v8 = vpop.f32.mrb[36].mxu0 }
 0x8d7   :  { %v2515_v9 = vadd.f32 %v2875_v7, %v2514_v8  ;;  %v3451_v10 = vpop.f32.mrb[37].mxu0 }
 0x8d8   :  { %v2517_v11 = vpop.f32.mrb[38].mxu0 }
 0x8d9   :  { %2521 = vst [vmem:[#allocation38] sm:$0xff] %v2515_v9  ;;  %v2518_v12 = vadd.f32 %v2875_v7, %v2517_v11  ;;  %v3452_v13 = vpop.f32.mrb[39].mxu0 }
 0x8db   :  { %2522 = vst [vmem:[#allocation38 + $0x8] sm:$0xff] %v2518_v12 }
 0x8dc   :  { %4185 = shalt.err (!%p4182_p6)
}
 0x8dd   :  { %s5217_s6 = sld [smem:[#allocation70_spill]] }
 0x8e3   :  { %s4186_s3 = scalar_lea.hbm %s5217_s6, 256 }
 0x8e4   :  { %p4187_p7 = scmp.ne.s32.totalorder %s5217_s6, %s4186_s3  ;;  %p4190_p8 = scmp.lt.u32.totalorder %s4186_s3, %s5217_s6 }
 0x8e6   :  { %p4192_p9 = pnand %p4190_p8, %p4187_p7 }
 0x8e8   :  { %4195 = shalt.err (!%p4192_p9)
}
 0x8e9   :  { %2658 = dma.vmem_to_hbm [thread:$0]  %s2653_s15, 256, %s5217_s6, [#allocation39], %s5207_s10, %s5207_s10, %s5206_s20  }
 0x8ea   :  { %s4196_s18 = scalar_lea.vmem %s5082_s4, 256  ;;  %p4201_p11 = scmp.lt.s32.totalorder %s5082_s4, %s5082_s4 }
 0x8eb   :  { %p4197_p10 = scmp.ne.s32.totalorder %s5082_s4, %s4196_s18  ;;  %p4202_p12 = scmp.lt.s32.totalorder %s4196_s18, %s4196_s18 }
 0x8ed   :  { %p4203_p13 = por %p4202_p12, %p4201_p11 }
 0x8ef   :  { %p4204_p0 = pnand %p4203_p13, %p4197_p10 }
 0x8f1   :  { %4207 = shalt.err (!%p4204_p0)
}
 0x8f2   :  { %s5218_s0 = sld [smem:[#allocation71_spill]] }
 0x8f8   :  { %s4208_s16 = scalar_lea.hbm %s5218_s0, 256 }
 0x8f9   :  { %p4209_p1 = scmp.ne.s32.totalorder %s5218_s0, %s4208_s16  ;;  %p4212_p2 = scmp.lt.u32.totalorder %s4208_s16, %s5218_s0 }
 0x8fb   :  { %p4214_p3 = pnand %p4212_p2, %p4209_p1 }
 0x8fd   :  { %4217 = shalt.err (!%p4214_p3)
}
 0x8fe   :  { %2670 = dma.vmem_to_hbm [thread:$0]  %s5082_s4, 256, %s5218_s0, [#allocation39], %s5207_s10, %s5207_s10, %s5206_s20   ;;  %v2626_v15 = vpop.f32.mrb[36].mxu1 }
 0x8ff   :  { %v2884_v14 = vld [vmem:[%s5160_s23 + $0xf] ss:$0 sm:$0xff]  ;;  %s4302_s11 = smov [#allocation41]   ;;  %v3471_v17 = vpop.f32.mrb[37].mxu1 }
 0x900   :  { %s2676_s15 = sshll.u32 %s4302_s11, 4  ;;  %v2627_v16 = vadd.f32 %v2884_v14, %v2626_v15  ;;  %v2629_v18 = vpop.f32.mrb[38].mxu1  ;;  %s2677_s15 = int_to_ptr.vmem [resolvable:$true] %s2676_s15 }
 0x901   :  { %v2630_v19 = vadd.f32 %v2884_v14, %v2629_v18  ;;  %v3472_v20 = vpop.f32.mrb[39].mxu1  ;;  %s4218_s1 = scalar_lea.vmem %s2677_s15, 256  ;;  %p4223_p5 = scmp.lt.s32.totalorder %s2677_s15, %s2677_s15 }
 0x902   :  { %2633 = vst [vmem:[#allocation41] sm:$0xff] %v2627_v16  ;;  %p4219_p4 = scmp.ne.s32.totalorder %s2677_s15, %s4218_s1  ;;  %p4224_p6 = scmp.lt.s32.totalorder %s4218_s1, %s4218_s1 }
 0x903   :  { %2634 = vst [vmem:[#allocation41 + $0x8] sm:$0xff] %v2630_v19 }
 0x904   :  { %p4225_p7 = por %p4224_p6, %p4223_p5 }
 0x906   :  { %p4226_p8 = pnand %p4225_p7, %p4219_p4 }
 0x908   :  { %4229 = shalt.err (!%p4226_p8)
}
 0x909   :  { %s5219_s24 = sld [smem:[#allocation72_spill]] }
 0x90f   :  { %s4230_s25 = scalar_lea.hbm %s5219_s24, 256 }
 0x910   :  { %p4231_p9 = scmp.ne.s32.totalorder %s5219_s24, %s4230_s25  ;;  %p4234_p10 = scmp.lt.u32.totalorder %s4230_s25, %s5219_s24 }
 0x912   :  { %p4236_p11 = pnand %p4234_p10, %p4231_p9 }
 0x914   :  { %4239 = shalt.err (!%p4236_p11)
}
 0x915   :  { %2682 = dma.vmem_to_hbm [thread:$0]  %s2677_s15, 256, %s5219_s24, [#allocation42], %s5207_s10, %s5207_s10, %s5206_s20  }
 0x916   :  { %4264 = dma.done.wait [#allocation4], 256  }
 0x917   :  { %4265 = vsyncadd [#allocation4], 4294967040 }
 0x918   :  { %4266 = dma.done.wait [#allocation39], 512  }
 0x919   :  { %4267 = vsyncadd [#allocation39], 4294966784 }
 0x91a   :  { %4268 = dma.done.wait [#allocation42], 256  }
 0x91b   :  { %4269 = vsyncadd [#allocation42], 4294967040 }
 0x91c   :  { %2695 = vsyncpa [#allocation3], 1 }
 0x91d   :  { %2696 = vsyncpa [#allocation6], 1 }
 0x91e   :  { %2697 = vsyncpa [#allocation9], 1 }
 0x91f   :  { %2698 = vsyncpa [#allocation12], 1 }
 0x920   :  { %2699 = vsyncpa [#allocation15], 1 }
 0x921   :  { %2700 = vsyncpa [#allocation18], 1 }
 0x922   :  { %2701 = vsyncpa [#allocation21], 1 }
 0x923   :  { %2702 = vsyncpa [#allocation24], 1 }
 0x924   :  { %2703 = vsyncpa [#allocation27], 1 }
 0x925   :  { %2704 = vsyncpa [#allocation30], 1 }
 0x926   :  { %2705 = vsyncpa [#allocation33], 1 }
 0x927   :  { %2706 = vsyncpa [#allocation36], 1 }
 0x928   :  { %2707 = vsyncpa [#allocation4], 1 }
 0x929   :  { %2708 = vsyncpa [#allocation39], 1 }
 0x92a   :  { %2709 = vsyncpa [#allocation42], 1 }

</bundles_post_ra>
